<compile_context>
chip_gen: v7x
topology: tpu7x:2x2x1
jax: 0.10.0
libtpu: 0.0.40
codegen_flags: <defaults>
</compile_context>

<pallas_src>
import functools

import numpy as np
import jax
import jax.numpy as jnp
from jax.experimental import pallas as pl
from jax.experimental.pallas import tpu as pltpu


# ---------------------------------------------------------------------------
# Fused forward kernel: one grid step == one batch element, everything in VMEM.
# ---------------------------------------------------------------------------
def _gated_stgcn_kernel(*refs, Kcheb, Kt, pad, T):
    (x_ref, scale_ref, shift_ref, kron_ref, tmat_ref, sel_ref,
     hw_ref, hb_ref) = refs[:8]
    out_ref = refs[-1]
    block_refs = refs[8:-1]

    def mxu(a, b):
        # bf16 MXU operands, f32 accumulation (f32 epilogues everywhere else).
        return jnp.dot(a.astype(jnp.bfloat16), b.astype(jnp.bfloat16),
                       preferred_element_type=jnp.float32)

    def tshifts(v):
        # Temporal shift by s = kt - pad within each node's T-block (zero fill
        # at node boundaries), realized as matmuls with precomputed 0/1 matrices.
        return [v if kt == pad else mxu(v, tmat_ref[kt]) for kt in range(Kt)]

    def conv_t(xs, w_ref, b_ref):
        # (1, Kt) conv:  sum_kt W[kt] @ shift_{kt-pad}(x)  + bias
        w = w_ref[...]                       # (Kt, Cout, Cin) f32
        acc = None
        for kt in range(Kt):
            term = mxu(w[kt], xs[kt])
            acc = term if acc is None else acc + term
        return acc + b_ref[...]              # bias (Cout, 1) broadcast over lanes

    def st_block(v, brefs):
        (rw, rb, t1w, t1b, gw, gb, t2fw, t2fb, t2gw, t2gb) = brefs
        # residual 1x1 conv
        x_res = mxu(rw[...], v) + rb[...]
        # temporal conv + fused residual add + ReLU
        xs = tshifts(v)
        x1 = jnp.maximum(conv_t(xs, t1w, t1b) + x_res, 0.0)
        # Chebyshev graph conv fused with its 1x1 channel mix:
        #   x2 = relu( sum_k Wg_k @ (x1 @ (L_k^T ⊗ I_T)) + bg )
        gwv = gw[...]                        # (K, Cout, Cout)
        acc = None
        for k in range(Kcheb):
            yk = mxu(x1, kron_ref[k])        # (C, NT) spatial mixing, K=128 contraction
            term = mxu(gwv[k], yk)           # (Cout, NT) channel mixing
            acc = term if acc is None else acc + term
        x2 = jnp.maximum(acc + gb[...], 0.0)
        # gated temporal conv (filter / gate share the shifted views)
        xs2 = tshifts(x2)
        filt = conv_t(xs2, t2fw, t2fb)
        gate = conv_t(xs2, t2gw, t2gb)
        return (filt + x2) * jax.nn.sigmoid(gate)

    # BatchNorm (per-channel affine precomputed on the host side of the call)
    x = x_ref[0].astype(jnp.float32) * scale_ref[...] + shift_ref[...]

    n_per_block = 10
    n_blocks = len(block_refs) // n_per_block
    for bi in range(n_blocks):
        x = st_block(x, block_refs[bi * n_per_block:(bi + 1) * n_per_block])

    # (1, recent) read-out head:  out[co, n] = sum_{c,t} Wh[co,c,t] * x[c, n*T+t]
    acc = None
    for t in range(T):
        xt = mxu(x, sel_ref[t])              # (Cout, N): column n*T+t of every node
        term = mxu(hw_ref[t], xt)            # (12, N)
        acc = term if acc is None else acc + term
    out_ref[0] = (acc + hb_ref[...]).astype(out_ref.dtype)


# ---------------------------------------------------------------------------
# Static helper matrices (built with numpy at trace time).
# ---------------------------------------------------------------------------
def _shift_matrix(N, T, s):
    """M such that (x @ M)[c, n*T+t] = x[c, n*T+t+s] if 0<=t+s<T else 0."""
    NT = N * T
    m = np.zeros((NT, NT), np.float32)
    for n in range(N):
        for t in range(T):
            if 0 <= t + s < T:
                m[n * T + t + s, n * T + t] = 1.0
    return m


def _select_matrices(N, T):
    """sel[t][j, n] = 1 iff j == n*T + t  (picks temporal tap t of every node)."""
    NT = N * T
    sel = np.zeros((T, NT, N), np.float32)
    for t in range(T):
        for n in range(N):
            sel[t, n * T + t, n] = 1.0
    return sel


# ---------------------------------------------------------------------------
# Forward wrapper: parameter re-layout + one pallas_call.
# ---------------------------------------------------------------------------
def gated_stgcn_forward(params, x_w, x_d, x_r, supports, *, c_out, Kcheb, Kt=3):
    del x_w, x_d  # Gated_STGCN only consumes x_r (matches the reference model)
    f32 = jnp.float32
    B, c_in, N, T = x_r.shape
    NT = N * T
    pad = 1  # ST_BLOCK_4 uses padding=(0,1) for its (1,Kt) convs

    x_flat = x_r.reshape(B, c_in, NT).astype(f32)

    # BatchNorm2d(c_in, affine=False), training mode: batch statistics, eps=1e-5.
    # (tiny cross-batch reduction done in plain JAX; per-channel scale/shift
    #  applied inside the fused kernel)
    mean = jnp.mean(x_flat, axis=(0, 2))
    var = jnp.var(x_flat, axis=(0, 2))
    inv = jax.lax.rsqrt(var + 1e-5)
    bn_scale = inv.reshape(c_in, 1).astype(f32)
    bn_shift = (-mean * inv).reshape(c_in, 1).astype(f32)

    # Chebyshev polynomials of the support lifted with ⊗ I_T so the node
    # contraction is a lane-dense (C, NT) @ (NT, NT) matmul inside the kernel.
    A = supports.astype(f32)
    Ls = [jnp.eye(N, dtype=f32), A]
    for _ in range(2, Kcheb):
        Ls.append(2.0 * (A @ Ls[-1]) - Ls[-2])
    eyeT = jnp.eye(T, dtype=f32)
    kron = jnp.stack([jnp.kron(Lk.T, eyeT) for Lk in Ls[:Kcheb]], axis=0)
    kron = kron.astype(jnp.bfloat16)                                  # (K, NT, NT)

    tmat = jnp.asarray(
        np.stack([_shift_matrix(N, T, kt - pad) for kt in range(Kt)], 0),
        dtype=jnp.bfloat16)                                           # (Kt, NT, NT)
    sel = jnp.asarray(_select_matrices(N, T), dtype=jnp.bfloat16)     # (T, NT, N)

    def prep_block(p):
        co = p["res_w"].shape[0]
        rw = p["res_w"][:, :, 0, 0].astype(f32)                       # (Cout, Cin)
        rb = p["res_b"].reshape(co, 1).astype(f32)
        t1w = jnp.transpose(p["t1_w"][:, :, 0, :], (2, 0, 1)).astype(f32)  # (Kt,Co,Ci)
        t1b = p["t1_b"].reshape(co, 1).astype(f32)
        # cheby_conv weight layout: channel = c*K + k (c-major), split into per-k mats
        gw = jnp.transpose(p["gcn_w"][:, :, 0, 0].reshape(co, co, Kcheb),
                           (2, 0, 1)).astype(f32)                     # (K, Co, Co)
        gb = p["gcn_b"].reshape(co, 1).astype(f32)
        t2w = p["t2_w"][:, :, 0, :]                                   # (2Co, Co, Kt)
        t2fw = jnp.transpose(t2w[:co], (2, 0, 1)).astype(f32)
        t2gw = jnp.transpose(t2w[co:], (2, 0, 1)).astype(f32)
        t2fb = p["t2_b"][:co].reshape(co, 1).astype(f32)
        t2gb = p["t2_b"][co:].reshape(co, 1).astype(f32)
        return [rw, rb, t1w, t1b, gw, gb, t2fw, t2fb, t2gw, t2gb]

    block_params = []
    for name in ("block1", "block2", "block3"):
        block_params += prep_block(params[name])

    hw = jnp.transpose(params["head_w"][:, :, 0, :], (2, 0, 1)).astype(f32)  # (T,12,Co)
    hb = params["head_b"].reshape(12, 1).astype(f32)

    inputs = [x_flat, bn_scale, bn_shift, kron, tmat, sel, hw, hb] + block_params

    def full_spec(a):
        zeros = (0,) * a.ndim
        return pl.BlockSpec(a.shape, lambda b: zeros)

    in_specs = [pl.BlockSpec((1, c_in, NT), lambda b: (b, 0, 0))]
    in_specs += [full_spec(a) for a in inputs[1:]]

    out = pl.pallas_call(
        functools.partial(_gated_stgcn_kernel, Kcheb=Kcheb, Kt=Kt, pad=pad, T=T),
        out_shape=jax.ShapeDtypeStruct((B, 12, N), f32),
        grid=(B,),
        in_specs=in_specs,
        out_specs=pl.BlockSpec((1, 12, N), lambda b: (b, 0, 0)),
        compiler_params=pltpu.CompilerParams(dimension_semantics=("parallel",)),
    )(*inputs)

    # torch: conv1(x).squeeze().permute(0, 2, 1)  ->  (B, N, 12)
    return jnp.transpose(out, (0, 2, 1)), supports, supports


# ---------------------------------------------------------------------------
# Deterministic parameter init (mimics torch Conv2d default: U(-1/sqrt(fan_in), +))
# ---------------------------------------------------------------------------
def _conv_init(key, cout, cin, kh, kw):
    k1, k2 = jax.random.split(key)
    bound = 1.0 / np.sqrt(cin * kh * kw)
    w = jax.random.uniform(k1, (cout, cin, kh, kw), jnp.float32, -bound, bound)
    b = jax.random.uniform(k2, (cout,), jnp.float32, -bound, bound)
    return w, b


def init_block(key, c_in, c_out, Kcheb, Kt):
    ks = jax.random.split(key, 4)
    p = {}
    p["t1_w"], p["t1_b"] = _conv_init(ks[0], c_out, c_in, 1, Kt)            # conv1
    p["gcn_w"], p["gcn_b"] = _conv_init(ks[1], c_out, Kcheb * c_out, 1, 1)  # cheby_conv.conv1
    p["t2_w"], p["t2_b"] = _conv_init(ks[2], 2 * c_out, c_out, 1, Kt)       # conv2
    p["res_w"], p["res_b"] = _conv_init(ks[3], c_out, c_in, 1, 1)           # conv_1
    return p


def init_params(key, c_in, c_out, Kcheb, Kt, recent):
    ks = jax.random.split(key, 4)
    params = {
        "block1": init_block(ks[0], c_in, c_out, Kcheb, Kt),
        "block2": init_block(ks[1], c_out, c_out, Kcheb, Kt),
        "block3": init_block(ks[2], c_out, c_out, Kcheb, Kt),
    }
    params["head_w"], params["head_b"] = _conv_init(ks[3], 12, c_out, 1, recent)
    return params


# ---------------------------------------------------------------------------
if __name__ == "__main__":
    B = 2
    c_in, c_out = 4, 8
    num_nodes = 16
    week, day, recent = 4, 4, 8
    Kcheb, Kt = 3, 3

    key = jax.random.PRNGKey(0)
    kp, kw_, kd_, kr_, ka_ = jax.random.split(key, 5)

    params = init_params(kp, c_in, c_out, Kcheb, Kt, recent)

    x_w = jax.random.normal(kw_, (B, c_in, num_nodes, week), jnp.float32)
    x_d = jax.random.normal(kd_, (B, c_in, num_nodes, day), jnp.float32)
    x_r = jax.random.normal(kr_, (B, c_in, num_nodes, recent), jnp.float32)
    a = jax.random.uniform(ka_, (num_nodes, num_nodes), jnp.float32)
    supports = 0.1 * (a + a.T)                                  # symmetric "support"

    fwd = jax.jit(functools.partial(gated_stgcn_forward,
                                    c_out=c_out, Kcheb=Kcheb, Kt=Kt))
    out, s1, s2 = fwd(params, x_w, x_d, x_r, supports)
    jax.block_until_ready(out)

    assert out.shape == (B, num_nodes, 12)
    assert bool(jnp.all(jnp.isfinite(out)))
    print("KERNEL_OK")
</pallas_src>

<mosaic_0001>
module attributes {stable_mosaic.version = 11 : i64} {
  func.func @_gated_stgcn_kernel(%arg0: i32, %arg1: memref<1x4x128xf32, #tpu.memory_space<vmem>>, %arg2: memref<4x1xf32, #tpu.memory_space<vmem>>, %arg3: memref<4x1xf32, #tpu.memory_space<vmem>>, %arg4: memref<3x128x128xbf16, #tpu.memory_space<vmem>>, %arg5: memref<3x128x128xbf16, #tpu.memory_space<vmem>>, %arg6: memref<8x128x16xbf16, #tpu.memory_space<vmem>>, %arg7: memref<8x12x8xf32, #tpu.memory_space<vmem>>, %arg8: memref<12x1xf32, #tpu.memory_space<vmem>>, %arg9: memref<8x4xf32, #tpu.memory_space<vmem>>, %arg10: memref<8x1xf32, #tpu.memory_space<vmem>>, %arg11: memref<3x8x4xf32, #tpu.memory_space<vmem>>, %arg12: memref<8x1xf32, #tpu.memory_space<vmem>>, %arg13: memref<3x8x8xf32, #tpu.memory_space<vmem>>, %arg14: memref<8x1xf32, #tpu.memory_space<vmem>>, %arg15: memref<3x8x8xf32, #tpu.memory_space<vmem>>, %arg16: memref<8x1xf32, #tpu.memory_space<vmem>>, %arg17: memref<3x8x8xf32, #tpu.memory_space<vmem>>, %arg18: memref<8x1xf32, #tpu.memory_space<vmem>>, %arg19: memref<8x8xf32, #tpu.memory_space<vmem>>, %arg20: memref<8x1xf32, #tpu.memory_space<vmem>>, %arg21: memref<3x8x8xf32, #tpu.memory_space<vmem>>, %arg22: memref<8x1xf32, #tpu.memory_space<vmem>>, %arg23: memref<3x8x8xf32, #tpu.memory_space<vmem>>, %arg24: memref<8x1xf32, #tpu.memory_space<vmem>>, %arg25: memref<3x8x8xf32, #tpu.memory_space<vmem>>, %arg26: memref<8x1xf32, #tpu.memory_space<vmem>>, %arg27: memref<3x8x8xf32, #tpu.memory_space<vmem>>, %arg28: memref<8x1xf32, #tpu.memory_space<vmem>>, %arg29: memref<8x8xf32, #tpu.memory_space<vmem>>, %arg30: memref<8x1xf32, #tpu.memory_space<vmem>>, %arg31: memref<3x8x8xf32, #tpu.memory_space<vmem>>, %arg32: memref<8x1xf32, #tpu.memory_space<vmem>>, %arg33: memref<3x8x8xf32, #tpu.memory_space<vmem>>, %arg34: memref<8x1xf32, #tpu.memory_space<vmem>>, %arg35: memref<3x8x8xf32, #tpu.memory_space<vmem>>, %arg36: memref<8x1xf32, #tpu.memory_space<vmem>>, %arg37: memref<3x8x8xf32, #tpu.memory_space<vmem>>, %arg38: memref<8x1xf32, #tpu.memory_space<vmem>>, %arg39: memref<1x12x16xf32, #tpu.memory_space<vmem>>) attributes {dimension_semantics = [#tpu.dimension_semantics<parallel>], iteration_bounds = array<i64: 2>, scalar_prefetch = 0 : i64, scratch_operands = 0 : i64, tpu.core_type = #tpu.core_type<tc>, window_params = [{transform_indices = @transform_0, window_bounds = array<i64: 1, 4, 128>}, {pipeline_mode = #tpu.pipeline_mode<synchronous>, transform_indices = @transform_1, window_bounds = array<i64: 4, 1>}, {pipeline_mode = #tpu.pipeline_mode<synchronous>, transform_indices = @transform_2, window_bounds = array<i64: 4, 1>}, {pipeline_mode = #tpu.pipeline_mode<synchronous>, transform_indices = @transform_3, window_bounds = array<i64: 3, 128, 128>}, {pipeline_mode = #tpu.pipeline_mode<synchronous>, transform_indices = @transform_4, window_bounds = array<i64: 3, 128, 128>}, {pipeline_mode = #tpu.pipeline_mode<synchronous>, transform_indices = @transform_5, window_bounds = array<i64: 8, 128, 16>}, {pipeline_mode = #tpu.pipeline_mode<synchronous>, transform_indices = @transform_6, window_bounds = array<i64: 8, 12, 8>}, {pipeline_mode = #tpu.pipeline_mode<synchronous>, transform_indices = @transform_7, window_bounds = array<i64: 12, 1>}, {pipeline_mode = #tpu.pipeline_mode<synchronous>, transform_indices = @transform_8, window_bounds = array<i64: 8, 4>}, {pipeline_mode = #tpu.pipeline_mode<synchronous>, transform_indices = @transform_9, window_bounds = array<i64: 8, 1>}, {pipeline_mode = #tpu.pipeline_mode<synchronous>, transform_indices = @transform_10, window_bounds = array<i64: 3, 8, 4>}, {pipeline_mode = #tpu.pipeline_mode<synchronous>, transform_indices = @transform_11, window_bounds = array<i64: 8, 1>}, {pipeline_mode = #tpu.pipeline_mode<synchronous>, transform_indices = @transform_12, window_bounds = array<i64: 3, 8, 8>}, {pipeline_mode = #tpu.pipeline_mode<synchronous>, transform_indices = @transform_13, window_bounds = array<i64: 8, 1>}, {pipeline_mode = #tpu.pipeline_mode<synchronous>, transform_indices = @transform_14, window_bounds = array<i64: 3, 8, 8>}, {pipeline_mode = #tpu.pipeline_mode<synchronous>, transform_indices = @transform_15, window_bounds = array<i64: 8, 1>}, {pipeline_mode = #tpu.pipeline_mode<synchronous>, transform_indices = @transform_16, window_bounds = array<i64: 3, 8, 8>}, {pipeline_mode = #tpu.pipeline_mode<synchronous>, transform_indices = @transform_17, window_bounds = array<i64: 8, 1>}, {pipeline_mode = #tpu.pipeline_mode<synchronous>, transform_indices = @transform_18, window_bounds = array<i64: 8, 8>}, {pipeline_mode = #tpu.pipeline_mode<synchronous>, transform_indices = @transform_19, window_bounds = array<i64: 8, 1>}, {pipeline_mode = #tpu.pipeline_mode<synchronous>, transform_indices = @transform_20, window_bounds = array<i64: 3, 8, 8>}, {pipeline_mode = #tpu.pipeline_mode<synchronous>, transform_indices = @transform_21, window_bounds = array<i64: 8, 1>}, {pipeline_mode = #tpu.pipeline_mode<synchronous>, transform_indices = @transform_22, window_bounds = array<i64: 3, 8, 8>}, {pipeline_mode = #tpu.pipeline_mode<synchronous>, transform_indices = @transform_23, window_bounds = array<i64: 8, 1>}, {pipeline_mode = #tpu.pipeline_mode<synchronous>, transform_indices = @transform_24, window_bounds = array<i64: 3, 8, 8>}, {pipeline_mode = #tpu.pipeline_mode<synchronous>, transform_indices = @transform_25, window_bounds = array<i64: 8, 1>}, {pipeline_mode = #tpu.pipeline_mode<synchronous>, transform_indices = @transform_26, window_bounds = array<i64: 3, 8, 8>}, {pipeline_mode = #tpu.pipeline_mode<synchronous>, transform_indices = @transform_27, window_bounds = array<i64: 8, 1>}, {pipeline_mode = #tpu.pipeline_mode<synchronous>, transform_indices = @transform_28, window_bounds = array<i64: 8, 8>}, {pipeline_mode = #tpu.pipeline_mode<synchronous>, transform_indices = @transform_29, window_bounds = array<i64: 8, 1>}, {pipeline_mode = #tpu.pipeline_mode<synchronous>, transform_indices = @transform_30, window_bounds = array<i64: 3, 8, 8>}, {pipeline_mode = #tpu.pipeline_mode<synchronous>, transform_indices = @transform_31, window_bounds = array<i64: 8, 1>}, {pipeline_mode = #tpu.pipeline_mode<synchronous>, transform_indices = @transform_32, window_bounds = array<i64: 3, 8, 8>}, {pipeline_mode = #tpu.pipeline_mode<synchronous>, transform_indices = @transform_33, window_bounds = array<i64: 8, 1>}, {pipeline_mode = #tpu.pipeline_mode<synchronous>, transform_indices = @transform_34, window_bounds = array<i64: 3, 8, 8>}, {pipeline_mode = #tpu.pipeline_mode<synchronous>, transform_indices = @transform_35, window_bounds = array<i64: 8, 1>}, {pipeline_mode = #tpu.pipeline_mode<synchronous>, transform_indices = @transform_36, window_bounds = array<i64: 3, 8, 8>}, {pipeline_mode = #tpu.pipeline_mode<synchronous>, transform_indices = @transform_37, window_bounds = array<i64: 8, 1>}, {transform_indices = @transform_38, window_bounds = array<i64: 1, 12, 16>}]} {
    %c0 = arith.constant 0 : index
    %c0_0 = arith.constant 0 : index
    %c0_1 = arith.constant 0 : index
    %0 = vector.load %arg1[%c0, %c0_0, %c0_1] : memref<1x4x128xf32, #tpu.memory_space<vmem>>, vector<1x4x128xf32>
    %1 = vector.shape_cast %0 : vector<1x4x128xf32> to vector<4x128xf32>
    %c0_2 = arith.constant 0 : index
    %c0_3 = arith.constant 0 : index
    %2 = vector.load %arg2[%c0_2, %c0_3] : memref<4x1xf32, #tpu.memory_space<vmem>>, vector<4x1xf32>
    %3 = vector.broadcast %2 : vector<4x1xf32> to vector<4x128xf32>
    %4 = arith.mulf %1, %3 : vector<4x128xf32>
    %c0_4 = arith.constant 0 : index
    %c0_5 = arith.constant 0 : index
    %5 = vector.load %arg3[%c0_4, %c0_5] : memref<4x1xf32, #tpu.memory_space<vmem>>, vector<4x1xf32>
    %6 = vector.broadcast %5 : vector<4x1xf32> to vector<4x128xf32>
    %7 = arith.addf %4, %6 : vector<4x128xf32>
    %c0_6 = arith.constant 0 : index
    %c0_7 = arith.constant 0 : index
    %8 = vector.load %arg9[%c0_6, %c0_7] : memref<8x4xf32, #tpu.memory_space<vmem>>, vector<8x4xf32>
    %9 = arith.truncf %8 : vector<8x4xf32> to vector<8x4xbf16>
    %10 = arith.truncf %7 : vector<4x128xf32> to vector<4x128xbf16>
    %cst = arith.constant dense<0.000000e+00> : vector<8x128xf32>
    %11 = tpu.matmul %9, %10, %cst {dimension_numbers = #tpu.dot_dimension_numbers<[1], [0], [0], [1], [0, 0, 1, 1], [], []>} : vector<8x4xbf16>, vector<4x128xbf16>, vector<8x128xf32> -> vector<8x128xf32>
    %c0_8 = arith.constant 0 : index
    %c0_9 = arith.constant 0 : index
    %12 = vector.load %arg10[%c0_8, %c0_9] : memref<8x1xf32, #tpu.memory_space<vmem>>, vector<8x1xf32>
    %13 = vector.broadcast %12 : vector<8x1xf32> to vector<8x128xf32>
    %14 = arith.addf %11, %13 : vector<8x128xf32>
    %c0_10 = arith.constant 0 : index
    %c0_11 = arith.constant 0 : index
    %c0_12 = arith.constant 0 : index
    %15 = vector.load %arg5[%c0_10, %c0_11, %c0_12] : memref<3x128x128xbf16, #tpu.memory_space<vmem>>, vector<1x128x128xbf16>
    %16 = vector.shape_cast %15 : vector<1x128x128xbf16> to vector<128x128xbf16>
    %17 = arith.truncf %7 : vector<4x128xf32> to vector<4x128xbf16>
    %cst_13 = arith.constant dense<0.000000e+00> : vector<4x128xf32>
    %18 = tpu.matmul %17, %16, %cst_13 {dimension_numbers = #tpu.dot_dimension_numbers<[1], [0], [0], [1], [0, 0, 1, 1], [], []>} : vector<4x128xbf16>, vector<128x128xbf16>, vector<4x128xf32> -> vector<4x128xf32>
    %c2 = arith.constant 2 : index
    %c0_14 = arith.constant 0 : index
    %c0_15 = arith.constant 0 : index
    %19 = vector.load %arg5[%c2, %c0_14, %c0_15] : memref<3x128x128xbf16, #tpu.memory_space<vmem>>, vector<1x128x128xbf16>
    %20 = vector.shape_cast %19 : vector<1x128x128xbf16> to vector<128x128xbf16>
    %21 = arith.truncf %7 : vector<4x128xf32> to vector<4x128xbf16>
    %cst_16 = arith.constant dense<0.000000e+00> : vector<4x128xf32>
    %22 = tpu.matmul %21, %20, %cst_16 {dimension_numbers = #tpu.dot_dimension_numbers<[1], [0], [0], [1], [0, 0, 1, 1], [], []>} : vector<4x128xbf16>, vector<128x128xbf16>, vector<4x128xf32> -> vector<4x128xf32>
    %c0_17 = arith.constant 0 : index
    %c0_18 = arith.constant 0 : index
    %c0_19 = arith.constant 0 : index
    %23 = vector.load %arg11[%c0_17, %c0_18, %c0_19] : memref<3x8x4xf32, #tpu.memory_space<vmem>>, vector<3x8x4xf32>
    %24 = vector.extract_strided_slice %23 {offsets = [0, 0, 0], sizes = [1, 8, 4], strides = [1, 1, 1]} : vector<3x8x4xf32> to vector<1x8x4xf32>
    %25 = vector.shape_cast %24 : vector<1x8x4xf32> to vector<8x4xf32>
    %26 = arith.truncf %25 : vector<8x4xf32> to vector<8x4xbf16>
    %27 = arith.truncf %18 : vector<4x128xf32> to vector<4x128xbf16>
    %cst_20 = arith.constant dense<0.000000e+00> : vector<8x128xf32>
    %28 = tpu.matmul %26, %27, %cst_20 {dimension_numbers = #tpu.dot_dimension_numbers<[1], [0], [0], [1], [0, 0, 1, 1], [], []>} : vector<8x4xbf16>, vector<4x128xbf16>, vector<8x128xf32> -> vector<8x128xf32>
    %29 = vector.extract_strided_slice %23 {offsets = [1, 0, 0], sizes = [1, 8, 4], strides = [1, 1, 1]} : vector<3x8x4xf32> to vector<1x8x4xf32>
    %30 = vector.shape_cast %29 : vector<1x8x4xf32> to vector<8x4xf32>
    %31 = arith.truncf %30 : vector<8x4xf32> to vector<8x4xbf16>
    %32 = arith.truncf %7 : vector<4x128xf32> to vector<4x128xbf16>
    %cst_21 = arith.constant dense<0.000000e+00> : vector<8x128xf32>
    %33 = tpu.matmul %31, %32, %cst_21 {dimension_numbers = #tpu.dot_dimension_numbers<[1], [0], [0], [1], [0, 0, 1, 1], [], []>} : vector<8x4xbf16>, vector<4x128xbf16>, vector<8x128xf32> -> vector<8x128xf32>
    %34 = arith.addf %28, %33 : vector<8x128xf32>
    %35 = vector.extract_strided_slice %23 {offsets = [2, 0, 0], sizes = [1, 8, 4], strides = [1, 1, 1]} : vector<3x8x4xf32> to vector<1x8x4xf32>
    %36 = vector.shape_cast %35 : vector<1x8x4xf32> to vector<8x4xf32>
    %37 = arith.truncf %36 : vector<8x4xf32> to vector<8x4xbf16>
    %38 = arith.truncf %22 : vector<4x128xf32> to vector<4x128xbf16>
    %cst_22 = arith.constant dense<0.000000e+00> : vector<8x128xf32>
    %39 = tpu.matmul %37, %38, %cst_22 {dimension_numbers = #tpu.dot_dimension_numbers<[1], [0], [0], [1], [0, 0, 1, 1], [], []>} : vector<8x4xbf16>, vector<4x128xbf16>, vector<8x128xf32> -> vector<8x128xf32>
    %40 = arith.addf %34, %39 : vector<8x128xf32>
    %c0_23 = arith.constant 0 : index
    %c0_24 = arith.constant 0 : index
    %41 = vector.load %arg12[%c0_23, %c0_24] : memref<8x1xf32, #tpu.memory_space<vmem>>, vector<8x1xf32>
    %42 = vector.broadcast %41 : vector<8x1xf32> to vector<8x128xf32>
    %43 = arith.addf %40, %42 : vector<8x128xf32>
    %44 = arith.addf %43, %14 : vector<8x128xf32>
    %cst_25 = arith.constant 0.000000e+00 : f32
    %45 = vector.broadcast %cst_25 : f32 to vector<8x128xf32>
    %46 = arith.maximumf %44, %45 : vector<8x128xf32>
    %c0_26 = arith.constant 0 : index
    %c0_27 = arith.constant 0 : index
    %c0_28 = arith.constant 0 : index
    %47 = vector.load %arg13[%c0_26, %c0_27, %c0_28] : memref<3x8x8xf32, #tpu.memory_space<vmem>>, vector<3x8x8xf32>
    %c0_29 = arith.constant 0 : index
    %c0_30 = arith.constant 0 : index
    %c0_31 = arith.constant 0 : index
    %48 = vector.load %arg4[%c0_29, %c0_30, %c0_31] : memref<3x128x128xbf16, #tpu.memory_space<vmem>>, vector<1x128x128xbf16>
    %49 = vector.shape_cast %48 : vector<1x128x128xbf16> to vector<128x128xbf16>
    %50 = arith.truncf %46 : vector<8x128xf32> to vector<8x128xbf16>
    %cst_32 = arith.constant dense<0.000000e+00> : vector<8x128xf32>
    %51 = tpu.matmul %50, %49, %cst_32 {dimension_numbers = #tpu.dot_dimension_numbers<[1], [0], [0], [1], [0, 0, 1, 1], [], []>} : vector<8x128xbf16>, vector<128x128xbf16>, vector<8x128xf32> -> vector<8x128xf32>
    %52 = vector.extract_strided_slice %47 {offsets = [0, 0, 0], sizes = [1, 8, 8], strides = [1, 1, 1]} : vector<3x8x8xf32> to vector<1x8x8xf32>
    %53 = vector.shape_cast %52 : vector<1x8x8xf32> to vector<8x8xf32>
    %54 = arith.truncf %53 : vector<8x8xf32> to vector<8x8xbf16>
    %55 = arith.truncf %51 : vector<8x128xf32> to vector<8x128xbf16>
    %cst_33 = arith.constant dense<0.000000e+00> : vector<8x128xf32>
    %56 = tpu.matmul %54, %55, %cst_33 {dimension_numbers = #tpu.dot_dimension_numbers<[1], [0], [0], [1], [0, 0, 1, 1], [], []>} : vector<8x8xbf16>, vector<8x128xbf16>, vector<8x128xf32> -> vector<8x128xf32>
    %c1 = arith.constant 1 : index
    %c0_34 = arith.constant 0 : index
    %c0_35 = arith.constant 0 : index
    %57 = vector.load %arg4[%c1, %c0_34, %c0_35] : memref<3x128x128xbf16, #tpu.memory_space<vmem>>, vector<1x128x128xbf16>
    %58 = vector.shape_cast %57 : vector<1x128x128xbf16> to vector<128x128xbf16>
    %59 = arith.truncf %46 : vector<8x128xf32> to vector<8x128xbf16>
    %cst_36 = arith.constant dense<0.000000e+00> : vector<8x128xf32>
    %60 = tpu.matmul %59, %58, %cst_36 {dimension_numbers = #tpu.dot_dimension_numbers<[1], [0], [0], [1], [0, 0, 1, 1], [], []>} : vector<8x128xbf16>, vector<128x128xbf16>, vector<8x128xf32> -> vector<8x128xf32>
    %61 = vector.extract_strided_slice %47 {offsets = [1, 0, 0], sizes = [1, 8, 8], strides = [1, 1, 1]} : vector<3x8x8xf32> to vector<1x8x8xf32>
    %62 = vector.shape_cast %61 : vector<1x8x8xf32> to vector<8x8xf32>
    %63 = arith.truncf %62 : vector<8x8xf32> to vector<8x8xbf16>
    %64 = arith.truncf %60 : vector<8x128xf32> to vector<8x128xbf16>
    %cst_37 = arith.constant dense<0.000000e+00> : vector<8x128xf32>
    %65 = tpu.matmul %63, %64, %cst_37 {dimension_numbers = #tpu.dot_dimension_numbers<[1], [0], [0], [1], [0, 0, 1, 1], [], []>} : vector<8x8xbf16>, vector<8x128xbf16>, vector<8x128xf32> -> vector<8x128xf32>
    %66 = arith.addf %56, %65 : vector<8x128xf32>
    %c2_38 = arith.constant 2 : index
    %c0_39 = arith.constant 0 : index
    %c0_40 = arith.constant 0 : index
    %67 = vector.load %arg4[%c2_38, %c0_39, %c0_40] : memref<3x128x128xbf16, #tpu.memory_space<vmem>>, vector<1x128x128xbf16>
    %68 = vector.shape_cast %67 : vector<1x128x128xbf16> to vector<128x128xbf16>
    %69 = arith.truncf %46 : vector<8x128xf32> to vector<8x128xbf16>
    %cst_41 = arith.constant dense<0.000000e+00> : vector<8x128xf32>
    %70 = tpu.matmul %69, %68, %cst_41 {dimension_numbers = #tpu.dot_dimension_numbers<[1], [0], [0], [1], [0, 0, 1, 1], [], []>} : vector<8x128xbf16>, vector<128x128xbf16>, vector<8x128xf32> -> vector<8x128xf32>
    %71 = vector.extract_strided_slice %47 {offsets = [2, 0, 0], sizes = [1, 8, 8], strides = [1, 1, 1]} : vector<3x8x8xf32> to vector<1x8x8xf32>
    %72 = vector.shape_cast %71 : vector<1x8x8xf32> to vector<8x8xf32>
    %73 = arith.truncf %72 : vector<8x8xf32> to vector<8x8xbf16>
    %74 = arith.truncf %70 : vector<8x128xf32> to vector<8x128xbf16>
    %cst_42 = arith.constant dense<0.000000e+00> : vector<8x128xf32>
    %75 = tpu.matmul %73, %74, %cst_42 {dimension_numbers = #tpu.dot_dimension_numbers<[1], [0], [0], [1], [0, 0, 1, 1], [], []>} : vector<8x8xbf16>, vector<8x128xbf16>, vector<8x128xf32> -> vector<8x128xf32>
    %76 = arith.addf %66, %75 : vector<8x128xf32>
    %c0_43 = arith.constant 0 : index
    %c0_44 = arith.constant 0 : index
    %77 = vector.load %arg14[%c0_43, %c0_44] : memref<8x1xf32, #tpu.memory_space<vmem>>, vector<8x1xf32>
    %78 = vector.broadcast %77 : vector<8x1xf32> to vector<8x128xf32>
    %79 = arith.addf %76, %78 : vector<8x128xf32>
    %cst_45 = arith.constant 0.000000e+00 : f32
    %80 = vector.broadcast %cst_45 : f32 to vector<8x128xf32>
    %81 = arith.maximumf %79, %80 : vector<8x128xf32>
    %c0_46 = arith.constant 0 : index
    %c0_47 = arith.constant 0 : index
    %c0_48 = arith.constant 0 : index
    %82 = vector.load %arg5[%c0_46, %c0_47, %c0_48] : memref<3x128x128xbf16, #tpu.memory_space<vmem>>, vector<1x128x128xbf16>
    %83 = vector.shape_cast %82 : vector<1x128x128xbf16> to vector<128x128xbf16>
    %84 = arith.truncf %81 : vector<8x128xf32> to vector<8x128xbf16>
    %cst_49 = arith.constant dense<0.000000e+00> : vector<8x128xf32>
    %85 = tpu.matmul %84, %83, %cst_49 {dimension_numbers = #tpu.dot_dimension_numbers<[1], [0], [0], [1], [0, 0, 1, 1], [], []>} : vector<8x128xbf16>, vector<128x128xbf16>, vector<8x128xf32> -> vector<8x128xf32>
    %c2_50 = arith.constant 2 : index
    %c0_51 = arith.constant 0 : index
    %c0_52 = arith.constant 0 : index
    %86 = vector.load %arg5[%c2_50, %c0_51, %c0_52] : memref<3x128x128xbf16, #tpu.memory_space<vmem>>, vector<1x128x128xbf16>
    %87 = vector.shape_cast %86 : vector<1x128x128xbf16> to vector<128x128xbf16>
    %88 = arith.truncf %81 : vector<8x128xf32> to vector<8x128xbf16>
    %cst_53 = arith.constant dense<0.000000e+00> : vector<8x128xf32>
    %89 = tpu.matmul %88, %87, %cst_53 {dimension_numbers = #tpu.dot_dimension_numbers<[1], [0], [0], [1], [0, 0, 1, 1], [], []>} : vector<8x128xbf16>, vector<128x128xbf16>, vector<8x128xf32> -> vector<8x128xf32>
    %c0_54 = arith.constant 0 : index
    %c0_55 = arith.constant 0 : index
    %c0_56 = arith.constant 0 : index
    %90 = vector.load %arg15[%c0_54, %c0_55, %c0_56] : memref<3x8x8xf32, #tpu.memory_space<vmem>>, vector<3x8x8xf32>
    %91 = vector.extract_strided_slice %90 {offsets = [0, 0, 0], sizes = [1, 8, 8], strides = [1, 1, 1]} : vector<3x8x8xf32> to vector<1x8x8xf32>
    %92 = vector.shape_cast %91 : vector<1x8x8xf32> to vector<8x8xf32>
    %93 = arith.truncf %92 : vector<8x8xf32> to vector<8x8xbf16>
    %94 = arith.truncf %85 : vector<8x128xf32> to vector<8x128xbf16>
    %cst_57 = arith.constant dense<0.000000e+00> : vector<8x128xf32>
    %95 = tpu.matmul %93, %94, %cst_57 {dimension_numbers = #tpu.dot_dimension_numbers<[1], [0], [0], [1], [0, 0, 1, 1], [], []>} : vector<8x8xbf16>, vector<8x128xbf16>, vector<8x128xf32> -> vector<8x128xf32>
    %96 = vector.extract_strided_slice %90 {offsets = [1, 0, 0], sizes = [1, 8, 8], strides = [1, 1, 1]} : vector<3x8x8xf32> to vector<1x8x8xf32>
    %97 = vector.shape_cast %96 : vector<1x8x8xf32> to vector<8x8xf32>
    %98 = arith.truncf %97 : vector<8x8xf32> to vector<8x8xbf16>
    %99 = arith.truncf %81 : vector<8x128xf32> to vector<8x128xbf16>
    %cst_58 = arith.constant dense<0.000000e+00> : vector<8x128xf32>
    %100 = tpu.matmul %98, %99, %cst_58 {dimension_numbers = #tpu.dot_dimension_numbers<[1], [0], [0], [1], [0, 0, 1, 1], [], []>} : vector<8x8xbf16>, vector<8x128xbf16>, vector<8x128xf32> -> vector<8x128xf32>
    %101 = arith.addf %95, %100 : vector<8x128xf32>
    %102 = vector.extract_strided_slice %90 {offsets = [2, 0, 0], sizes = [1, 8, 8], strides = [1, 1, 1]} : vector<3x8x8xf32> to vector<1x8x8xf32>
    %103 = vector.shape_cast %102 : vector<1x8x8xf32> to vector<8x8xf32>
    %104 = arith.truncf %103 : vector<8x8xf32> to vector<8x8xbf16>
    %105 = arith.truncf %89 : vector<8x128xf32> to vector<8x128xbf16>
    %cst_59 = arith.constant dense<0.000000e+00> : vector<8x128xf32>
    %106 = tpu.matmul %104, %105, %cst_59 {dimension_numbers = #tpu.dot_dimension_numbers<[1], [0], [0], [1], [0, 0, 1, 1], [], []>} : vector<8x8xbf16>, vector<8x128xbf16>, vector<8x128xf32> -> vector<8x128xf32>
    %107 = arith.addf %101, %106 : vector<8x128xf32>
    %c0_60 = arith.constant 0 : index
    %c0_61 = arith.constant 0 : index
    %108 = vector.load %arg16[%c0_60, %c0_61] : memref<8x1xf32, #tpu.memory_space<vmem>>, vector<8x1xf32>
    %109 = vector.broadcast %108 : vector<8x1xf32> to vector<8x128xf32>
    %110 = arith.addf %107, %109 : vector<8x128xf32>
    %c0_62 = arith.constant 0 : index
    %c0_63 = arith.constant 0 : index
    %c0_64 = arith.constant 0 : index
    %111 = vector.load %arg17[%c0_62, %c0_63, %c0_64] : memref<3x8x8xf32, #tpu.memory_space<vmem>>, vector<3x8x8xf32>
    %112 = vector.extract_strided_slice %111 {offsets = [0, 0, 0], sizes = [1, 8, 8], strides = [1, 1, 1]} : vector<3x8x8xf32> to vector<1x8x8xf32>
    %113 = vector.shape_cast %112 : vector<1x8x8xf32> to vector<8x8xf32>
    %114 = arith.truncf %113 : vector<8x8xf32> to vector<8x8xbf16>
    %115 = arith.truncf %85 : vector<8x128xf32> to vector<8x128xbf16>
    %cst_65 = arith.constant dense<0.000000e+00> : vector<8x128xf32>
    %116 = tpu.matmul %114, %115, %cst_65 {dimension_numbers = #tpu.dot_dimension_numbers<[1], [0], [0], [1], [0, 0, 1, 1], [], []>} : vector<8x8xbf16>, vector<8x128xbf16>, vector<8x128xf32> -> vector<8x128xf32>
    %117 = vector.extract_strided_slice %111 {offsets = [1, 0, 0], sizes = [1, 8, 8], strides = [1, 1, 1]} : vector<3x8x8xf32> to vector<1x8x8xf32>
    %118 = vector.shape_cast %117 : vector<1x8x8xf32> to vector<8x8xf32>
    %119 = arith.truncf %118 : vector<8x8xf32> to vector<8x8xbf16>
    %120 = arith.truncf %81 : vector<8x128xf32> to vector<8x128xbf16>
    %cst_66 = arith.constant dense<0.000000e+00> : vector<8x128xf32>
    %121 = tpu.matmul %119, %120, %cst_66 {dimension_numbers = #tpu.dot_dimension_numbers<[1], [0], [0], [1], [0, 0, 1, 1], [], []>} : vector<8x8xbf16>, vector<8x128xbf16>, vector<8x128xf32> -> vector<8x128xf32>
    %122 = arith.addf %116, %121 : vector<8x128xf32>
    %123 = vector.extract_strided_slice %111 {offsets = [2, 0, 0], sizes = [1, 8, 8], strides = [1, 1, 1]} : vector<3x8x8xf32> to vector<1x8x8xf32>
    %124 = vector.shape_cast %123 : vector<1x8x8xf32> to vector<8x8xf32>
    %125 = arith.truncf %124 : vector<8x8xf32> to vector<8x8xbf16>
    %126 = arith.truncf %89 : vector<8x128xf32> to vector<8x128xbf16>
    %cst_67 = arith.constant dense<0.000000e+00> : vector<8x128xf32>
    %127 = tpu.matmul %125, %126, %cst_67 {dimension_numbers = #tpu.dot_dimension_numbers<[1], [0], [0], [1], [0, 0, 1, 1], [], []>} : vector<8x8xbf16>, vector<8x128xbf16>, vector<8x128xf32> -> vector<8x128xf32>
    %128 = arith.addf %122, %127 : vector<8x128xf32>
    %c0_68 = arith.constant 0 : index
    %c0_69 = arith.constant 0 : index
    %129 = vector.load %arg18[%c0_68, %c0_69] : memref<8x1xf32, #tpu.memory_space<vmem>>, vector<8x1xf32>
    %130 = vector.broadcast %129 : vector<8x1xf32> to vector<8x128xf32>
    %131 = arith.addf %128, %130 : vector<8x128xf32>
    %132 = arith.addf %110, %81 : vector<8x128xf32>
    %133 = arith.negf %131 : vector<8x128xf32>
    %134 = math.exp %133 : vector<8x128xf32>
    %cst_70 = arith.constant 1.000000e+00 : f32
    %135 = vector.broadcast %cst_70 : f32 to vector<8x128xf32>
    %136 = arith.addf %135, %134 : vector<8x128xf32>
    %137 = arith.divf %135, %136 : vector<8x128xf32>
    %138 = arith.mulf %132, %137 : vector<8x128xf32>
    %c0_71 = arith.constant 0 : index
    %c0_72 = arith.constant 0 : index
    %139 = vector.load %arg19[%c0_71, %c0_72] : memref<8x8xf32, #tpu.memory_space<vmem>>, vector<8x8xf32>
    %140 = arith.truncf %139 : vector<8x8xf32> to vector<8x8xbf16>
    %141 = arith.truncf %138 : vector<8x128xf32> to vector<8x128xbf16>
    %cst_73 = arith.constant dense<0.000000e+00> : vector<8x128xf32>
    %142 = tpu.matmul %140, %141, %cst_73 {dimension_numbers = #tpu.dot_dimension_numbers<[1], [0], [0], [1], [0, 0, 1, 1], [], []>} : vector<8x8xbf16>, vector<8x128xbf16>, vector<8x128xf32> -> vector<8x128xf32>
    %c0_74 = arith.constant 0 : index
    %c0_75 = arith.constant 0 : index
    %143 = vector.load %arg20[%c0_74, %c0_75] : memref<8x1xf32, #tpu.memory_space<vmem>>, vector<8x1xf32>
    %144 = vector.broadcast %143 : vector<8x1xf32> to vector<8x128xf32>
    %145 = arith.addf %142, %144 : vector<8x128xf32>
    %c0_76 = arith.constant 0 : index
    %c0_77 = arith.constant 0 : index
    %c0_78 = arith.constant 0 : index
    %146 = vector.load %arg5[%c0_76, %c0_77, %c0_78] : memref<3x128x128xbf16, #tpu.memory_space<vmem>>, vector<1x128x128xbf16>
    %147 = vector.shape_cast %146 : vector<1x128x128xbf16> to vector<128x128xbf16>
    %148 = arith.truncf %138 : vector<8x128xf32> to vector<8x128xbf16>
    %cst_79 = arith.constant dense<0.000000e+00> : vector<8x128xf32>
    %149 = tpu.matmul %148, %147, %cst_79 {dimension_numbers = #tpu.dot_dimension_numbers<[1], [0], [0], [1], [0, 0, 1, 1], [], []>} : vector<8x128xbf16>, vector<128x128xbf16>, vector<8x128xf32> -> vector<8x128xf32>
    %c2_80 = arith.constant 2 : index
    %c0_81 = arith.constant 0 : index
    %c0_82 = arith.constant 0 : index
    %150 = vector.load %arg5[%c2_80, %c0_81, %c0_82] : memref<3x128x128xbf16, #tpu.memory_space<vmem>>, vector<1x128x128xbf16>
    %151 = vector.shape_cast %150 : vector<1x128x128xbf16> to vector<128x128xbf16>
    %152 = arith.truncf %138 : vector<8x128xf32> to vector<8x128xbf16>
    %cst_83 = arith.constant dense<0.000000e+00> : vector<8x128xf32>
    %153 = tpu.matmul %152, %151, %cst_83 {dimension_numbers = #tpu.dot_dimension_numbers<[1], [0], [0], [1], [0, 0, 1, 1], [], []>} : vector<8x128xbf16>, vector<128x128xbf16>, vector<8x128xf32> -> vector<8x128xf32>
    %c0_84 = arith.constant 0 : index
    %c0_85 = arith.constant 0 : index
    %c0_86 = arith.constant 0 : index
    %154 = vector.load %arg21[%c0_84, %c0_85, %c0_86] : memref<3x8x8xf32, #tpu.memory_space<vmem>>, vector<3x8x8xf32>
    %155 = vector.extract_strided_slice %154 {offsets = [0, 0, 0], sizes = [1, 8, 8], strides = [1, 1, 1]} : vector<3x8x8xf32> to vector<1x8x8xf32>
    %156 = vector.shape_cast %155 : vector<1x8x8xf32> to vector<8x8xf32>
    %157 = arith.truncf %156 : vector<8x8xf32> to vector<8x8xbf16>
    %158 = arith.truncf %149 : vector<8x128xf32> to vector<8x128xbf16>
    %cst_87 = arith.constant dense<0.000000e+00> : vector<8x128xf32>
    %159 = tpu.matmul %157, %158, %cst_87 {dimension_numbers = #tpu.dot_dimension_numbers<[1], [0], [0], [1], [0, 0, 1, 1], [], []>} : vector<8x8xbf16>, vector<8x128xbf16>, vector<8x128xf32> -> vector<8x128xf32>
    %160 = vector.extract_strided_slice %154 {offsets = [1, 0, 0], sizes = [1, 8, 8], strides = [1, 1, 1]} : vector<3x8x8xf32> to vector<1x8x8xf32>
    %161 = vector.shape_cast %160 : vector<1x8x8xf32> to vector<8x8xf32>
    %162 = arith.truncf %161 : vector<8x8xf32> to vector<8x8xbf16>
    %163 = arith.truncf %138 : vector<8x128xf32> to vector<8x128xbf16>
    %cst_88 = arith.constant dense<0.000000e+00> : vector<8x128xf32>
    %164 = tpu.matmul %162, %163, %cst_88 {dimension_numbers = #tpu.dot_dimension_numbers<[1], [0], [0], [1], [0, 0, 1, 1], [], []>} : vector<8x8xbf16>, vector<8x128xbf16>, vector<8x128xf32> -> vector<8x128xf32>
    %165 = arith.addf %159, %164 : vector<8x128xf32>
    %166 = vector.extract_strided_slice %154 {offsets = [2, 0, 0], sizes = [1, 8, 8], strides = [1, 1, 1]} : vector<3x8x8xf32> to vector<1x8x8xf32>
    %167 = vector.shape_cast %166 : vector<1x8x8xf32> to vector<8x8xf32>
    %168 = arith.truncf %167 : vector<8x8xf32> to vector<8x8xbf16>
    %169 = arith.truncf %153 : vector<8x128xf32> to vector<8x128xbf16>
    %cst_89 = arith.constant dense<0.000000e+00> : vector<8x128xf32>
    %170 = tpu.matmul %168, %169, %cst_89 {dimension_numbers = #tpu.dot_dimension_numbers<[1], [0], [0], [1], [0, 0, 1, 1], [], []>} : vector<8x8xbf16>, vector<8x128xbf16>, vector<8x128xf32> -> vector<8x128xf32>
    %171 = arith.addf %165, %170 : vector<8x128xf32>
    %c0_90 = arith.constant 0 : index
    %c0_91 = arith.constant 0 : index
    %172 = vector.load %arg22[%c0_90, %c0_91] : memref<8x1xf32, #tpu.memory_space<vmem>>, vector<8x1xf32>
    %173 = vector.broadcast %172 : vector<8x1xf32> to vector<8x128xf32>
    %174 = arith.addf %171, %173 : vector<8x128xf32>
    %175 = arith.addf %174, %145 : vector<8x128xf32>
    %cst_92 = arith.constant 0.000000e+00 : f32
    %176 = vector.broadcast %cst_92 : f32 to vector<8x128xf32>
    %177 = arith.maximumf %175, %176 : vector<8x128xf32>
    %c0_93 = arith.constant 0 : index
    %c0_94 = arith.constant 0 : index
    %c0_95 = arith.constant 0 : index
    %178 = vector.load %arg23[%c0_93, %c0_94, %c0_95] : memref<3x8x8xf32, #tpu.memory_space<vmem>>, vector<3x8x8xf32>
    %c0_96 = arith.constant 0 : index
    %c0_97 = arith.constant 0 : index
    %c0_98 = arith.constant 0 : index
    %179 = vector.load %arg4[%c0_96, %c0_97, %c0_98] : memref<3x128x128xbf16, #tpu.memory_space<vmem>>, vector<1x128x128xbf16>
    %180 = vector.shape_cast %179 : vector<1x128x128xbf16> to vector<128x128xbf16>
    %181 = arith.truncf %177 : vector<8x128xf32> to vector<8x128xbf16>
    %cst_99 = arith.constant dense<0.000000e+00> : vector<8x128xf32>
    %182 = tpu.matmul %181, %180, %cst_99 {dimension_numbers = #tpu.dot_dimension_numbers<[1], [0], [0], [1], [0, 0, 1, 1], [], []>} : vector<8x128xbf16>, vector<128x128xbf16>, vector<8x128xf32> -> vector<8x128xf32>
    %183 = vector.extract_strided_slice %178 {offsets = [0, 0, 0], sizes = [1, 8, 8], strides = [1, 1, 1]} : vector<3x8x8xf32> to vector<1x8x8xf32>
    %184 = vector.shape_cast %183 : vector<1x8x8xf32> to vector<8x8xf32>
    %185 = arith.truncf %184 : vector<8x8xf32> to vector<8x8xbf16>
    %186 = arith.truncf %182 : vector<8x128xf32> to vector<8x128xbf16>
    %cst_100 = arith.constant dense<0.000000e+00> : vector<8x128xf32>
    %187 = tpu.matmul %185, %186, %cst_100 {dimension_numbers = #tpu.dot_dimension_numbers<[1], [0], [0], [1], [0, 0, 1, 1], [], []>} : vector<8x8xbf16>, vector<8x128xbf16>, vector<8x128xf32> -> vector<8x128xf32>
    %c1_101 = arith.constant 1 : index
    %c0_102 = arith.constant 0 : index
    %c0_103 = arith.constant 0 : index
    %188 = vector.load %arg4[%c1_101, %c0_102, %c0_103] : memref<3x128x128xbf16, #tpu.memory_space<vmem>>, vector<1x128x128xbf16>
    %189 = vector.shape_cast %188 : vector<1x128x128xbf16> to vector<128x128xbf16>
    %190 = arith.truncf %177 : vector<8x128xf32> to vector<8x128xbf16>
    %cst_104 = arith.constant dense<0.000000e+00> : vector<8x128xf32>
    %191 = tpu.matmul %190, %189, %cst_104 {dimension_numbers = #tpu.dot_dimension_numbers<[1], [0], [0], [1], [0, 0, 1, 1], [], []>} : vector<8x128xbf16>, vector<128x128xbf16>, vector<8x128xf32> -> vector<8x128xf32>
    %192 = vector.extract_strided_slice %178 {offsets = [1, 0, 0], sizes = [1, 8, 8], strides = [1, 1, 1]} : vector<3x8x8xf32> to vector<1x8x8xf32>
    %193 = vector.shape_cast %192 : vector<1x8x8xf32> to vector<8x8xf32>
    %194 = arith.truncf %193 : vector<8x8xf32> to vector<8x8xbf16>
    %195 = arith.truncf %191 : vector<8x128xf32> to vector<8x128xbf16>
    %cst_105 = arith.constant dense<0.000000e+00> : vector<8x128xf32>
    %196 = tpu.matmul %194, %195, %cst_105 {dimension_numbers = #tpu.dot_dimension_numbers<[1], [0], [0], [1], [0, 0, 1, 1], [], []>} : vector<8x8xbf16>, vector<8x128xbf16>, vector<8x128xf32> -> vector<8x128xf32>
    %197 = arith.addf %187, %196 : vector<8x128xf32>
    %c2_106 = arith.constant 2 : index
    %c0_107 = arith.constant 0 : index
    %c0_108 = arith.constant 0 : index
    %198 = vector.load %arg4[%c2_106, %c0_107, %c0_108] : memref<3x128x128xbf16, #tpu.memory_space<vmem>>, vector<1x128x128xbf16>
    %199 = vector.shape_cast %198 : vector<1x128x128xbf16> to vector<128x128xbf16>
    %200 = arith.truncf %177 : vector<8x128xf32> to vector<8x128xbf16>
    %cst_109 = arith.constant dense<0.000000e+00> : vector<8x128xf32>
    %201 = tpu.matmul %200, %199, %cst_109 {dimension_numbers = #tpu.dot_dimension_numbers<[1], [0], [0], [1], [0, 0, 1, 1], [], []>} : vector<8x128xbf16>, vector<128x128xbf16>, vector<8x128xf32> -> vector<8x128xf32>
    %202 = vector.extract_strided_slice %178 {offsets = [2, 0, 0], sizes = [1, 8, 8], strides = [1, 1, 1]} : vector<3x8x8xf32> to vector<1x8x8xf32>
    %203 = vector.shape_cast %202 : vector<1x8x8xf32> to vector<8x8xf32>
    %204 = arith.truncf %203 : vector<8x8xf32> to vector<8x8xbf16>
    %205 = arith.truncf %201 : vector<8x128xf32> to vector<8x128xbf16>
    %cst_110 = arith.constant dense<0.000000e+00> : vector<8x128xf32>
    %206 = tpu.matmul %204, %205, %cst_110 {dimension_numbers = #tpu.dot_dimension_numbers<[1], [0], [0], [1], [0, 0, 1, 1], [], []>} : vector<8x8xbf16>, vector<8x128xbf16>, vector<8x128xf32> -> vector<8x128xf32>
    %207 = arith.addf %197, %206 : vector<8x128xf32>
    %c0_111 = arith.constant 0 : index
    %c0_112 = arith.constant 0 : index
    %208 = vector.load %arg24[%c0_111, %c0_112] : memref<8x1xf32, #tpu.memory_space<vmem>>, vector<8x1xf32>
    %209 = vector.broadcast %208 : vector<8x1xf32> to vector<8x128xf32>
    %210 = arith.addf %207, %209 : vector<8x128xf32>
    %cst_113 = arith.constant 0.000000e+00 : f32
    %211 = vector.broadcast %cst_113 : f32 to vector<8x128xf32>
    %212 = arith.maximumf %210, %211 : vector<8x128xf32>
    %c0_114 = arith.constant 0 : index
    %c0_115 = arith.constant 0 : index
    %c0_116 = arith.constant 0 : index
    %213 = vector.load %arg5[%c0_114, %c0_115, %c0_116] : memref<3x128x128xbf16, #tpu.memory_space<vmem>>, vector<1x128x128xbf16>
    %214 = vector.shape_cast %213 : vector<1x128x128xbf16> to vector<128x128xbf16>
    %215 = arith.truncf %212 : vector<8x128xf32> to vector<8x128xbf16>
    %cst_117 = arith.constant dense<0.000000e+00> : vector<8x128xf32>
    %216 = tpu.matmul %215, %214, %cst_117 {dimension_numbers = #tpu.dot_dimension_numbers<[1], [0], [0], [1], [0, 0, 1, 1], [], []>} : vector<8x128xbf16>, vector<128x128xbf16>, vector<8x128xf32> -> vector<8x128xf32>
    %c2_118 = arith.constant 2 : index
    %c0_119 = arith.constant 0 : index
    %c0_120 = arith.constant 0 : index
    %217 = vector.load %arg5[%c2_118, %c0_119, %c0_120] : memref<3x128x128xbf16, #tpu.memory_space<vmem>>, vector<1x128x128xbf16>
    %218 = vector.shape_cast %217 : vector<1x128x128xbf16> to vector<128x128xbf16>
    %219 = arith.truncf %212 : vector<8x128xf32> to vector<8x128xbf16>
    %cst_121 = arith.constant dense<0.000000e+00> : vector<8x128xf32>
    %220 = tpu.matmul %219, %218, %cst_121 {dimension_numbers = #tpu.dot_dimension_numbers<[1], [0], [0], [1], [0, 0, 1, 1], [], []>} : vector<8x128xbf16>, vector<128x128xbf16>, vector<8x128xf32> -> vector<8x128xf32>
    %c0_122 = arith.constant 0 : index
    %c0_123 = arith.constant 0 : index
    %c0_124 = arith.constant 0 : index
    %221 = vector.load %arg25[%c0_122, %c0_123, %c0_124] : memref<3x8x8xf32, #tpu.memory_space<vmem>>, vector<3x8x8xf32>
    %222 = vector.extract_strided_slice %221 {offsets = [0, 0, 0], sizes = [1, 8, 8], strides = [1, 1, 1]} : vector<3x8x8xf32> to vector<1x8x8xf32>
    %223 = vector.shape_cast %222 : vector<1x8x8xf32> to vector<8x8xf32>
    %224 = arith.truncf %223 : vector<8x8xf32> to vector<8x8xbf16>
    %225 = arith.truncf %216 : vector<8x128xf32> to vector<8x128xbf16>
    %cst_125 = arith.constant dense<0.000000e+00> : vector<8x128xf32>
    %226 = tpu.matmul %224, %225, %cst_125 {dimension_numbers = #tpu.dot_dimension_numbers<[1], [0], [0], [1], [0, 0, 1, 1], [], []>} : vector<8x8xbf16>, vector<8x128xbf16>, vector<8x128xf32> -> vector<8x128xf32>
    %227 = vector.extract_strided_slice %221 {offsets = [1, 0, 0], sizes = [1, 8, 8], strides = [1, 1, 1]} : vector<3x8x8xf32> to vector<1x8x8xf32>
    %228 = vector.shape_cast %227 : vector<1x8x8xf32> to vector<8x8xf32>
    %229 = arith.truncf %228 : vector<8x8xf32> to vector<8x8xbf16>
    %230 = arith.truncf %212 : vector<8x128xf32> to vector<8x128xbf16>
    %cst_126 = arith.constant dense<0.000000e+00> : vector<8x128xf32>
    %231 = tpu.matmul %229, %230, %cst_126 {dimension_numbers = #tpu.dot_dimension_numbers<[1], [0], [0], [1], [0, 0, 1, 1], [], []>} : vector<8x8xbf16>, vector<8x128xbf16>, vector<8x128xf32> -> vector<8x128xf32>
    %232 = arith.addf %226, %231 : vector<8x128xf32>
    %233 = vector.extract_strided_slice %221 {offsets = [2, 0, 0], sizes = [1, 8, 8], strides = [1, 1, 1]} : vector<3x8x8xf32> to vector<1x8x8xf32>
    %234 = vector.shape_cast %233 : vector<1x8x8xf32> to vector<8x8xf32>
    %235 = arith.truncf %234 : vector<8x8xf32> to vector<8x8xbf16>
    %236 = arith.truncf %220 : vector<8x128xf32> to vector<8x128xbf16>
    %cst_127 = arith.constant dense<0.000000e+00> : vector<8x128xf32>
    %237 = tpu.matmul %235, %236, %cst_127 {dimension_numbers = #tpu.dot_dimension_numbers<[1], [0], [0], [1], [0, 0, 1, 1], [], []>} : vector<8x8xbf16>, vector<8x128xbf16>, vector<8x128xf32> -> vector<8x128xf32>
    %238 = arith.addf %232, %237 : vector<8x128xf32>
    %c0_128 = arith.constant 0 : index
    %c0_129 = arith.constant 0 : index
    %239 = vector.load %arg26[%c0_128, %c0_129] : memref<8x1xf32, #tpu.memory_space<vmem>>, vector<8x1xf32>
    %240 = vector.broadcast %239 : vector<8x1xf32> to vector<8x128xf32>
    %241 = arith.addf %238, %240 : vector<8x128xf32>
    %c0_130 = arith.constant 0 : index
    %c0_131 = arith.constant 0 : index
    %c0_132 = arith.constant 0 : index
    %242 = vector.load %arg27[%c0_130, %c0_131, %c0_132] : memref<3x8x8xf32, #tpu.memory_space<vmem>>, vector<3x8x8xf32>
    %243 = vector.extract_strided_slice %242 {offsets = [0, 0, 0], sizes = [1, 8, 8], strides = [1, 1, 1]} : vector<3x8x8xf32> to vector<1x8x8xf32>
    %244 = vector.shape_cast %243 : vector<1x8x8xf32> to vector<8x8xf32>
    %245 = arith.truncf %244 : vector<8x8xf32> to vector<8x8xbf16>
    %246 = arith.truncf %216 : vector<8x128xf32> to vector<8x128xbf16>
    %cst_133 = arith.constant dense<0.000000e+00> : vector<8x128xf32>
    %247 = tpu.matmul %245, %246, %cst_133 {dimension_numbers = #tpu.dot_dimension_numbers<[1], [0], [0], [1], [0, 0, 1, 1], [], []>} : vector<8x8xbf16>, vector<8x128xbf16>, vector<8x128xf32> -> vector<8x128xf32>
    %248 = vector.extract_strided_slice %242 {offsets = [1, 0, 0], sizes = [1, 8, 8], strides = [1, 1, 1]} : vector<3x8x8xf32> to vector<1x8x8xf32>
    %249 = vector.shape_cast %248 : vector<1x8x8xf32> to vector<8x8xf32>
    %250 = arith.truncf %249 : vector<8x8xf32> to vector<8x8xbf16>
    %251 = arith.truncf %212 : vector<8x128xf32> to vector<8x128xbf16>
    %cst_134 = arith.constant dense<0.000000e+00> : vector<8x128xf32>
    %252 = tpu.matmul %250, %251, %cst_134 {dimension_numbers = #tpu.dot_dimension_numbers<[1], [0], [0], [1], [0, 0, 1, 1], [], []>} : vector<8x8xbf16>, vector<8x128xbf16>, vector<8x128xf32> -> vector<8x128xf32>
    %253 = arith.addf %247, %252 : vector<8x128xf32>
    %254 = vector.extract_strided_slice %242 {offsets = [2, 0, 0], sizes = [1, 8, 8], strides = [1, 1, 1]} : vector<3x8x8xf32> to vector<1x8x8xf32>
    %255 = vector.shape_cast %254 : vector<1x8x8xf32> to vector<8x8xf32>
    %256 = arith.truncf %255 : vector<8x8xf32> to vector<8x8xbf16>
    %257 = arith.truncf %220 : vector<8x128xf32> to vector<8x128xbf16>
    %cst_135 = arith.constant dense<0.000000e+00> : vector<8x128xf32>
    %258 = tpu.matmul %256, %257, %cst_135 {dimension_numbers = #tpu.dot_dimension_numbers<[1], [0], [0], [1], [0, 0, 1, 1], [], []>} : vector<8x8xbf16>, vector<8x128xbf16>, vector<8x128xf32> -> vector<8x128xf32>
    %259 = arith.addf %253, %258 : vector<8x128xf32>
    %c0_136 = arith.constant 0 : index
    %c0_137 = arith.constant 0 : index
    %260 = vector.load %arg28[%c0_136, %c0_137] : memref<8x1xf32, #tpu.memory_space<vmem>>, vector<8x1xf32>
    %261 = vector.broadcast %260 : vector<8x1xf32> to vector<8x128xf32>
    %262 = arith.addf %259, %261 : vector<8x128xf32>
    %263 = arith.addf %241, %212 : vector<8x128xf32>
    %264 = arith.negf %262 : vector<8x128xf32>
    %265 = math.exp %264 : vector<8x128xf32>
    %cst_138 = arith.constant 1.000000e+00 : f32
    %266 = vector.broadcast %cst_138 : f32 to vector<8x128xf32>
    %267 = arith.addf %266, %265 : vector<8x128xf32>
    %268 = arith.divf %266, %267 : vector<8x128xf32>
    %269 = arith.mulf %263, %268 : vector<8x128xf32>
    %c0_139 = arith.constant 0 : index
    %c0_140 = arith.constant 0 : index
    %270 = vector.load %arg29[%c0_139, %c0_140] : memref<8x8xf32, #tpu.memory_space<vmem>>, vector<8x8xf32>
    %271 = arith.truncf %270 : vector<8x8xf32> to vector<8x8xbf16>
    %272 = arith.truncf %269 : vector<8x128xf32> to vector<8x128xbf16>
    %cst_141 = arith.constant dense<0.000000e+00> : vector<8x128xf32>
    %273 = tpu.matmul %271, %272, %cst_141 {dimension_numbers = #tpu.dot_dimension_numbers<[1], [0], [0], [1], [0, 0, 1, 1], [], []>} : vector<8x8xbf16>, vector<8x128xbf16>, vector<8x128xf32> -> vector<8x128xf32>
    %c0_142 = arith.constant 0 : index
    %c0_143 = arith.constant 0 : index
    %274 = vector.load %arg30[%c0_142, %c0_143] : memref<8x1xf32, #tpu.memory_space<vmem>>, vector<8x1xf32>
    %275 = vector.broadcast %274 : vector<8x1xf32> to vector<8x128xf32>
    %276 = arith.addf %273, %275 : vector<8x128xf32>
    %c0_144 = arith.constant 0 : index
    %c0_145 = arith.constant 0 : index
    %c0_146 = arith.constant 0 : index
    %277 = vector.load %arg5[%c0_144, %c0_145, %c0_146] : memref<3x128x128xbf16, #tpu.memory_space<vmem>>, vector<1x128x128xbf16>
    %278 = vector.shape_cast %277 : vector<1x128x128xbf16> to vector<128x128xbf16>
    %279 = arith.truncf %269 : vector<8x128xf32> to vector<8x128xbf16>
    %cst_147 = arith.constant dense<0.000000e+00> : vector<8x128xf32>
    %280 = tpu.matmul %279, %278, %cst_147 {dimension_numbers = #tpu.dot_dimension_numbers<[1], [0], [0], [1], [0, 0, 1, 1], [], []>} : vector<8x128xbf16>, vector<128x128xbf16>, vector<8x128xf32> -> vector<8x128xf32>
    %c2_148 = arith.constant 2 : index
    %c0_149 = arith.constant 0 : index
    %c0_150 = arith.constant 0 : index
    %281 = vector.load %arg5[%c2_148, %c0_149, %c0_150] : memref<3x128x128xbf16, #tpu.memory_space<vmem>>, vector<1x128x128xbf16>
    %282 = vector.shape_cast %281 : vector<1x128x128xbf16> to vector<128x128xbf16>
    %283 = arith.truncf %269 : vector<8x128xf32> to vector<8x128xbf16>
    %cst_151 = arith.constant dense<0.000000e+00> : vector<8x128xf32>
    %284 = tpu.matmul %283, %282, %cst_151 {dimension_numbers = #tpu.dot_dimension_numbers<[1], [0], [0], [1], [0, 0, 1, 1], [], []>} : vector<8x128xbf16>, vector<128x128xbf16>, vector<8x128xf32> -> vector<8x128xf32>
    %c0_152 = arith.constant 0 : index
    %c0_153 = arith.constant 0 : index
    %c0_154 = arith.constant 0 : index
    %285 = vector.load %arg31[%c0_152, %c0_153, %c0_154] : memref<3x8x8xf32, #tpu.memory_space<vmem>>, vector<3x8x8xf32>
    %286 = vector.extract_strided_slice %285 {offsets = [0, 0, 0], sizes = [1, 8, 8], strides = [1, 1, 1]} : vector<3x8x8xf32> to vector<1x8x8xf32>
    %287 = vector.shape_cast %286 : vector<1x8x8xf32> to vector<8x8xf32>
    %288 = arith.truncf %287 : vector<8x8xf32> to vector<8x8xbf16>
    %289 = arith.truncf %280 : vector<8x128xf32> to vector<8x128xbf16>
    %cst_155 = arith.constant dense<0.000000e+00> : vector<8x128xf32>
    %290 = tpu.matmul %288, %289, %cst_155 {dimension_numbers = #tpu.dot_dimension_numbers<[1], [0], [0], [1], [0, 0, 1, 1], [], []>} : vector<8x8xbf16>, vector<8x128xbf16>, vector<8x128xf32> -> vector<8x128xf32>
    %291 = vector.extract_strided_slice %285 {offsets = [1, 0, 0], sizes = [1, 8, 8], strides = [1, 1, 1]} : vector<3x8x8xf32> to vector<1x8x8xf32>
    %292 = vector.shape_cast %291 : vector<1x8x8xf32> to vector<8x8xf32>
    %293 = arith.truncf %292 : vector<8x8xf32> to vector<8x8xbf16>
    %294 = arith.truncf %269 : vector<8x128xf32> to vector<8x128xbf16>
    %cst_156 = arith.constant dense<0.000000e+00> : vector<8x128xf32>
    %295 = tpu.matmul %293, %294, %cst_156 {dimension_numbers = #tpu.dot_dimension_numbers<[1], [0], [0], [1], [0, 0, 1, 1], [], []>} : vector<8x8xbf16>, vector<8x128xbf16>, vector<8x128xf32> -> vector<8x128xf32>
    %296 = arith.addf %290, %295 : vector<8x128xf32>
    %297 = vector.extract_strided_slice %285 {offsets = [2, 0, 0], sizes = [1, 8, 8], strides = [1, 1, 1]} : vector<3x8x8xf32> to vector<1x8x8xf32>
    %298 = vector.shape_cast %297 : vector<1x8x8xf32> to vector<8x8xf32>
    %299 = arith.truncf %298 : vector<8x8xf32> to vector<8x8xbf16>
    %300 = arith.truncf %284 : vector<8x128xf32> to vector<8x128xbf16>
    %cst_157 = arith.constant dense<0.000000e+00> : vector<8x128xf32>
    %301 = tpu.matmul %299, %300, %cst_157 {dimension_numbers = #tpu.dot_dimension_numbers<[1], [0], [0], [1], [0, 0, 1, 1], [], []>} : vector<8x8xbf16>, vector<8x128xbf16>, vector<8x128xf32> -> vector<8x128xf32>
    %302 = arith.addf %296, %301 : vector<8x128xf32>
    %c0_158 = arith.constant 0 : index
    %c0_159 = arith.constant 0 : index
    %303 = vector.load %arg32[%c0_158, %c0_159] : memref<8x1xf32, #tpu.memory_space<vmem>>, vector<8x1xf32>
    %304 = vector.broadcast %303 : vector<8x1xf32> to vector<8x128xf32>
    %305 = arith.addf %302, %304 : vector<8x128xf32>
    %306 = arith.addf %305, %276 : vector<8x128xf32>
    %cst_160 = arith.constant 0.000000e+00 : f32
    %307 = vector.broadcast %cst_160 : f32 to vector<8x128xf32>
    %308 = arith.maximumf %306, %307 : vector<8x128xf32>
    %c0_161 = arith.constant 0 : index
    %c0_162 = arith.constant 0 : index
    %c0_163 = arith.constant 0 : index
    %309 = vector.load %arg33[%c0_161, %c0_162, %c0_163] : memref<3x8x8xf32, #tpu.memory_space<vmem>>, vector<3x8x8xf32>
    %c0_164 = arith.constant 0 : index
    %c0_165 = arith.constant 0 : index
    %c0_166 = arith.constant 0 : index
    %310 = vector.load %arg4[%c0_164, %c0_165, %c0_166] : memref<3x128x128xbf16, #tpu.memory_space<vmem>>, vector<1x128x128xbf16>
    %311 = vector.shape_cast %310 : vector<1x128x128xbf16> to vector<128x128xbf16>
    %312 = arith.truncf %308 : vector<8x128xf32> to vector<8x128xbf16>
    %cst_167 = arith.constant dense<0.000000e+00> : vector<8x128xf32>
    %313 = tpu.matmul %312, %311, %cst_167 {dimension_numbers = #tpu.dot_dimension_numbers<[1], [0], [0], [1], [0, 0, 1, 1], [], []>} : vector<8x128xbf16>, vector<128x128xbf16>, vector<8x128xf32> -> vector<8x128xf32>
    %314 = vector.extract_strided_slice %309 {offsets = [0, 0, 0], sizes = [1, 8, 8], strides = [1, 1, 1]} : vector<3x8x8xf32> to vector<1x8x8xf32>
    %315 = vector.shape_cast %314 : vector<1x8x8xf32> to vector<8x8xf32>
    %316 = arith.truncf %315 : vector<8x8xf32> to vector<8x8xbf16>
    %317 = arith.truncf %313 : vector<8x128xf32> to vector<8x128xbf16>
    %cst_168 = arith.constant dense<0.000000e+00> : vector<8x128xf32>
    %318 = tpu.matmul %316, %317, %cst_168 {dimension_numbers = #tpu.dot_dimension_numbers<[1], [0], [0], [1], [0, 0, 1, 1], [], []>} : vector<8x8xbf16>, vector<8x128xbf16>, vector<8x128xf32> -> vector<8x128xf32>
    %c1_169 = arith.constant 1 : index
    %c0_170 = arith.constant 0 : index
    %c0_171 = arith.constant 0 : index
    %319 = vector.load %arg4[%c1_169, %c0_170, %c0_171] : memref<3x128x128xbf16, #tpu.memory_space<vmem>>, vector<1x128x128xbf16>
    %320 = vector.shape_cast %319 : vector<1x128x128xbf16> to vector<128x128xbf16>
    %321 = arith.truncf %308 : vector<8x128xf32> to vector<8x128xbf16>
    %cst_172 = arith.constant dense<0.000000e+00> : vector<8x128xf32>
    %322 = tpu.matmul %321, %320, %cst_172 {dimension_numbers = #tpu.dot_dimension_numbers<[1], [0], [0], [1], [0, 0, 1, 1], [], []>} : vector<8x128xbf16>, vector<128x128xbf16>, vector<8x128xf32> -> vector<8x128xf32>
    %323 = vector.extract_strided_slice %309 {offsets = [1, 0, 0], sizes = [1, 8, 8], strides = [1, 1, 1]} : vector<3x8x8xf32> to vector<1x8x8xf32>
    %324 = vector.shape_cast %323 : vector<1x8x8xf32> to vector<8x8xf32>
    %325 = arith.truncf %324 : vector<8x8xf32> to vector<8x8xbf16>
    %326 = arith.truncf %322 : vector<8x128xf32> to vector<8x128xbf16>
    %cst_173 = arith.constant dense<0.000000e+00> : vector<8x128xf32>
    %327 = tpu.matmul %325, %326, %cst_173 {dimension_numbers = #tpu.dot_dimension_numbers<[1], [0], [0], [1], [0, 0, 1, 1], [], []>} : vector<8x8xbf16>, vector<8x128xbf16>, vector<8x128xf32> -> vector<8x128xf32>
    %328 = arith.addf %318, %327 : vector<8x128xf32>
    %c2_174 = arith.constant 2 : index
    %c0_175 = arith.constant 0 : index
    %c0_176 = arith.constant 0 : index
    %329 = vector.load %arg4[%c2_174, %c0_175, %c0_176] : memref<3x128x128xbf16, #tpu.memory_space<vmem>>, vector<1x128x128xbf16>
    %330 = vector.shape_cast %329 : vector<1x128x128xbf16> to vector<128x128xbf16>
    %331 = arith.truncf %308 : vector<8x128xf32> to vector<8x128xbf16>
    %cst_177 = arith.constant dense<0.000000e+00> : vector<8x128xf32>
    %332 = tpu.matmul %331, %330, %cst_177 {dimension_numbers = #tpu.dot_dimension_numbers<[1], [0], [0], [1], [0, 0, 1, 1], [], []>} : vector<8x128xbf16>, vector<128x128xbf16>, vector<8x128xf32> -> vector<8x128xf32>
    %333 = vector.extract_strided_slice %309 {offsets = [2, 0, 0], sizes = [1, 8, 8], strides = [1, 1, 1]} : vector<3x8x8xf32> to vector<1x8x8xf32>
    %334 = vector.shape_cast %333 : vector<1x8x8xf32> to vector<8x8xf32>
    %335 = arith.truncf %334 : vector<8x8xf32> to vector<8x8xbf16>
    %336 = arith.truncf %332 : vector<8x128xf32> to vector<8x128xbf16>
    %cst_178 = arith.constant dense<0.000000e+00> : vector<8x128xf32>
    %337 = tpu.matmul %335, %336, %cst_178 {dimension_numbers = #tpu.dot_dimension_numbers<[1], [0], [0], [1], [0, 0, 1, 1], [], []>} : vector<8x8xbf16>, vector<8x128xbf16>, vector<8x128xf32> -> vector<8x128xf32>
    %338 = arith.addf %328, %337 : vector<8x128xf32>
    %c0_179 = arith.constant 0 : index
    %c0_180 = arith.constant 0 : index
    %339 = vector.load %arg34[%c0_179, %c0_180] : memref<8x1xf32, #tpu.memory_space<vmem>>, vector<8x1xf32>
    %340 = vector.broadcast %339 : vector<8x1xf32> to vector<8x128xf32>
    %341 = arith.addf %338, %340 : vector<8x128xf32>
    %cst_181 = arith.constant 0.000000e+00 : f32
    %342 = vector.broadcast %cst_181 : f32 to vector<8x128xf32>
    %343 = arith.maximumf %341, %342 : vector<8x128xf32>
    %c0_182 = arith.constant 0 : index
    %c0_183 = arith.constant 0 : index
    %c0_184 = arith.constant 0 : index
    %344 = vector.load %arg5[%c0_182, %c0_183, %c0_184] : memref<3x128x128xbf16, #tpu.memory_space<vmem>>, vector<1x128x128xbf16>
    %345 = vector.shape_cast %344 : vector<1x128x128xbf16> to vector<128x128xbf16>
    %346 = arith.truncf %343 : vector<8x128xf32> to vector<8x128xbf16>
    %cst_185 = arith.constant dense<0.000000e+00> : vector<8x128xf32>
    %347 = tpu.matmul %346, %345, %cst_185 {dimension_numbers = #tpu.dot_dimension_numbers<[1], [0], [0], [1], [0, 0, 1, 1], [], []>} : vector<8x128xbf16>, vector<128x128xbf16>, vector<8x128xf32> -> vector<8x128xf32>
    %c2_186 = arith.constant 2 : index
    %c0_187 = arith.constant 0 : index
    %c0_188 = arith.constant 0 : index
    %348 = vector.load %arg5[%c2_186, %c0_187, %c0_188] : memref<3x128x128xbf16, #tpu.memory_space<vmem>>, vector<1x128x128xbf16>
    %349 = vector.shape_cast %348 : vector<1x128x128xbf16> to vector<128x128xbf16>
    %350 = arith.truncf %343 : vector<8x128xf32> to vector<8x128xbf16>
    %cst_189 = arith.constant dense<0.000000e+00> : vector<8x128xf32>
    %351 = tpu.matmul %350, %349, %cst_189 {dimension_numbers = #tpu.dot_dimension_numbers<[1], [0], [0], [1], [0, 0, 1, 1], [], []>} : vector<8x128xbf16>, vector<128x128xbf16>, vector<8x128xf32> -> vector<8x128xf32>
    %c0_190 = arith.constant 0 : index
    %c0_191 = arith.constant 0 : index
    %c0_192 = arith.constant 0 : index
    %352 = vector.load %arg35[%c0_190, %c0_191, %c0_192] : memref<3x8x8xf32, #tpu.memory_space<vmem>>, vector<3x8x8xf32>
    %353 = vector.extract_strided_slice %352 {offsets = [0, 0, 0], sizes = [1, 8, 8], strides = [1, 1, 1]} : vector<3x8x8xf32> to vector<1x8x8xf32>
    %354 = vector.shape_cast %353 : vector<1x8x8xf32> to vector<8x8xf32>
    %355 = arith.truncf %354 : vector<8x8xf32> to vector<8x8xbf16>
    %356 = arith.truncf %347 : vector<8x128xf32> to vector<8x128xbf16>
    %cst_193 = arith.constant dense<0.000000e+00> : vector<8x128xf32>
    %357 = tpu.matmul %355, %356, %cst_193 {dimension_numbers = #tpu.dot_dimension_numbers<[1], [0], [0], [1], [0, 0, 1, 1], [], []>} : vector<8x8xbf16>, vector<8x128xbf16>, vector<8x128xf32> -> vector<8x128xf32>
    %358 = vector.extract_strided_slice %352 {offsets = [1, 0, 0], sizes = [1, 8, 8], strides = [1, 1, 1]} : vector<3x8x8xf32> to vector<1x8x8xf32>
    %359 = vector.shape_cast %358 : vector<1x8x8xf32> to vector<8x8xf32>
    %360 = arith.truncf %359 : vector<8x8xf32> to vector<8x8xbf16>
    %361 = arith.truncf %343 : vector<8x128xf32> to vector<8x128xbf16>
    %cst_194 = arith.constant dense<0.000000e+00> : vector<8x128xf32>
    %362 = tpu.matmul %360, %361, %cst_194 {dimension_numbers = #tpu.dot_dimension_numbers<[1], [0], [0], [1], [0, 0, 1, 1], [], []>} : vector<8x8xbf16>, vector<8x128xbf16>, vector<8x128xf32> -> vector<8x128xf32>
    %363 = arith.addf %357, %362 : vector<8x128xf32>
    %364 = vector.extract_strided_slice %352 {offsets = [2, 0, 0], sizes = [1, 8, 8], strides = [1, 1, 1]} : vector<3x8x8xf32> to vector<1x8x8xf32>
    %365 = vector.shape_cast %364 : vector<1x8x8xf32> to vector<8x8xf32>
    %366 = arith.truncf %365 : vector<8x8xf32> to vector<8x8xbf16>
    %367 = arith.truncf %351 : vector<8x128xf32> to vector<8x128xbf16>
    %cst_195 = arith.constant dense<0.000000e+00> : vector<8x128xf32>
    %368 = tpu.matmul %366, %367, %cst_195 {dimension_numbers = #tpu.dot_dimension_numbers<[1], [0], [0], [1], [0, 0, 1, 1], [], []>} : vector<8x8xbf16>, vector<8x128xbf16>, vector<8x128xf32> -> vector<8x128xf32>
    %369 = arith.addf %363, %368 : vector<8x128xf32>
    %c0_196 = arith.constant 0 : index
    %c0_197 = arith.constant 0 : index
    %370 = vector.load %arg36[%c0_196, %c0_197] : memref<8x1xf32, #tpu.memory_space<vmem>>, vector<8x1xf32>
    %371 = vector.broadcast %370 : vector<8x1xf32> to vector<8x128xf32>
    %372 = arith.addf %369, %371 : vector<8x128xf32>
    %c0_198 = arith.constant 0 : index
    %c0_199 = arith.constant 0 : index
    %c0_200 = arith.constant 0 : index
    %373 = vector.load %arg37[%c0_198, %c0_199, %c0_200] : memref<3x8x8xf32, #tpu.memory_space<vmem>>, vector<3x8x8xf32>
    %374 = vector.extract_strided_slice %373 {offsets = [0, 0, 0], sizes = [1, 8, 8], strides = [1, 1, 1]} : vector<3x8x8xf32> to vector<1x8x8xf32>
    %375 = vector.shape_cast %374 : vector<1x8x8xf32> to vector<8x8xf32>
    %376 = arith.truncf %375 : vector<8x8xf32> to vector<8x8xbf16>
    %377 = arith.truncf %347 : vector<8x128xf32> to vector<8x128xbf16>
    %cst_201 = arith.constant dense<0.000000e+00> : vector<8x128xf32>
    %378 = tpu.matmul %376, %377, %cst_201 {dimension_numbers = #tpu.dot_dimension_numbers<[1], [0], [0], [1], [0, 0, 1, 1], [], []>} : vector<8x8xbf16>, vector<8x128xbf16>, vector<8x128xf32> -> vector<8x128xf32>
    %379 = vector.extract_strided_slice %373 {offsets = [1, 0, 0], sizes = [1, 8, 8], strides = [1, 1, 1]} : vector<3x8x8xf32> to vector<1x8x8xf32>
    %380 = vector.shape_cast %379 : vector<1x8x8xf32> to vector<8x8xf32>
    %381 = arith.truncf %380 : vector<8x8xf32> to vector<8x8xbf16>
    %382 = arith.truncf %343 : vector<8x128xf32> to vector<8x128xbf16>
    %cst_202 = arith.constant dense<0.000000e+00> : vector<8x128xf32>
    %383 = tpu.matmul %381, %382, %cst_202 {dimension_numbers = #tpu.dot_dimension_numbers<[1], [0], [0], [1], [0, 0, 1, 1], [], []>} : vector<8x8xbf16>, vector<8x128xbf16>, vector<8x128xf32> -> vector<8x128xf32>
    %384 = arith.addf %378, %383 : vector<8x128xf32>
    %385 = vector.extract_strided_slice %373 {offsets = [2, 0, 0], sizes = [1, 8, 8], strides = [1, 1, 1]} : vector<3x8x8xf32> to vector<1x8x8xf32>
    %386 = vector.shape_cast %385 : vector<1x8x8xf32> to vector<8x8xf32>
    %387 = arith.truncf %386 : vector<8x8xf32> to vector<8x8xbf16>
    %388 = arith.truncf %351 : vector<8x128xf32> to vector<8x128xbf16>
    %cst_203 = arith.constant dense<0.000000e+00> : vector<8x128xf32>
    %389 = tpu.matmul %387, %388, %cst_203 {dimension_numbers = #tpu.dot_dimension_numbers<[1], [0], [0], [1], [0, 0, 1, 1], [], []>} : vector<8x8xbf16>, vector<8x128xbf16>, vector<8x128xf32> -> vector<8x128xf32>
    %390 = arith.addf %384, %389 : vector<8x128xf32>
    %c0_204 = arith.constant 0 : index
    %c0_205 = arith.constant 0 : index
    %391 = vector.load %arg38[%c0_204, %c0_205] : memref<8x1xf32, #tpu.memory_space<vmem>>, vector<8x1xf32>
    %392 = vector.broadcast %391 : vector<8x1xf32> to vector<8x128xf32>
    %393 = arith.addf %390, %392 : vector<8x128xf32>
    %394 = arith.addf %372, %343 : vector<8x128xf32>
    %395 = arith.negf %393 : vector<8x128xf32>
    %396 = math.exp %395 : vector<8x128xf32>
    %cst_206 = arith.constant 1.000000e+00 : f32
    %397 = vector.broadcast %cst_206 : f32 to vector<8x128xf32>
    %398 = arith.addf %397, %396 : vector<8x128xf32>
    %399 = arith.divf %397, %398 : vector<8x128xf32>
    %400 = arith.mulf %394, %399 : vector<8x128xf32>
    %c0_207 = arith.constant 0 : index
    %c0_208 = arith.constant 0 : index
    %c0_209 = arith.constant 0 : index
    %401 = vector.load %arg6[%c0_207, %c0_208, %c0_209] : memref<8x128x16xbf16, #tpu.memory_space<vmem>>, vector<1x128x16xbf16>
    %402 = vector.shape_cast %401 : vector<1x128x16xbf16> to vector<128x16xbf16>
    %403 = arith.truncf %400 : vector<8x128xf32> to vector<8x128xbf16>
    %cst_210 = arith.constant dense<0.000000e+00> : vector<8x16xf32>
    %404 = tpu.matmul %403, %402, %cst_210 {dimension_numbers = #tpu.dot_dimension_numbers<[1], [0], [0], [1], [0, 0, 1, 1], [], []>} : vector<8x128xbf16>, vector<128x16xbf16>, vector<8x16xf32> -> vector<8x16xf32>
    %c0_211 = arith.constant 0 : index
    %c0_212 = arith.constant 0 : index
    %c0_213 = arith.constant 0 : index
    %405 = vector.load %arg7[%c0_211, %c0_212, %c0_213] : memref<8x12x8xf32, #tpu.memory_space<vmem>>, vector<1x12x8xf32>
    %406 = vector.shape_cast %405 : vector<1x12x8xf32> to vector<12x8xf32>
    %407 = arith.truncf %406 : vector<12x8xf32> to vector<12x8xbf16>
    %408 = arith.truncf %404 : vector<8x16xf32> to vector<8x16xbf16>
    %cst_214 = arith.constant dense<0.000000e+00> : vector<12x16xf32>
    %409 = tpu.matmul %407, %408, %cst_214 {dimension_numbers = #tpu.dot_dimension_numbers<[1], [0], [0], [1], [0, 0, 1, 1], [], []>} : vector<12x8xbf16>, vector<8x16xbf16>, vector<12x16xf32> -> vector<12x16xf32>
    %c1_215 = arith.constant 1 : index
    %c0_216 = arith.constant 0 : index
    %c0_217 = arith.constant 0 : index
    %410 = vector.load %arg6[%c1_215, %c0_216, %c0_217] : memref<8x128x16xbf16, #tpu.memory_space<vmem>>, vector<1x128x16xbf16>
    %411 = vector.shape_cast %410 : vector<1x128x16xbf16> to vector<128x16xbf16>
    %412 = arith.truncf %400 : vector<8x128xf32> to vector<8x128xbf16>
    %cst_218 = arith.constant dense<0.000000e+00> : vector<8x16xf32>
    %413 = tpu.matmul %412, %411, %cst_218 {dimension_numbers = #tpu.dot_dimension_numbers<[1], [0], [0], [1], [0, 0, 1, 1], [], []>} : vector<8x128xbf16>, vector<128x16xbf16>, vector<8x16xf32> -> vector<8x16xf32>
    %c1_219 = arith.constant 1 : index
    %c0_220 = arith.constant 0 : index
    %c0_221 = arith.constant 0 : index
    %414 = vector.load %arg7[%c1_219, %c0_220, %c0_221] : memref<8x12x8xf32, #tpu.memory_space<vmem>>, vector<1x12x8xf32>
    %415 = vector.shape_cast %414 : vector<1x12x8xf32> to vector<12x8xf32>
    %416 = arith.truncf %415 : vector<12x8xf32> to vector<12x8xbf16>
    %417 = arith.truncf %413 : vector<8x16xf32> to vector<8x16xbf16>
    %cst_222 = arith.constant dense<0.000000e+00> : vector<12x16xf32>
    %418 = tpu.matmul %416, %417, %cst_222 {dimension_numbers = #tpu.dot_dimension_numbers<[1], [0], [0], [1], [0, 0, 1, 1], [], []>} : vector<12x8xbf16>, vector<8x16xbf16>, vector<12x16xf32> -> vector<12x16xf32>
    %419 = arith.addf %409, %418 : vector<12x16xf32>
    %c2_223 = arith.constant 2 : index
    %c0_224 = arith.constant 0 : index
    %c0_225 = arith.constant 0 : index
    %420 = vector.load %arg6[%c2_223, %c0_224, %c0_225] : memref<8x128x16xbf16, #tpu.memory_space<vmem>>, vector<1x128x16xbf16>
    %421 = vector.shape_cast %420 : vector<1x128x16xbf16> to vector<128x16xbf16>
    %422 = arith.truncf %400 : vector<8x128xf32> to vector<8x128xbf16>
    %cst_226 = arith.constant dense<0.000000e+00> : vector<8x16xf32>
    %423 = tpu.matmul %422, %421, %cst_226 {dimension_numbers = #tpu.dot_dimension_numbers<[1], [0], [0], [1], [0, 0, 1, 1], [], []>} : vector<8x128xbf16>, vector<128x16xbf16>, vector<8x16xf32> -> vector<8x16xf32>
    %c2_227 = arith.constant 2 : index
    %c0_228 = arith.constant 0 : index
    %c0_229 = arith.constant 0 : index
    %424 = vector.load %arg7[%c2_227, %c0_228, %c0_229] : memref<8x12x8xf32, #tpu.memory_space<vmem>>, vector<1x12x8xf32>
    %425 = vector.shape_cast %424 : vector<1x12x8xf32> to vector<12x8xf32>
    %426 = arith.truncf %425 : vector<12x8xf32> to vector<12x8xbf16>
    %427 = arith.truncf %423 : vector<8x16xf32> to vector<8x16xbf16>
    %cst_230 = arith.constant dense<0.000000e+00> : vector<12x16xf32>
    %428 = tpu.matmul %426, %427, %cst_230 {dimension_numbers = #tpu.dot_dimension_numbers<[1], [0], [0], [1], [0, 0, 1, 1], [], []>} : vector<12x8xbf16>, vector<8x16xbf16>, vector<12x16xf32> -> vector<12x16xf32>
    %429 = arith.addf %419, %428 : vector<12x16xf32>
    %c3 = arith.constant 3 : index
    %c0_231 = arith.constant 0 : index
    %c0_232 = arith.constant 0 : index
    %430 = vector.load %arg6[%c3, %c0_231, %c0_232] : memref<8x128x16xbf16, #tpu.memory_space<vmem>>, vector<1x128x16xbf16>
    %431 = vector.shape_cast %430 : vector<1x128x16xbf16> to vector<128x16xbf16>
    %432 = arith.truncf %400 : vector<8x128xf32> to vector<8x128xbf16>
    %cst_233 = arith.constant dense<0.000000e+00> : vector<8x16xf32>
    %433 = tpu.matmul %432, %431, %cst_233 {dimension_numbers = #tpu.dot_dimension_numbers<[1], [0], [0], [1], [0, 0, 1, 1], [], []>} : vector<8x128xbf16>, vector<128x16xbf16>, vector<8x16xf32> -> vector<8x16xf32>
    %c3_234 = arith.constant 3 : index
    %c0_235 = arith.constant 0 : index
    %c0_236 = arith.constant 0 : index
    %434 = vector.load %arg7[%c3_234, %c0_235, %c0_236] : memref<8x12x8xf32, #tpu.memory_space<vmem>>, vector<1x12x8xf32>
    %435 = vector.shape_cast %434 : vector<1x12x8xf32> to vector<12x8xf32>
    %436 = arith.truncf %435 : vector<12x8xf32> to vector<12x8xbf16>
    %437 = arith.truncf %433 : vector<8x16xf32> to vector<8x16xbf16>
    %cst_237 = arith.constant dense<0.000000e+00> : vector<12x16xf32>
    %438 = tpu.matmul %436, %437, %cst_237 {dimension_numbers = #tpu.dot_dimension_numbers<[1], [0], [0], [1], [0, 0, 1, 1], [], []>} : vector<12x8xbf16>, vector<8x16xbf16>, vector<12x16xf32> -> vector<12x16xf32>
    %439 = arith.addf %429, %438 : vector<12x16xf32>
    %c4 = arith.constant 4 : index
    %c0_238 = arith.constant 0 : index
    %c0_239 = arith.constant 0 : index
    %440 = vector.load %arg6[%c4, %c0_238, %c0_239] : memref<8x128x16xbf16, #tpu.memory_space<vmem>>, vector<1x128x16xbf16>
    %441 = vector.shape_cast %440 : vector<1x128x16xbf16> to vector<128x16xbf16>
    %442 = arith.truncf %400 : vector<8x128xf32> to vector<8x128xbf16>
    %cst_240 = arith.constant dense<0.000000e+00> : vector<8x16xf32>
    %443 = tpu.matmul %442, %441, %cst_240 {dimension_numbers = #tpu.dot_dimension_numbers<[1], [0], [0], [1], [0, 0, 1, 1], [], []>} : vector<8x128xbf16>, vector<128x16xbf16>, vector<8x16xf32> -> vector<8x16xf32>
    %c4_241 = arith.constant 4 : index
    %c0_242 = arith.constant 0 : index
    %c0_243 = arith.constant 0 : index
    %444 = vector.load %arg7[%c4_241, %c0_242, %c0_243] : memref<8x12x8xf32, #tpu.memory_space<vmem>>, vector<1x12x8xf32>
    %445 = vector.shape_cast %444 : vector<1x12x8xf32> to vector<12x8xf32>
    %446 = arith.truncf %445 : vector<12x8xf32> to vector<12x8xbf16>
    %447 = arith.truncf %443 : vector<8x16xf32> to vector<8x16xbf16>
    %cst_244 = arith.constant dense<0.000000e+00> : vector<12x16xf32>
    %448 = tpu.matmul %446, %447, %cst_244 {dimension_numbers = #tpu.dot_dimension_numbers<[1], [0], [0], [1], [0, 0, 1, 1], [], []>} : vector<12x8xbf16>, vector<8x16xbf16>, vector<12x16xf32> -> vector<12x16xf32>
    %449 = arith.addf %439, %448 : vector<12x16xf32>
    %c5 = arith.constant 5 : index
    %c0_245 = arith.constant 0 : index
    %c0_246 = arith.constant 0 : index
    %450 = vector.load %arg6[%c5, %c0_245, %c0_246] : memref<8x128x16xbf16, #tpu.memory_space<vmem>>, vector<1x128x16xbf16>
    %451 = vector.shape_cast %450 : vector<1x128x16xbf16> to vector<128x16xbf16>
    %452 = arith.truncf %400 : vector<8x128xf32> to vector<8x128xbf16>
    %cst_247 = arith.constant dense<0.000000e+00> : vector<8x16xf32>
    %453 = tpu.matmul %452, %451, %cst_247 {dimension_numbers = #tpu.dot_dimension_numbers<[1], [0], [0], [1], [0, 0, 1, 1], [], []>} : vector<8x128xbf16>, vector<128x16xbf16>, vector<8x16xf32> -> vector<8x16xf32>
    %c5_248 = arith.constant 5 : index
    %c0_249 = arith.constant 0 : index
    %c0_250 = arith.constant 0 : index
    %454 = vector.load %arg7[%c5_248, %c0_249, %c0_250] : memref<8x12x8xf32, #tpu.memory_space<vmem>>, vector<1x12x8xf32>
    %455 = vector.shape_cast %454 : vector<1x12x8xf32> to vector<12x8xf32>
    %456 = arith.truncf %455 : vector<12x8xf32> to vector<12x8xbf16>
    %457 = arith.truncf %453 : vector<8x16xf32> to vector<8x16xbf16>
    %cst_251 = arith.constant dense<0.000000e+00> : vector<12x16xf32>
    %458 = tpu.matmul %456, %457, %cst_251 {dimension_numbers = #tpu.dot_dimension_numbers<[1], [0], [0], [1], [0, 0, 1, 1], [], []>} : vector<12x8xbf16>, vector<8x16xbf16>, vector<12x16xf32> -> vector<12x16xf32>
    %459 = arith.addf %449, %458 : vector<12x16xf32>
    %c6 = arith.constant 6 : index
    %c0_252 = arith.constant 0 : index
    %c0_253 = arith.constant 0 : index
    %460 = vector.load %arg6[%c6, %c0_252, %c0_253] : memref<8x128x16xbf16, #tpu.memory_space<vmem>>, vector<1x128x16xbf16>
    %461 = vector.shape_cast %460 : vector<1x128x16xbf16> to vector<128x16xbf16>
    %462 = arith.truncf %400 : vector<8x128xf32> to vector<8x128xbf16>
    %cst_254 = arith.constant dense<0.000000e+00> : vector<8x16xf32>
    %463 = tpu.matmul %462, %461, %cst_254 {dimension_numbers = #tpu.dot_dimension_numbers<[1], [0], [0], [1], [0, 0, 1, 1], [], []>} : vector<8x128xbf16>, vector<128x16xbf16>, vector<8x16xf32> -> vector<8x16xf32>
    %c6_255 = arith.constant 6 : index
    %c0_256 = arith.constant 0 : index
    %c0_257 = arith.constant 0 : index
    %464 = vector.load %arg7[%c6_255, %c0_256, %c0_257] : memref<8x12x8xf32, #tpu.memory_space<vmem>>, vector<1x12x8xf32>
    %465 = vector.shape_cast %464 : vector<1x12x8xf32> to vector<12x8xf32>
    %466 = arith.truncf %465 : vector<12x8xf32> to vector<12x8xbf16>
    %467 = arith.truncf %463 : vector<8x16xf32> to vector<8x16xbf16>
    %cst_258 = arith.constant dense<0.000000e+00> : vector<12x16xf32>
    %468 = tpu.matmul %466, %467, %cst_258 {dimension_numbers = #tpu.dot_dimension_numbers<[1], [0], [0], [1], [0, 0, 1, 1], [], []>} : vector<12x8xbf16>, vector<8x16xbf16>, vector<12x16xf32> -> vector<12x16xf32>
    %469 = arith.addf %459, %468 : vector<12x16xf32>
    %c7 = arith.constant 7 : index
    %c0_259 = arith.constant 0 : index
    %c0_260 = arith.constant 0 : index
    %470 = vector.load %arg6[%c7, %c0_259, %c0_260] : memref<8x128x16xbf16, #tpu.memory_space<vmem>>, vector<1x128x16xbf16>
    %471 = vector.shape_cast %470 : vector<1x128x16xbf16> to vector<128x16xbf16>
    %472 = arith.truncf %400 : vector<8x128xf32> to vector<8x128xbf16>
    %cst_261 = arith.constant dense<0.000000e+00> : vector<8x16xf32>
    %473 = tpu.matmul %472, %471, %cst_261 {dimension_numbers = #tpu.dot_dimension_numbers<[1], [0], [0], [1], [0, 0, 1, 1], [], []>} : vector<8x128xbf16>, vector<128x16xbf16>, vector<8x16xf32> -> vector<8x16xf32>
    %c7_262 = arith.constant 7 : index
    %c0_263 = arith.constant 0 : index
    %c0_264 = arith.constant 0 : index
    %474 = vector.load %arg7[%c7_262, %c0_263, %c0_264] : memref<8x12x8xf32, #tpu.memory_space<vmem>>, vector<1x12x8xf32>
    %475 = vector.shape_cast %474 : vector<1x12x8xf32> to vector<12x8xf32>
    %476 = arith.truncf %475 : vector<12x8xf32> to vector<12x8xbf16>
    %477 = arith.truncf %473 : vector<8x16xf32> to vector<8x16xbf16>
    %cst_265 = arith.constant dense<0.000000e+00> : vector<12x16xf32>
    %478 = tpu.matmul %476, %477, %cst_265 {dimension_numbers = #tpu.dot_dimension_numbers<[1], [0], [0], [1], [0, 0, 1, 1], [], []>} : vector<12x8xbf16>, vector<8x16xbf16>, vector<12x16xf32> -> vector<12x16xf32>
    %479 = arith.addf %469, %478 : vector<12x16xf32>
    %c0_266 = arith.constant 0 : index
    %c0_267 = arith.constant 0 : index
    %480 = vector.load %arg8[%c0_266, %c0_267] : memref<12x1xf32, #tpu.memory_space<vmem>>, vector<12x1xf32>
    %481 = vector.broadcast %480 : vector<12x1xf32> to vector<12x16xf32>
    %482 = arith.addf %479, %481 : vector<12x16xf32>
    %c0_268 = arith.constant 0 : index
    %c0_269 = arith.constant 0 : index
    %c0_270 = arith.constant 0 : index
    %483 = vector.load %arg39[%c0_268, %c0_269, %c0_270] : memref<1x12x16xf32, #tpu.memory_space<vmem>>, vector<1x12x16xf32>
    %484 = vector.shape_cast %483 : vector<1x12x16xf32> to vector<12x16xf32>
    %485 = vector.shape_cast %482 : vector<12x16xf32> to vector<1x12x16xf32>
    tpu.vector_store %arg39[%c0_268, %c0_269, %c0_270], %485 {strides = array<i32>} : memref<1x12x16xf32, #tpu.memory_space<vmem>>, vector<1x12x16xf32>,
    return
  }
  func.func @transform_0(%arg0: i32) -> (i32, i32, i32) {
    %c0_i32 = arith.constant 0 : i32
    %c0_i32_0 = arith.constant 0 : i32
    %c0_i32_1 = arith.constant 0 : i32
    return %arg0, %c0_i32, %c0_i32_0 : i32, i32, i32
  }
  func.func @transform_1(%arg0: i32) -> (i32, i32) {
    %c0_i32 = arith.constant 0 : i32
    %c0_i32_0 = arith.constant 0 : i32
    %c0_i32_1 = arith.constant 0 : i32
    return %c0_i32, %c0_i32_0 : i32, i32
  }
  func.func @transform_2(%arg0: i32) -> (i32, i32) {
    %c0_i32 = arith.constant 0 : i32
    %c0_i32_0 = arith.constant 0 : i32
    %c0_i32_1 = arith.constant 0 : i32
    return %c0_i32, %c0_i32_0 : i32, i32
  }
  func.func @transform_3(%arg0: i32) -> (i32, i32, i32) {
    %c0_i32 = arith.constant 0 : i32
    %c0_i32_0 = arith.constant 0 : i32
    %c0_i32_1 = arith.constant 0 : i32
    %c0_i32_2 = arith.constant 0 : i32
    return %c0_i32, %c0_i32_0, %c0_i32_1 : i32, i32, i32
  }
  func.func @transform_4(%arg0: i32) -> (i32, i32, i32) {
    %c0_i32 = arith.constant 0 : i32
    %c0_i32_0 = arith.constant 0 : i32
    %c0_i32_1 = arith.constant 0 : i32
    %c0_i32_2 = arith.constant 0 : i32
    return %c0_i32, %c0_i32_0, %c0_i32_1 : i32, i32, i32
  }
  func.func @transform_5(%arg0: i32) -> (i32, i32, i32) {
    %c0_i32 = arith.constant 0 : i32
    %c0_i32_0 = arith.constant 0 : i32
    %c0_i32_1 = arith.constant 0 : i32
    %c0_i32_2 = arith.constant 0 : i32
    return %c0_i32, %c0_i32_0, %c0_i32_1 : i32, i32, i32
  }
  func.func @transform_6(%arg0: i32) -> (i32, i32, i32) {
    %c0_i32 = arith.constant 0 : i32
    %c0_i32_0 = arith.constant 0 : i32
    %c0_i32_1 = arith.constant 0 : i32
    %c0_i32_2 = arith.constant 0 : i32
    return %c0_i32, %c0_i32_0, %c0_i32_1 : i32, i32, i32
  }
  func.func @transform_7(%arg0: i32) -> (i32, i32) {
    %c0_i32 = arith.constant 0 : i32
    %c0_i32_0 = arith.constant 0 : i32
    %c0_i32_1 = arith.constant 0 : i32
    return %c0_i32, %c0_i32_0 : i32, i32
  }
  func.func @transform_8(%arg0: i32) -> (i32, i32) {
    %c0_i32 = arith.constant 0 : i32
    %c0_i32_0 = arith.constant 0 : i32
    %c0_i32_1 = arith.constant 0 : i32
    return %c0_i32, %c0_i32_0 : i32, i32
  }
  func.func @transform_9(%arg0: i32) -> (i32, i32) {
    %c0_i32 = arith.constant 0 : i32
    %c0_i32_0 = arith.constant 0 : i32
    %c0_i32_1 = arith.constant 0 : i32
    return %c0_i32, %c0_i32_0 : i32, i32
  }
  func.func @transform_10(%arg0: i32) -> (i32, i32, i32) {
    %c0_i32 = arith.constant 0 : i32
    %c0_i32_0 = arith.constant 0 : i32
    %c0_i32_1 = arith.constant 0 : i32
    %c0_i32_2 = arith.constant 0 : i32
    return %c0_i32, %c0_i32_0, %c0_i32_1 : i32, i32, i32
  }
  func.func @transform_11(%arg0: i32) -> (i32, i32) {
    %c0_i32 = arith.constant 0 : i32
    %c0_i32_0 = arith.constant 0 : i32
    %c0_i32_1 = arith.constant 0 : i32
    return %c0_i32, %c0_i32_0 : i32, i32
  }
  func.func @transform_12(%arg0: i32) -> (i32, i32, i32) {
    %c0_i32 = arith.constant 0 : i32
    %c0_i32_0 = arith.constant 0 : i32
    %c0_i32_1 = arith.constant 0 : i32
    %c0_i32_2 = arith.constant 0 : i32
    return %c0_i32, %c0_i32_0, %c0_i32_1 : i32, i32, i32
  }
  func.func @transform_13(%arg0: i32) -> (i32, i32) {
    %c0_i32 = arith.constant 0 : i32
    %c0_i32_0 = arith.constant 0 : i32
    %c0_i32_1 = arith.constant 0 : i32
    return %c0_i32, %c0_i32_0 : i32, i32
  }
  func.func @transform_14(%arg0: i32) -> (i32, i32, i32) {
    %c0_i32 = arith.constant 0 : i32
    %c0_i32_0 = arith.constant 0 : i32
    %c0_i32_1 = arith.constant 0 : i32
    %c0_i32_2 = arith.constant 0 : i32
    return %c0_i32, %c0_i32_0, %c0_i32_1 : i32, i32, i32
  }
  func.func @transform_15(%arg0: i32) -> (i32, i32) {
    %c0_i32 = arith.constant 0 : i32
    %c0_i32_0 = arith.constant 0 : i32
    %c0_i32_1 = arith.constant 0 : i32
    return %c0_i32, %c0_i32_0 : i32, i32
  }
  func.func @transform_16(%arg0: i32) -> (i32, i32, i32) {
    %c0_i32 = arith.constant 0 : i32
    %c0_i32_0 = arith.constant 0 : i32
    %c0_i32_1 = arith.constant 0 : i32
    %c0_i32_2 = arith.constant 0 : i32
    return %c0_i32, %c0_i32_0, %c0_i32_1 : i32, i32, i32
  }
  func.func @transform_17(%arg0: i32) -> (i32, i32) {
    %c0_i32 = arith.constant 0 : i32
    %c0_i32_0 = arith.constant 0 : i32
    %c0_i32_1 = arith.constant 0 : i32
    return %c0_i32, %c0_i32_0 : i32, i32
  }
  func.func @transform_18(%arg0: i32) -> (i32, i32) {
    %c0_i32 = arith.constant 0 : i32
    %c0_i32_0 = arith.constant 0 : i32
    %c0_i32_1 = arith.constant 0 : i32
    return %c0_i32, %c0_i32_0 : i32, i32
  }
  func.func @transform_19(%arg0: i32) -> (i32, i32) {
    %c0_i32 = arith.constant 0 : i32
    %c0_i32_0 = arith.constant 0 : i32
    %c0_i32_1 = arith.constant 0 : i32
    return %c0_i32, %c0_i32_0 : i32, i32
  }
  func.func @transform_20(%arg0: i32) -> (i32, i32, i32) {
    %c0_i32 = arith.constant 0 : i32
    %c0_i32_0 = arith.constant 0 : i32
    %c0_i32_1 = arith.constant 0 : i32
    %c0_i32_2 = arith.constant 0 : i32
    return %c0_i32, %c0_i32_0, %c0_i32_1 : i32, i32, i32
  }
  func.func @transform_21(%arg0: i32) -> (i32, i32) {
    %c0_i32 = arith.constant 0 : i32
    %c0_i32_0 = arith.constant 0 : i32
    %c0_i32_1 = arith.constant 0 : i32
    return %c0_i32, %c0_i32_0 : i32, i32
  }
  func.func @transform_22(%arg0: i32) -> (i32, i32, i32) {
    %c0_i32 = arith.constant 0 : i32
    %c0_i32_0 = arith.constant 0 : i32
    %c0_i32_1 = arith.constant 0 : i32
    %c0_i32_2 = arith.constant 0 : i32
    return %c0_i32, %c0_i32_0, %c0_i32_1 : i32, i32, i32
  }
  func.func @transform_23(%arg0: i32) -> (i32, i32) {
    %c0_i32 = arith.constant 0 : i32
    %c0_i32_0 = arith.constant 0 : i32
    %c0_i32_1 = arith.constant 0 : i32
    return %c0_i32, %c0_i32_0 : i32, i32
  }
  func.func @transform_24(%arg0: i32) -> (i32, i32, i32) {
    %c0_i32 = arith.constant 0 : i32
    %c0_i32_0 = arith.constant 0 : i32
    %c0_i32_1 = arith.constant 0 : i32
    %c0_i32_2 = arith.constant 0 : i32
    return %c0_i32, %c0_i32_0, %c0_i32_1 : i32, i32, i32
  }
  func.func @transform_25(%arg0: i32) -> (i32, i32) {
    %c0_i32 = arith.constant 0 : i32
    %c0_i32_0 = arith.constant 0 : i32
    %c0_i32_1 = arith.constant 0 : i32
    return %c0_i32, %c0_i32_0 : i32, i32
  }
  func.func @transform_26(%arg0: i32) -> (i32, i32, i32) {
    %c0_i32 = arith.constant 0 : i32
    %c0_i32_0 = arith.constant 0 : i32
    %c0_i32_1 = arith.constant 0 : i32
    %c0_i32_2 = arith.constant 0 : i32
    return %c0_i32, %c0_i32_0, %c0_i32_1 : i32, i32, i32
  }
  func.func @transform_27(%arg0: i32) -> (i32, i32) {
    %c0_i32 = arith.constant 0 : i32
    %c0_i32_0 = arith.constant 0 : i32
    %c0_i32_1 = arith.constant 0 : i32
    return %c0_i32, %c0_i32_0 : i32, i32
  }
  func.func @transform_28(%arg0: i32) -> (i32, i32) {
    %c0_i32 = arith.constant 0 : i32
    %c0_i32_0 = arith.constant 0 : i32
    %c0_i32_1 = arith.constant 0 : i32
    return %c0_i32, %c0_i32_0 : i32, i32
  }
  func.func @transform_29(%arg0: i32) -> (i32, i32) {
    %c0_i32 = arith.constant 0 : i32
    %c0_i32_0 = arith.constant 0 : i32
    %c0_i32_1 = arith.constant 0 : i32
    return %c0_i32, %c0_i32_0 : i32, i32
  }
  func.func @transform_30(%arg0: i32) -> (i32, i32, i32) {
    %c0_i32 = arith.constant 0 : i32
    %c0_i32_0 = arith.constant 0 : i32
    %c0_i32_1 = arith.constant 0 : i32
    %c0_i32_2 = arith.constant 0 : i32
    return %c0_i32, %c0_i32_0, %c0_i32_1 : i32, i32, i32
  }
  func.func @transform_31(%arg0: i32) -> (i32, i32) {
    %c0_i32 = arith.constant 0 : i32
    %c0_i32_0 = arith.constant 0 : i32
    %c0_i32_1 = arith.constant 0 : i32
    return %c0_i32, %c0_i32_0 : i32, i32
  }
  func.func @transform_32(%arg0: i32) -> (i32, i32, i32) {
    %c0_i32 = arith.constant 0 : i32
    %c0_i32_0 = arith.constant 0 : i32
    %c0_i32_1 = arith.constant 0 : i32
    %c0_i32_2 = arith.constant 0 : i32
    return %c0_i32, %c0_i32_0, %c0_i32_1 : i32, i32, i32
  }
  func.func @transform_33(%arg0: i32) -> (i32, i32) {
    %c0_i32 = arith.constant 0 : i32
    %c0_i32_0 = arith.constant 0 : i32
    %c0_i32_1 = arith.constant 0 : i32
    return %c0_i32, %c0_i32_0 : i32, i32
  }
  func.func @transform_34(%arg0: i32) -> (i32, i32, i32) {
    %c0_i32 = arith.constant 0 : i32
    %c0_i32_0 = arith.constant 0 : i32
    %c0_i32_1 = arith.constant 0 : i32
    %c0_i32_2 = arith.constant 0 : i32
    return %c0_i32, %c0_i32_0, %c0_i32_1 : i32, i32, i32
  }
  func.func @transform_35(%arg0: i32) -> (i32, i32) {
    %c0_i32 = arith.constant 0 : i32
    %c0_i32_0 = arith.constant 0 : i32
    %c0_i32_1 = arith.constant 0 : i32
    return %c0_i32, %c0_i32_0 : i32, i32
  }
  func.func @transform_36(%arg0: i32) -> (i32, i32, i32) {
    %c0_i32 = arith.constant 0 : i32
    %c0_i32_0 = arith.constant 0 : i32
    %c0_i32_1 = arith.constant 0 : i32
    %c0_i32_2 = arith.constant 0 : i32
    return %c0_i32, %c0_i32_0, %c0_i32_1 : i32, i32, i32
  }
  func.func @transform_37(%arg0: i32) -> (i32, i32) {
    %c0_i32 = arith.constant 0 : i32
    %c0_i32_0 = arith.constant 0 : i32
    %c0_i32_1 = arith.constant 0 : i32
    return %c0_i32, %c0_i32_0 : i32, i32
  }
  func.func @transform_38(%arg0: i32) -> (i32, i32, i32) {
    %c0_i32 = arith.constant 0 : i32
    %c0_i32_0 = arith.constant 0 : i32
    %c0_i32_1 = arith.constant 0 : i32
    return %arg0, %c0_i32, %c0_i32_0 : i32, i32, i32
  }
}

</mosaic_0001>

<bundles_post_ra>
// kernel: mul.56
= control target key start
LH: loop header
LB: loop body
LE: loop exit
PB: predicated region body
PF: predicated region fallthrough
CT: control target
= control target key end

     0   :  { %s34_s0 = inlined_call_operand.vmem [shape: f32[4,1], index: 0, kind: input, shape index: {}]   ;;  %s35_s1 = inlined_call_operand.vmem [shape: f32[4,1], index: 1, kind: input, shape index: {}]   ;;  %s36_s2 = inlined_call_operand.vmem [shape: f32[4,1], index: 2, kind: output, shape index: {}]  }
   0x1   :  { %v3_v0 = vld [vmem:[%s34_s0] sm:$0xf] }
   0x2   :  { %v4_v1 = vld [vmem:[%s35_s1] sm:$0xf] }
   0x3   :  { %v7_v2 = vmul.f32 %v4_v1, %v3_v0 }
   0x5   :  { %9 = vst [vmem:[%s36_s2] sm:$0xf] %v7_v2 }

// kernel: gated_stgcn_forward.1
= control target key start
LH: loop header
LB: loop body
LE: loop exit
PB: predicated region body
PF: predicated region fallthrough
CT: control target
= control target key end

     0   :  { %s7545_s6 = smov 1   ;;  %s7546_s10 = smov 2   ;;  %s8822_s0 = inlined_call_operand.smem [shape: u32[39], index: -1, kind: input, shape index: {}] }
   0x1   :  { %s7594_s5 = sld [smem:[%s8822_s0]]   ;;  %s7547_s14 = smov 3  }
   0x2   :  { %s7599_s9 = sld [smem:[%s8822_s0 + %s7545_s6]]   ;;  %s7548_s18 = smov 4  }
   0x3   :  { %s7604_s13 = sld [smem:[%s8822_s0 + %s7546_s10]]   ;;  %s7549_s22 = smov 5  }
   0x4   :  { %s7609_s17 = sld [smem:[%s8822_s0 + %s7547_s14]]   ;;  %s7550_s26 = smov 6  }
   0x5   :  { %s7614_s21 = sld [smem:[%s8822_s0 + %s7548_s18]]   ;;  %s7551_s30 = smov 7  }
   0x6   :  { %s7619_s25 = sld [smem:[%s8822_s0 + %s7549_s22]]   ;;  %s7552_s4 = smov 8  }
   0x7   :  { %s7624_s29 = sld [smem:[%s8822_s0 + %s7550_s26]]   ;;  %s7553_s10 = smov 9  }
   0x8   :  { %s7629_s3 = sld [smem:[%s8822_s0 + %s7551_s30]]   ;;  %s7554_s15 = smov 10  }
   0x9   :  { %s7634_s8 = sld [smem:[%s8822_s0 + %s7552_s4]]   ;;  %s7555_s20 = smov 11  }
   0xa   :  { %8840 = sst [smem:[#allocation2_spill]] %s7609_s17  ;;  %s7556_s26 = smov 12  }
   0xb   :  { %s7639_s14 = sld [smem:[%s8822_s0 + %s7553_s10]]   ;;  %s7557_s1 = smov 13  }
   0xc   :  { %8841 = sst [smem:[#allocation3_spill]] %s7619_s25  ;;  %s7558_s7 = smov 14  }
   0xd   :  { %8842 = sst [smem:[#allocation4_spill]] %s7624_s29  ;;  %s7560_s22 = smov 16  }
   0xe   :  { %s7644_s19 = sld [smem:[%s8822_s0 + %s7554_s15]]   ;;  %s7559_s15 = smov 15  }
   0xf   :  { %s7649_s24 = sld [smem:[%s8822_s0 + %s7555_s20]]   ;;  %s7561_s28 = smov 17  }
  0x10   :  { %s7654_s30 = sld [smem:[%s8822_s0 + %s7556_s26]]  }
  0x11   :  { %s7659_s6 = sld [smem:[%s8822_s0 + %s7557_s1]]  }
  0x12   :  { %s7664_s12 = sld [smem:[%s8822_s0 + %s7558_s7]]   ;;  %s7562_s7 = smov 18  }
  0x13   :  { %s7669_s20 = sld [smem:[%s8822_s0 + %s7559_s15]]   ;;  %s7563_s15 = smov 19  }
  0x14   :  { %s7674_s27 = sld [smem:[%s8822_s0 + %s7560_s22]]   ;;  %s7564_s22 = smov 20  }
  0x15   :  { %8843 = sst [smem:[#allocation5_spill]] %s7649_s24 }
  0x16   :  { %8844 = sst [smem:[#allocation6_spill]] %s7654_s30 }
  0x17   :  { %s7679_s4 = sld [smem:[%s8822_s0 + %s7561_s28]]   ;;  %s7565_s28 = smov 21  }
  0x18   :  { %8845 = sst [smem:[#allocation7_spill]] %s7664_s12 }
  0x19   :  { %s7684_s29 = sld [smem:[%s8822_s0 + %s7562_s7]]   ;;  %s7566_s7 = smov 22  }
  0x1a   :  { %8846 = sst [smem:[#allocation8_spill]] %s7674_s27 }
  0x1b   :  { %s7689_s25 = sld [smem:[%s8822_s0 + %s7563_s15]]   ;;  %s7567_s15 = smov 23  }
  0x1c   :  { %s7694_s27 = sld [smem:[%s8822_s0 + %s7564_s22]]   ;;  %s7568_s22 = smov 24  }
  0x1d   :  { %8847 = sst [smem:[#allocation9_spill]] %s7679_s4 }
  0x1e   :  { %s7699_s12 = sld [smem:[%s8822_s0 + %s7565_s28]]   ;;  %s7569_s28 = smov 25  }
  0x1f   :  { %8848 = sst [smem:[#allocation10_spill]] %s7684_s29 }
  0x20   :  { %s7704_s29 = sld [smem:[%s8822_s0 + %s7566_s7]]   ;;  %s7570_s7 = smov 26  }
  0x21   :  { %8849 = sst [smem:[#allocation11_spill]] %s7689_s25 }
  0x22   :  { %8850 = sst [smem:[#allocation12_spill]] %s7694_s27 }
  0x23   :  { %s7709_s30 = sld [smem:[%s8822_s0 + %s7567_s15]]   ;;  %s7571_s15 = smov 27  }
  0x24   :  { %s7714_s27 = sld [smem:[%s8822_s0 + %s7568_s22]]   ;;  %s7572_s22 = smov 28  }
  0x25   :  { %s7719_s17 = sld [smem:[%s8822_s0 + %s7569_s28]]   ;;  %s7573_s28 = smov 29  }
  0x26   :  { %8851 = sst [smem:[#allocation13_spill]] %s7704_s29 }
  0x27   :  { %s7724_s29 = sld [smem:[%s8822_s0 + %s7570_s7]]   ;;  %s7574_s7 = smov 30  }
  0x29   :  { %8852 = sst [smem:[#allocation14_spill]] %s7709_s30 }
  0x2a   :  { %8853 = sst [smem:[#allocation15_spill]] %s7714_s27 }
  0x2b   :  { %8854 = sst [smem:[#allocation16_spill]] %s7719_s17 }
  0x2c   :  { %s7729_s30 = sld [smem:[%s8822_s0 + %s7571_s15]]   ;;  %s7575_s15 = smov 31  }
  0x2d   :  { %8855 = sst [smem:[#allocation17_spill]] %s7724_s29 }
  0x2e   :  { %s7734_s27 = sld [smem:[%s8822_s0 + %s7572_s22]]   ;;  %s7576_s22 = smov 32  }
  0x2f   :  { %s7739_s17 = sld [smem:[%s8822_s0 + %s7573_s28]]   ;;  %s7577_s28 = smov 33  }
  0x30   :  { %s7744_s29 = sld [smem:[%s8822_s0 + %s7574_s7]]   ;;  %s7578_s7 = smov 34  }
  0x31   :  { %s7749_s25 = sld [smem:[%s8822_s0 + %s7575_s15]]   ;;  %s7579_s15 = smov 35  }
  0x32   :  { %s7759_s4 = sld [smem:[%s8822_s0 + %s7577_s28]]   ;;  %s7581_s28 = smov 37  }
  0x33   :  { %s7779_s24 = sld [smem:[%s8822_s0 + %s7581_s28]]  }
  0x34   :  { %8856 = sst [smem:[#allocation18_spill]] %s7734_s27 }
  0x35   :  { %s7754_s27 = sld [smem:[%s8822_s0 + %s7576_s22]]   ;;  %s7580_s22 = smov 36  }
  0x36   :  { %8857 = sst [smem:[#allocation19_spill]] %s7744_s29 }
  0x37   :  { %8858 = sst [smem:[#allocation20_spill]] %s7749_s25 }
  0x38   :  { %s7764_s29 = sld [smem:[%s8822_s0 + %s7578_s7]]   ;;  %s7582_s7 = smov 38  }
  0x39   :  { %s7769_s25 = sld [smem:[%s8822_s0 + %s7579_s15]]   ;;  %s7786_s15 = smov 0  }
  0x3b   :  { %8859 = sst [smem:[#allocation21_spill]] %s7754_s27 }
  0x3c   :  { %s7774_s27 = sld [smem:[%s8822_s0 + %s7580_s22]]  }
  0x3e   :  { %8860 = sst [smem:[#allocation22_spill]] %s7764_s29 }
  0x3f   :  { %s7784_s29 = sld [smem:[%s8822_s0 + %s7582_s7]]  }
  0x40 LB: > { %s5726_s16 = sadd.s32 4294967295, %s7543_s15   ;;  %p5730_p0 = scmp.ge.s32.totalorder %s7543_s15, 1  ;;  %s7543_s15 = sphi %s7786_s15, %s87_s15  }
  0x41   : > { %p1050_p1 = scmp.lt.s32.totalorder %s7543_s15, 3 }
  0x43   : > { %p1051_p2 = pnand %p5730_p0, %p1050_p1 }
  0x44   : > { %v1154_v0 = vld [vmem:[%s7599_s9] sm:$0xf] (!%p1051_p2)  ;;  %v7583_v1 = vmov (!%p1051_p2), 0   ;;  %v7584_v2 = vmov (!%p1051_p2), 0.0   ;;  %v7803_v5 = vld [vmem:[%s7614_s21 + $0x8] sm:$0xff] (!%p1051_p2)   ;;  %vm7585_vm0 = vmmov (!%p1051_p2), 0  }
  0x45   : > { %1054 = sbr.rel (%p1051_p2) target bundleno = 7093 (0x1bb5), region = 172  ;;  %7373 = vset.pattern.permute.xlu0 (!%p1051_p2), %v7583_v1  ;;  %7374 = vset.pattern.permute.xlu1 (!%p1051_p2), %v7583_v1  ;;  %v1161_v3 = vld [vmem:[%s7604_s13] sm:$0xf] (!%p1051_p2)  ;;  %v7813_v7 = vld [vmem:[%s7614_s21 + $0x10] sm:$0xff] (!%p1051_p2)   ;;  %v7819_v10 = vld [vmem:[%s7614_s21 + $0x18] sm:$0xff] (!%p1051_p2)   ;;  %p1143_p3 = scmp.lt.s32.totalorder (!%p1051_p2), %s5726_s16, 1 }
  0x46   : > { %1157 = vperm.xlu0 (!%p1051_p2), %7373, %v1154_v0   ;;  %6426 = vmatprep.subr.bf16.mxu1 (!%p1051_p2), %v7584_v2  ;;  %v7799_v4 = vld [vmem:[%s7614_s21] sm:$0xff] (!%p1051_p2)   ;;  %v7831_v14 = vld [vmem:[%s7614_s21 + $0x28] sm:$0xff] (!%p1051_p2)   ;;  %v7837_v16 = vld [vmem:[%s7614_s21 + $0x30] sm:$0xff] (!%p1051_p2)   ;;  %vm1181_vm1 = vcmask (!%p1051_p2), 1041408   ;;  %vm1177_vm2 = vcmask (!%p1051_p2), 31744   ;;  %s8861_s22 = sld [smem:[#allocation5_spill]] (!%p1051_p2) }
  0x47   : > { %6420 = vmatprep.subr.bf16.mxu0 (!%p1051_p2), %v7584_v2  ;;  %6427 = vmatpush3.bf16.msra.mxu1 (!%p1051_p2), %v7799_v4  ;;  %v2052_v6 = vld [vmem:[%s7659_s6] sm:$0xff] (!%p1051_p2)  ;;  %v7843_v18 = vld [vmem:[%s7614_s21 + $0x38] sm:$0xff] (!%p1051_p2)   ;;  %v5616_v19 = vld [vmem:[%s7629_s3 + $0x8] sm:$0xf] (!%p1051_p2)  ;;  %s8862_s23 = sld [smem:[#allocation9_spill]] (!%p1051_p2)  ;;  %s8863_s26 = sld [smem:[#allocation11_spill]] (!%p1051_p2) }
  0x48   : > { %6428 = vmatprep.subr.bf16.mxu1 (!%p1051_p2), %v7584_v2  ;;  %6442 = vmatprep.mubr.msk.bf16.mxu1 (!%p1051_p2), %vm7585_vm0, %v7584_v2  ;;  %v2288_v8 = vld [vmem:[%s7669_s20] sm:$0xff] (!%p1051_p2)  ;;  %v7869_v30 = vld [vmem:[%s7614_s21 + $0x88] sm:$0xff] (!%p1051_p2)   ;;  %v7876_v31 = vld [vmem:[%s7614_s21 + $0x90] sm:$0xff] (!%p1051_p2)   ;;  %s8864_s28 = sld [smem:[#allocation2_spill]] (!%p1051_p2)  ;;  %s8865_s1 = sld [smem:[#allocation14_spill]] (!%p1051_p2)  ;;  %vm1808_vm3 = vcmask (!%p1051_p2), 1043456  }
  0x49   : > { %6422 = vmatprep.mubr.msk.bf16.mxu0 (!%p1051_p2), %vm7585_vm0, %v7584_v2  ;;  %v2725_v9 = vld [vmem:[%s7699_s12] sm:$0xff] (!%p1051_p2)  ;;  %v7881_v32 = vld [vmem:[%s7614_s21 + $0x98] sm:$0xff] (!%p1051_p2)   ;;  %v7891_v34 = vld [vmem:[%s7614_s21 + $0xa8] sm:$0xff] (!%p1051_p2)   ;;  %s8866_s2 = sld [smem:[#allocation16_spill]] (!%p1051_p2)  ;;  %s8867_s7 = sld [smem:[#allocation20_spill]] (!%p1051_p2)  ;;  %vm1804_vm4 = vcmask (!%p1051_p2), 64512  }
  0x4a   : > { %1164 = vperm.xlu0 (!%p1051_p2), %7373, %v1161_v3   ;;  %v3382_v11 = vld [vmem:[%s7729_s30] sm:$0xff] (!%p1051_p2)  ;;  %v7896_v35 = vld [vmem:[%s7614_s21 + $0xb0] sm:$0xff] (!%p1051_p2)   ;;  %v7901_v36 = vld [vmem:[%s7614_s21 + $0xb8] sm:$0xff] (!%p1051_p2)   ;;  %s8868_s10 = sld [smem:[#allocation6_spill]] (!%p1051_p2)  ;;  %s8869_s11 = sld [smem:[#allocation7_spill]] (!%p1051_p2)  ;;  %vm5629_vm5 = vcmask (!%p1051_p2), 130048  }
  0x4b   : > { %6429 = vmatpush3.bf16.msra.mxu1 (!%p1051_p2), %v7803_v5  ;;  %v7825_v12 = vld [vmem:[%s7614_s21 + $0x20] sm:$0xff] (!%p1051_p2)   ;;  %v1435_v37 = vld [vmem:[%s7644_s19 + $0x8] sm:$0xff] (!%p1051_p2)  ;;  %v1436_v63 = vld [vmem:[%s7644_s19 + $0x10] sm:$0xff] (!%p1051_p2)  ;;  %vm5631_vm6 = vcmask (!%p1051_p2), 125952  }
  0x4c   : > { %6430 = vmatprep.subr.bf16.mxu1 %v7584_v2  ;;  %v3400_v13 = vld [vmem:[%s7739_s17] sm:$0xff]  ;;  %s8883_s16 = smov (!%p1143_p3, %s5726_s16), 1  ;;  %v1439_v38 = vpack.c.bf16 %v1435_v37, %v1435_v37 }
  0x4d   : > { %v3954_v15 = vld [vmem:[%s7759_s4] sm:$0xff]  ;;  %s5731_s0 = sshll.u32 %s8883_s16, 2 }
  0x4e   : > { %2055 = vperm.xlu0 %7373, %v2052_v6   ;;  %v4190_v17 = vld [vmem:[%s7769_s25] sm:$0xff]  ;;  %s1146_s18 = scalar_lea.vmem %s7594_s5, %s5731_s0  ;;  %v7924_v45 = vld [vmem:[%s8864_s28 + $0x8] sm:$0xff]   ;;  %v7930_v47 = vld [vmem:[%s8864_s28 + $0x10] sm:$0xff]   ;;  %s8870_s0 = sld [smem:[#allocation8_spill]] }
  0x4f   : > { %6431 = vmatpush3.bf16.msra.mxu1 %v7813_v7  ;;  %v1153_v21 = vld [vmem:[%s1146_s18] sm:$0xf]  ;;  %v7936_v49 = vld [vmem:[%s8864_s28 + $0x18] sm:$0xff]   ;;  %v7948_v53 = vld [vmem:[%s8864_s28 + $0x28] sm:$0xff]   ;;  %s8871_s18 = sld [smem:[#allocation10_spill]] }
  0x50   : > { %6432 = vmatprep.subr.bf16.mxu1 %v7584_v2  ;;  %v1168_v25 = vld [vmem:[%s7634_s8] sm:$0xff] }
  0x51   : > { %v1169_v28 = vpack.c.bf16 %v1168_v25, %v1168_v25  ;;  %v7861_v29 = vld [vmem:[%s7614_s21 + $0x80] sm:$0xff]  }
  0x52   : > { %2291 = vperm.xlu0 %7373, %v2288_v8   ;;  %v7886_v33 = vld [vmem:[%s7614_s21 + $0xa0] sm:$0xff]  }
  0x53   : > { %6433 = vmatpush3.bf16.msra.mxu1 %v7819_v10  ;;  %v1171_v39 = vld [vmem:[%s7639_s14] sm:$0xff] }
  0x54   : > { %6434 = vmatprep.subr.bf16.mxu1 %v7584_v2  ;;  %1174 = vperm.xlu1 %7374, %v1171_v39   ;;  %v1578_v40 = vld [vmem:[%s8861_s22] sm:$0xff]  ;;  %s8872_s22 = sld [smem:[#allocation12_spill]] }
  0x55   : > { %v2431_v41 = vld [vmem:[%s8862_s23] sm:$0xff]  ;;  %s8873_s23 = sld [smem:[#allocation13_spill]] }
  0x56   : > { %2728 = vperm.xlu0 %7373, %v2725_v9   ;;  %v2449_v42 = vld [vmem:[%s8863_s26] sm:$0xff]  ;;  %v1529_v9 = vpack.c.bf16 %v1436_v63, %v1436_v63  ;;  %s8874_s26 = sld [smem:[#allocation15_spill]] }
  0x57   : > { %6435 = vmatpush3.bf16.msra.mxu1 %v7825_v12  ;;  %v7918_v43 = vld [vmem:[%s8864_s28] sm:$0xff]  }
  0x58   : > { %6436 = vmatprep.subr.bf16.mxu1 %v7584_v2  ;;  %1581 = vperm.xlu1 %7374, %v1578_v40   ;;  %v3003_v44 = vld [vmem:[%s8865_s1] sm:$0xff]  ;;  %s8875_s1 = sld [smem:[#allocation17_spill]] }
  0x59   : > { %v3239_v46 = vld [vmem:[%s8866_s2] sm:$0xff]  ;;  %s8876_s2 = sld [smem:[#allocation18_spill]] }
  0x5a   : > { %3385 = vperm.xlu0 %7373, %v3382_v11   ;;  %v3676_v48 = vld [vmem:[%s8867_s7] sm:$0xff]  ;;  %s8877_s7 = sld [smem:[#allocation19_spill]] }
  0x5b   : > { %6437 = vmatpush3.bf16.msra.mxu1 %v7831_v14  ;;  %v4333_v50 = vld [vmem:[%s7779_s24] sm:$0xff] }
  0x5c   : > { %6438 = vmatprep.subr.bf16.mxu1 %v7584_v2  ;;  %2434 = vperm.xlu1 %7374, %v2431_v41   ;;  %v7942_v51 = vld [vmem:[%s8864_s28 + $0x20] sm:$0xff]  }
  0x5d   : > { %v5615_v52 = vld [vmem:[%s7629_s3] sm:$0xff] }
  0x5e   : > { %3403 = vperm.xlu0 %7373, %v3400_v13   ;;  %v1434_v55 = vld [vmem:[%s7644_s19] sm:$0xff]  ;;  %v7967_v13 = vld [vmem:[%s8864_s28 + $0x48] sm:$0xff]  }
  0x5f   : > { %6439 = vmatpush3.bf16.msra.mxu1 %v7837_v16  ;;  %v1437_v61 = vpack.c.bf16 %v1434_v55, %v1434_v55  ;;  %v7961_v11 = vld [vmem:[%s8864_s28 + $0x40] sm:$0xff]  }
  0x60   : > { %6440 = vmatprep.subr.bf16.mxu1 %v7584_v2  ;;  %2452 = vperm.xlu1 %7374, %v2449_v42   ;;  %v1587_v63 = vld [vmem:[%s8868_s10] sm:$0xff] }
  0x62   : > { %3957 = vperm.xlu0 %7373, %v3954_v15   ;;  %v7974_v15 = vld [vmem:[%s8864_s28 + $0x50] sm:$0xff]  }
  0x63   : > { %6441 = vmatpush3.bf16.msra.mxu1 %v7843_v18 }
  0x64   : > { %6484 = vmatprep.subr.bf16.mxu1 %v7584_v2  ;;  %3006 = vperm.xlu1 %7374, %v3003_v44  }
  0x66   : > { %4193 = vperm.xlu0 %7373, %v4190_v17   ;;  %v7979_v17 = vld [vmem:[%s8864_s28 + $0x58] sm:$0xff]  }
  0x68   : > { %3242 = vperm.xlu1 %7374, %v3239_v46  }
  0x6a   : > { %5624 = vperm.xlu0 %7373, %v5616_v19   ;;  %v7984_v19 = vld [vmem:[%s8864_s28 + $0x60] sm:$0xff]  }
  0x6c   : > { %3679 = vperm.xlu1 %7374, %v3676_v48   ;;  %v1588_v48 = vld [vmem:[%s8868_s10 + $0x8] sm:$0xff] }
  0x70   : > { %4336 = vperm.xlu1 %7374, %v4333_v50  }
  0x74   : > { %5619 = vperm.xlu1 %7374, %v5615_v52  }
  0xc5   : > { %v1158_v20 = vpop.permute.xlu0 %1157 }
  0xc6   : > { %v1160_v22 = vmul.f32 %v1158_v20, %v1153_v21  ;;  %v7989_v20 = vld [vmem:[%s8864_s28 + $0x68] sm:$0xff]   ;;  %v7995_v21 = vld [vmem:[%s8864_s28 + $0x30] sm:$0xff]  }
  0xc9   : > { %v1165_v23 = vpop.permute.xlu0 %1164 }
  0xca   : > { %v1167_v24 = vadd.f32 %v1165_v23, %v1160_v22  ;;  %v7998_v22 = vld [vmem:[%s8864_s28 + $0x70] sm:$0xff]   ;;  %v8005_v23 = vld [vmem:[%s8864_s28 + $0x38] sm:$0xff]  }
  0xcc   : > { %v1170_v26 = vpack.c.bf16 %v1167_v24, %v1167_v24  ;;  %v8008_v24 = vld [vmem:[%s8864_s28 + $0x78] sm:$0xff]  }
  0xce   : > { %6443 = vmatmul.mubr.bf16.vlgmr.msra.gmra.mrb[0].mxu1 %v1170_v26  ;;  %v1183_v27 = vsel %vm1181_vm1, %v1170_v26, 0 }
  0xcf   : > { %6421 = vmatpush3.bf16.msra.mxu0 %v1183_v27  ;;  %6500 = vmatprep.mubr.msk.bf16.mxu1 %vm7585_vm0, %v7584_v2 }
  0xd0   : > { %6446 = vmatprep.subr.bf16.mxu0 %v7584_v2  ;;  %6485 = vmatpush3.bf16.msra.mxu1 %v7918_v43 }
  0xd1   : > { %6486 = vmatprep.subr.bf16.mxu1 %v7584_v2 }
  0xd2   : > { %6423 = vmatmul.mubr.msk.bf16.vlgmr.msra.gmra.mrb[0].mxu0 %vm1177_vm2, %v1169_v28 }
  0xd3   : > { %6447 = vmatpush3.bf16.msra.mxu0 %v7861_v29  ;;  %6462 = vmatprep.mubr.msk.bf16.mxu0 %vm7585_vm0, %v7584_v2  ;;  %v1175_v25 = vpop.permute.xlu1 %1174 }
  0xd4   : > { %6448 = vmatprep.subr.bf16.mxu0 %v7584_v2  ;;  %6487 = vmatpush3.bf16.msra.mxu1 %v7924_v45 }
  0xd5   : > { %6488 = vmatprep.subr.bf16.mxu1 %v7584_v2 }
  0xd7   : > { %6449 = vmatpush3.bf16.msra.mxu0 %v7869_v30  ;;  %v1582_v37 = vpop.permute.xlu1 %1581 }
  0xd8   : > { %6450 = vmatprep.subr.bf16.mxu0 %v7584_v2  ;;  %6489 = vmatpush3.bf16.msra.mxu1 %v7930_v47 }
  0xd9   : > { %6490 = vmatprep.subr.bf16.mxu1 %v7584_v2 }
  0xdb   : > { %6451 = vmatpush3.bf16.msra.mxu0 %v7876_v31 }
  0xdc   : > { %6452 = vmatprep.subr.bf16.mxu0 %v7584_v2  ;;  %6491 = vmatpush3.bf16.msra.mxu1 %v7936_v49 }
  0xdd   : > { %6492 = vmatprep.subr.bf16.mxu1 %v7584_v2 }
  0xdf   : > { %6453 = vmatpush3.bf16.msra.mxu0 %v7881_v32 }
  0xe0   : > { %6454 = vmatprep.subr.bf16.mxu0 %v7584_v2  ;;  %6493 = vmatpush3.bf16.msra.mxu1 %v7942_v51 }
  0xe1   : > { %6494 = vmatprep.subr.bf16.mxu1 %v7584_v2 }
  0xe3   : > { %6455 = vmatpush3.bf16.msra.mxu0 %v7886_v33 }
  0xe4   : > { %6456 = vmatprep.subr.bf16.mxu0 %v7584_v2  ;;  %6495 = vmatpush3.bf16.msra.mxu1 %v7948_v53 }
  0xe5   : > { %6496 = vmatprep.subr.bf16.mxu1 %v7584_v2 }
  0xe7   : > { %6457 = vmatpush3.bf16.msra.mxu0 %v7891_v34 }
  0xe8   : > { %6458 = vmatprep.subr.bf16.mxu0 %v7584_v2  ;;  %6497 = vmatpush3.bf16.msra.mxu1 %v7995_v21 }
  0xe9   : > { %6498 = vmatprep.subr.bf16.mxu1 %v7584_v2 }
  0xeb   : > { %6459 = vmatpush3.bf16.msra.mxu0 %v7896_v35 }
  0xec   : > { %6460 = vmatprep.subr.bf16.mxu0 %v7584_v2  ;;  %6499 = vmatpush3.bf16.msra.mxu1 %v8005_v23 }
  0xed   : > { %6524 = vmatprep.subr.bf16.mxu1 %v7584_v2 }
  0xef   : > { %6461 = vmatpush3.bf16.msra.mxu0 %v7901_v36 }
  0xf0   : > { %6466 = vmatprep.subr.bf16.mxu0 %v7584_v2 }
  0xf2   : > { %6463 = vmatmul.mubr.bf16.vlgmr.msra.gmra.mrb[4].mxu0 %v1170_v26 }
  0xf3   : > { %6467 = vmatpush3.bf16.msra.mxu0 %v1183_v27  ;;  %6468 = vmatprep.mubr.msk.bf16.mxu0 %vm7585_vm0, %v7584_v2 }
  0xf4   : > { %6472 = vmatprep.subr.bf16.mxu0 %v7584_v2 }
  0xfa   : > { %6469 = vmatmul.mubr.msk.bf16.vlgmr.msra.gmra.mrb[0].mxu0 %vm1177_vm2, %v1439_v38 }
  0xfb   : > { %6474 = vmatprep.mubr.msk.bf16.mxu0 %vm7585_vm0, %v7584_v2 }
 0x1a1   : > { %v1323_v54 = vpop.f32.mrb[0].mxu1 }
 0x1a2   : > { %v1438_v56 = vpack.c.bf16 %v1323_v54, %v1323_v54  ;;  %v6444_v57 = vpop.f32.mrb[1].mxu1 }
 0x1a3   : > { %v1326_v58 = vpop.f32.mrb[2].mxu1 }
 0x1a4   : > { %v1487_v59 = vsel %vm1181_vm1, %v1438_v56, 0  ;;  %v6445_v60 = vpop.f32.mrb[3].mxu1 }
 0x1a5   : > { %6473 = vmatpush3.bf16.msra.mxu0 %v1487_v59 }
 0x1a6   : > { %6478 = vmatprep.subr.bf16.mxu0 %v7584_v2 }
 0x1a8   : > { %6475 = vmatmul.mubr.msk.bf16.vlgmr.msra.gmra.mrb[0].mxu0 %vm1177_vm2, %v1437_v61  ;;  %v1802_v61 = vpack.c.bf16 %v1588_v48, %v1588_v48 }
 0x1a9   : > { %6480 = vmatprep.mubr.msk.bf16.mxu0 %vm7585_vm0, %v7584_v2 }
 0x1c5   : > { %v1428_v62 = vpop.f32.mrb[4].mxu0 }
 0x1c6   : > { %v1530_v0 = vpack.c.bf16 %v1428_v62, %v1428_v62  ;;  %v6464_v1 = vpop.f32.mrb[5].mxu0 }
 0x1c7   : > { %v1431_v3 = vpop.f32.mrb[6].mxu0  ;;  %v8028_v1 = vld [vmem:[%s8864_s28 + $0x80] sm:$0xff]  }
 0x1c8   : > { %v1535_v6 = vsel %vm1181_vm1, %v1530_v0, 0  ;;  %v6465_v8 = vpop.f32.mrb[7].mxu0  ;;  %v1695_v0 = vpack.c.bf16 %v1587_v63, %v1587_v63  ;;  %v8033_v3 = vld [vmem:[%s8864_s28 + $0x88] sm:$0xff]  }
 0x1c9   : > { %6479 = vmatpush3.bf16.msra.mxu0 %v1535_v6  ;;  %v8040_v6 = vld [vmem:[%s8864_s28 + $0x90] sm:$0xff]   ;;  %v8045_v8 = vld [vmem:[%s8864_s28 + $0x98] sm:$0xff]   ;;  %v2142_v63 = vld [vmem:[%s8869_s11 + $0x8] sm:$0xff] }
 0x1ca   : > { %6504 = vmatprep.subr.bf16.mxu0 %v7584_v2 }
 0x1cc   : > { %6481 = vmatmul.mubr.msk.bf16.vlgmr.msra.gmra.mrb[0].mxu0 %vm1177_vm2, %v1529_v9  ;;  %v8050_v9 = vld [vmem:[%s8864_s28 + $0xa0] sm:$0xff]  }
 0x1cd   : > { %6505 = vmatpush3.bf16.msra.mxu0 %v7961_v11  ;;  %6520 = vmatprep.mubr.msk.bf16.mxu0 %vm7585_vm0, %v7584_v2 }
 0x1ce   : > { %6506 = vmatprep.subr.bf16.mxu0 %v7584_v2 }
 0x1d1   : > { %6507 = vmatpush3.bf16.msra.mxu0 %v7967_v13 }
 0x1d2   : > { %6508 = vmatprep.subr.bf16.mxu0 %v7584_v2 }
 0x1d5   : > { %6509 = vmatpush3.bf16.msra.mxu0 %v7974_v15 }
 0x1d6   : > { %6510 = vmatprep.subr.bf16.mxu0 %v7584_v2 }
 0x1d9   : > { %6511 = vmatpush3.bf16.msra.mxu0 %v7979_v17 }
 0x1da   : > { %6512 = vmatprep.subr.bf16.mxu0 %v7584_v2 }
 0x1dd   : > { %6513 = vmatpush3.bf16.msra.mxu0 %v7984_v19 }
 0x1de   : > { %6514 = vmatprep.subr.bf16.mxu0 %v7584_v2 }
 0x1e1   : > { %6515 = vmatpush3.bf16.msra.mxu0 %v7989_v20 }
 0x1e2   : > { %6516 = vmatprep.subr.bf16.mxu0 %v7584_v2 }
 0x1e5   : > { %6517 = vmatpush3.bf16.msra.mxu0 %v7998_v22 }
 0x1e6   : > { %6518 = vmatprep.subr.bf16.mxu0 %v7584_v2 }
 0x1e9   : > { %6519 = vmatpush3.bf16.msra.mxu0 %v8008_v24 }
 0x1ea   : > { %6556 = vmatprep.subr.bf16.mxu0 %v7584_v2 }
 0x29f   : > { %v1571_v26 = vpop.f32.mrb[0].mxu0 }
 0x2a0   : > { %v7282_v27 = vadd.f32 %v1571_v26, %v1175_v25  ;;  %v6482_v28 = vpop.f32.mrb[1].mxu0  ;;  %v8055_v25 = vld [vmem:[%s8864_s28 + $0xa8] sm:$0xff]   ;;  %v8060_v26 = vld [vmem:[%s8864_s28 + $0xb0] sm:$0xff]  }
 0x2a1   : > { %v1574_v38 = vpop.f32.mrb[2].mxu0 }
 0x2a2   : > { %v7283_v39 = vadd.f32 %v7282_v27, %v1582_v37  ;;  %v6483_v40 = vpop.f32.mrb[3].mxu0  ;;  %v8065_v27 = vld [vmem:[%s8864_s28 + $0xb8] sm:$0xff]  }
 0x2a4   : > { %v1586_v41 = vmax.f32 %v7283_v39, 0.0 }
 0x2a6   : > { %v1606_v42 = vpack.c.bf16 %v1586_v41, %v1586_v41 }
 0x2a8   : > { %6501 = vmatmul.mubr.bf16.vlgmr.msra.gmra.mrb[4].mxu1 %v1606_v42  ;;  %6521 = vmatmul.mubr.bf16.vlgmr.msra.gmra.mrb[8].mxu0 %v1606_v42 }
 0x2a9   : > { %6526 = vmatprep.mubr.msk.bf16.mxu1 %vm7585_vm0, %v7584_v2  ;;  %6558 = vmatprep.mubr.msk.bf16.mxu0 %vm7585_vm0, %v7584_v2 }
 0x37b   : > { %v1689_v44 = vpop.f32.mrb[4].mxu1  ;;  %v1796_v46 = vpop.f32.mrb[8].mxu0 }
 0x37c   : > { %v1803_v50 = vpack.c.bf16 %v1796_v46, %v1796_v46  ;;  %v6502_v52 = vpop.f32.mrb[5].mxu1  ;;  %v6522_v54 = vpop.f32.mrb[9].mxu0  ;;  %v1696_v57 = vpack.c.bf16 %v1689_v44, %v1689_v44 }
 0x37d   : > { %v1692_v55 = vpop.f32.mrb[6].mxu1  ;;  %v1799_v56 = vpop.f32.mrb[10].mxu0 }
 0x37e   : > { %v1810_v58 = vsel %vm1808_vm3, %v1803_v50, 0  ;;  %v6503_v59 = vpop.f32.mrb[7].mxu1  ;;  %v6523_v60 = vpop.f32.mrb[11].mxu0  ;;  %v1856_v62 = vsel %vm1808_vm3, %v1696_v57, 0  ;;  %v1589_v50 = vld [vmem:[%s8868_s10 + $0x10] sm:$0xff] }
 0x37f   : > { %6525 = vmatpush3.bf16.msra.mxu1 %v1810_v58  ;;  %v2003_v58 = vpack.c.bf16 %v1589_v50, %v1589_v50 }
 0x380   : > { %6530 = vmatprep.subr.bf16.mxu1 %v7584_v2 }
 0x382   : > { %6527 = vmatmul.mubr.msk.bf16.vlgmr.msra.gmra.mrb[8].mxu1 %vm1804_vm4, %v1802_v61 }
 0x383   : > { %6531 = vmatpush3.bf16.msra.mxu1 %v1856_v62  ;;  %6532 = vmatprep.mubr.msk.bf16.mxu1 %vm7585_vm0, %v7584_v2 }
 0x384   : > { %6536 = vmatprep.subr.bf16.mxu1 %v7584_v2 }
 0x38a   : > { %6533 = vmatmul.mubr.msk.bf16.vlgmr.msra.gmra.mrb[12].mxu1 %vm1804_vm4, %v1695_v0  ;;  %v2146_v0 = vpack.c.bf16 %v2142_v63, %v2142_v63  ;;  %v8150_v63 = vld [vmem:[%s7614_s21] sm:$0xff]  }
 0x38b   : > { %6537 = vmatpush3.bf16.msra.mxu1 %v8028_v1  ;;  %6552 = vmatprep.mubr.msk.bf16.mxu1 %vm7585_vm0, %v7584_v2 }
 0x38c   : > { %6538 = vmatprep.subr.bf16.mxu1 %v7584_v2 }
 0x38f   : > { %6539 = vmatpush3.bf16.msra.mxu1 %v8033_v3 }
 0x390   : > { %6540 = vmatprep.subr.bf16.mxu1 %v7584_v2 }
 0x393   : > { %6541 = vmatpush3.bf16.msra.mxu1 %v8040_v6 }
 0x394   : > { %6542 = vmatprep.subr.bf16.mxu1 %v7584_v2 }
 0x397   : > { %6543 = vmatpush3.bf16.msra.mxu1 %v8045_v8 }
 0x398   : > { %6544 = vmatprep.subr.bf16.mxu1 %v7584_v2 }
 0x39b   : > { %6545 = vmatpush3.bf16.msra.mxu1 %v8050_v9 }
 0x39c   : > { %6546 = vmatprep.subr.bf16.mxu1 %v7584_v2 }
 0x39f   : > { %6547 = vmatpush3.bf16.msra.mxu1 %v8055_v25 }
 0x3a0   : > { %6548 = vmatprep.subr.bf16.mxu1 %v7584_v2 }
 0x3a3   : > { %6549 = vmatpush3.bf16.msra.mxu1 %v8060_v26 }
 0x3a4   : > { %6550 = vmatprep.subr.bf16.mxu1 %v7584_v2 }
 0x3a7   : > { %6551 = vmatpush3.bf16.msra.mxu1 %v8065_v27 }
 0x3a8   : > { %6582 = vmatprep.subr.bf16.mxu1 %v7584_v2 }
 0x3aa   : > { %6553 = vmatmul.mubr.bf16.vlgmr.msra.gmra.mrb[16].mxu1 %v1606_v42 }
 0x3ab   : > { %6583 = vmatpush3.bf16.msra.mxu1 %v7861_v29  ;;  %6598 = vmatprep.mubr.msk.bf16.mxu1 %vm7585_vm0, %v7584_v2 }
 0x3ac   : > { %6584 = vmatprep.subr.bf16.mxu1 %v7584_v2 }
 0x3af   : > { %6585 = vmatpush3.bf16.msra.mxu1 %v7869_v30 }
 0x3b0   : > { %6586 = vmatprep.subr.bf16.mxu1 %v7584_v2 }
 0x3b3   : > { %6587 = vmatpush3.bf16.msra.mxu1 %v7876_v31 }
 0x3b4   : > { %6588 = vmatprep.subr.bf16.mxu1 %v7584_v2 }
 0x3b7   : > { %6589 = vmatpush3.bf16.msra.mxu1 %v7881_v32 }
 0x3b8   : > { %6590 = vmatprep.subr.bf16.mxu1 %v7584_v2 }
 0x3bb   : > { %6591 = vmatpush3.bf16.msra.mxu1 %v7886_v33 }
 0x3bc   : > { %6592 = vmatprep.subr.bf16.mxu1 %v7584_v2 }
 0x3bf   : > { %6593 = vmatpush3.bf16.msra.mxu1 %v7891_v34 }
 0x3c0   : > { %6594 = vmatprep.subr.bf16.mxu1 %v7584_v2 }
 0x3c3   : > { %6595 = vmatpush3.bf16.msra.mxu1 %v7896_v35 }
 0x3c4   : > { %6596 = vmatprep.subr.bf16.mxu1 %v7584_v2 }
 0x3c7   : > { %6597 = vmatpush3.bf16.msra.mxu1 %v7901_v36 }
 0x3c8   : > { %6614 = vmatprep.subr.bf16.mxu1 %v7584_v2 }
 0x455   : > { %v1846_v28 = vpop.f32.mrb[8].mxu1 }
 0x456   : > { %v6528_v37 = vpop.f32.mrb[9].mxu1 }
 0x457   : > { %v1849_v38 = vpop.f32.mrb[10].mxu1 }
 0x458   : > { %v6529_v39 = vpop.f32.mrb[11].mxu1  ;;  %v2141_v38 = vld [vmem:[%s8869_s11] sm:$0xff] }
 0x459   : > { %v2143_v39 = vld [vmem:[%s8869_s11 + $0x10] sm:$0xff] }
 0x45d   : > { %v1892_v40 = vpop.f32.mrb[12].mxu1 }
 0x45e   : > { %v1893_v41 = vadd.f32 %v1892_v40, %v1846_v28  ;;  %v6534_v42 = vpop.f32.mrb[13].mxu1 }
 0x45f   : > { %v1895_v44 = vpop.f32.mrb[14].mxu1 }
 0x460   : > { %v6535_v46 = vpop.f32.mrb[15].mxu1 }
 0x47d   : > { %v1997_v48 = vpop.f32.mrb[16].mxu1 }
 0x47e   : > { %v2004_v52 = vpack.c.bf16 %v1997_v48, %v1997_v48  ;;  %v6554_v54 = vpop.f32.mrb[17].mxu1 }
 0x47f   : > { %v2000_v55 = vpop.f32.mrb[18].mxu1 }
 0x480   : > { %v2009_v56 = vsel %vm1808_vm3, %v2004_v52, 0  ;;  %v6555_v57 = vpop.f32.mrb[19].mxu1 }
 0x481   : > { %6557 = vmatpush3.bf16.msra.mxu0 %v2009_v56  ;;  %v2144_v56 = vpack.c.bf16 %v2141_v38, %v2141_v38  ;;  %v2239_v57 = vpack.c.bf16 %v2143_v39, %v2143_v39  ;;  %v8172_v38 = vld [vmem:[%s7614_s21 + $0x20] sm:$0xff]   ;;  %v8177_v39 = vld [vmem:[%s7614_s21 + $0x28] sm:$0xff]  }
 0x482   : > { %6562 = vmatprep.subr.bf16.mxu0 %v7584_v2 }
 0x484   : > { %6559 = vmatmul.mubr.msk.bf16.vlgmr.msra.gmra.mrb[12].mxu0 %vm1804_vm4, %v2003_v58  ;;  %v2296_v58 = vld [vmem:[%s8870_s0 + $0x8] sm:$0xff] }
 0x485   : > { %6563 = vmatpush3.bf16.msra.mxu0 %v7799_v4  ;;  %6578 = vmatprep.mubr.msk.bf16.mxu0 %vm7585_vm0, %v7584_v2 }
 0x486   : > { %6564 = vmatprep.subr.bf16.mxu0 %v7584_v2 }
 0x489   : > { %6565 = vmatpush3.bf16.msra.mxu0 %v7803_v5 }
 0x48a   : > { %6566 = vmatprep.subr.bf16.mxu0 %v7584_v2 }
 0x48d   : > { %6567 = vmatpush3.bf16.msra.mxu0 %v7813_v7 }
 0x48e   : > { %6568 = vmatprep.subr.bf16.mxu0 %v7584_v2 }
 0x491   : > { %6569 = vmatpush3.bf16.msra.mxu0 %v7819_v10  ;;  %v2056_v10 = vpop.permute.xlu0 %2055 }
 0x492   : > { %6570 = vmatprep.subr.bf16.mxu0 %v7584_v2 }
 0x495   : > { %6571 = vmatpush3.bf16.msra.mxu0 %v7825_v12 }
 0x496   : > { %6572 = vmatprep.subr.bf16.mxu0 %v7584_v2 }
 0x499   : > { %6573 = vmatpush3.bf16.msra.mxu0 %v7831_v14 }
 0x49a   : > { %6574 = vmatprep.subr.bf16.mxu0 %v7584_v2 }
 0x49d   : > { %6575 = vmatpush3.bf16.msra.mxu0 %v7837_v16 }
 0x49e   : > { %6576 = vmatprep.subr.bf16.mxu0 %v7584_v2 }
 0x4a1   : > { %6577 = vmatpush3.bf16.msra.mxu0 %v7843_v18 }
 0x4a2   : > { %6602 = vmatprep.subr.bf16.mxu0 %v7584_v2 }
 0x557   : > { %v2045_v4 = vpop.f32.mrb[12].mxu0 }
 0x558   : > { %v2051_v5 = vadd.f32 %v2045_v4, %v1893_v41  ;;  %v6560_v7 = vpop.f32.mrb[13].mxu0  ;;  %v2295_v4 = vld [vmem:[%s8870_s0] sm:$0xff] }
 0x559   : > { %v2048_v12 = vpop.f32.mrb[14].mxu0 }
 0x55a   : > { %v2058_v59 = vadd.f32 %v2056_v10, %v2051_v5  ;;  %v6561_v60 = vpop.f32.mrb[15].mxu0  ;;  %v2299_v12 = vpack.c.bf16 %v2296_v58, %v2296_v58 }
 0x55c   : > { %v8110_v14 = vmax.f32 %v2058_v59, 0.0  ;;  %v2298_v59 = vpack.c.bf16 %v2295_v4, %v2295_v4 }
 0x55e   : > { %v2060_v61 = vpack.c.bf16 %v8110_v14, %v8110_v14 }
 0x560   : > { %6579 = vmatmul.mubr.bf16.vlgmr.msra.gmra.mrb[16].mxu0 %v2060_v61  ;;  %6599 = vmatmul.mubr.bf16.vlgmr.msra.gmra.mrb[20].mxu1 %v2060_v61  ;;  %v2151_v62 = vsel %vm1808_vm3, %v2060_v61, 0  ;;  %v2297_v61 = vld [vmem:[%s8870_s0 + $0x10] sm:$0xff]  ;;  %s8880_s0 = sld [smem:[#allocation3_spill]] }
 0x561   : > { %6603 = vmatpush3.bf16.msra.mxu0 %v2151_v62  ;;  %6604 = vmatprep.mubr.msk.bf16.mxu0 %vm7585_vm0, %v7584_v2 }
 0x562   : > { %6608 = vmatprep.subr.bf16.mxu0 %v7584_v2  ;;  %6616 = vmatprep.mubr.msk.bf16.mxu1 %vm7585_vm0, %v7584_v2 }
 0x568   : > { %6605 = vmatmul.mubr.msk.bf16.vlgmr.msra.gmra.mrb[20].mxu0 %vm1804_vm4, %v2146_v0  ;;  %v8157_v0 = vld [vmem:[%s7614_s21 + $0x8] sm:$0xff]  }
 0x569   : > { %6610 = vmatprep.mubr.msk.bf16.mxu0 %vm7585_vm0, %v7584_v2 }
 0x633   : > { %v2095_v28 = vpop.f32.mrb[16].mxu0  ;;  %v2135_v37 = vpop.f32.mrb[20].mxu1 }
 0x634   : > { %v2145_v40 = vpack.c.bf16 %v2095_v28, %v2095_v28  ;;  %v2240_v41 = vpack.c.bf16 %v2135_v37, %v2135_v37  ;;  %v6580_v42 = vpop.f32.mrb[17].mxu0  ;;  %v6600_v44 = vpop.f32.mrb[21].mxu1  ;;  %v8162_v28 = vld [vmem:[%s7614_s21 + $0x10] sm:$0xff]   ;;  %v8167_v37 = vld [vmem:[%s7614_s21 + $0x18] sm:$0xff]  }
 0x635   : > { %v2098_v46 = vpop.f32.mrb[18].mxu0  ;;  %v2138_v48 = vpop.f32.mrb[22].mxu1 }
 0x636   : > { %v2197_v50 = vsel %vm1808_vm3, %v2145_v40, 0  ;;  %v2245_v52 = vsel %vm1808_vm3, %v2240_v41, 0  ;;  %v6581_v54 = vpop.f32.mrb[19].mxu0  ;;  %v6601_v55 = vpop.f32.mrb[23].mxu1 }
 0x637   : > { %6609 = vmatpush3.bf16.msra.mxu0 %v2197_v50  ;;  %6615 = vmatpush3.bf16.msra.mxu1 %v2245_v52 }
 0x638   : > { %6620 = vmatprep.subr.bf16.mxu0 %v7584_v2  ;;  %6626 = vmatprep.subr.bf16.mxu1 %v7584_v2 }
 0x63a   : > { %6611 = vmatmul.mubr.msk.bf16.vlgmr.msra.gmra.mrb[24].mxu0 %vm1804_vm4, %v2144_v56  ;;  %6617 = vmatmul.mubr.msk.bf16.vlgmr.msra.gmra.mrb[24].mxu1 %vm1804_vm4, %v2239_v57 }
 0x63b   : > { %6621 = vmatpush3.bf16.msra.mxu0 %v2151_v62  ;;  %6627 = vmatpush3.bf16.msra.mxu1 %v2197_v50  ;;  %v2187_v5 = vpop.f32.mrb[20].mxu0  ;;  %v2386_v62 = vpack.c.bf16 %v2297_v61, %v2297_v61  ;;  %v2435_v61 = vpop.permute.xlu1 %2434 }
 0x63c   : > { %6622 = vmatprep.mubr.msk.bf16.mxu0 %vm7585_vm0, %v7584_v2  ;;  %6628 = vmatprep.mubr.msk.bf16.mxu1 %vm7585_vm0, %v7584_v2  ;;  %v6606_v7 = vpop.f32.mrb[21].mxu0 }
 0x63d   : > { %6632 = vmatprep.subr.bf16.mxu0 %v7584_v2  ;;  %v2190_v10 = vpop.f32.mrb[22].mxu0  ;;  %6638 = vmatprep.subr.bf16.mxu1 %v7584_v2 }
 0x63e   : > { %v6607_v60 = vpop.f32.mrb[23].mxu0 }
 0x642   : > { %6623 = vmatmul.mubr.msk.bf16.vlgmr.msra.gmra.mrb[28].mxu0 %vm1804_vm4, %v2299_v12  ;;  %6629 = vmatmul.mubr.msk.bf16.vlgmr.msra.gmra.mrb[28].mxu1 %vm1804_vm4, %v2298_v59 }
 0x643   : > { %6633 = vmatpush3.bf16.msra.mxu0 %v2245_v52  ;;  %6634 = vmatprep.mubr.msk.bf16.mxu0 %vm7585_vm0, %v7584_v2 }
 0x644   : > { %6644 = vmatprep.subr.bf16.mxu0 %v7584_v2  ;;  %6640 = vmatprep.mubr.msk.bf16.mxu1 %vm7585_vm0, %v7584_v2 }
 0x64a   : > { %6635 = vmatmul.mubr.msk.bf16.vlgmr.msra.gmra.mrb[32].mxu0 %vm1804_vm4, %v2386_v62 }
 0x64b   : > { %6645 = vmatpush3.bf16.msra.mxu0 %v8150_v63  ;;  %6660 = vmatprep.mubr.msk.bf16.mxu0 %vm7585_vm0, %v7584_v2 }
 0x64c   : > { %6646 = vmatprep.subr.bf16.mxu0 %v7584_v2 }
 0x64f   : > { %6647 = vmatpush3.bf16.msra.mxu0 %v8157_v0 }
 0x650   : > { %6648 = vmatprep.subr.bf16.mxu0 %v7584_v2 }
 0x653   : > { %6649 = vmatpush3.bf16.msra.mxu0 %v8162_v28 }
 0x654   : > { %6650 = vmatprep.subr.bf16.mxu0 %v7584_v2 }
 0x657   : > { %6651 = vmatpush3.bf16.msra.mxu0 %v8167_v37 }
 0x658   : > { %6652 = vmatprep.subr.bf16.mxu0 %v7584_v2 }
 0x65b   : > { %6653 = vmatpush3.bf16.msra.mxu0 %v8172_v38 }
 0x65c   : > { %6654 = vmatprep.subr.bf16.mxu0 %v7584_v2 }
 0x65f   : > { %6655 = vmatpush3.bf16.msra.mxu0 %v8177_v39 }
 0x660   : > { %6656 = vmatprep.subr.bf16.mxu0 %v7584_v2 }
 0x663   : > { %6657 = vmatpush3.bf16.msra.mxu0 %v7837_v16 }
 0x664   : > { %6658 = vmatprep.subr.bf16.mxu0 %v7584_v2 }
 0x667   : > { %6659 = vmatpush3.bf16.msra.mxu0 %v7843_v18 }
 0x668   : > { %6702 = vmatprep.subr.bf16.mxu0 %v7584_v2 }
 0x70d   : > { %v2233_v40 = vpop.f32.mrb[24].mxu0  ;;  %v2281_v41 = vpop.f32.mrb[24].mxu1 }
 0x70e   : > { %v2234_v42 = vadd.f32 %v2233_v40, %v2187_v5  ;;  %v6612_v44 = vpop.f32.mrb[25].mxu0  ;;  %v6618_v46 = vpop.f32.mrb[25].mxu1 }
 0x70f   : > { %v2236_v48 = vpop.f32.mrb[26].mxu0  ;;  %v2284_v50 = vpop.f32.mrb[26].mxu1 }
 0x710   : > { %v2287_v52 = vadd.f32 %v2281_v41, %v2234_v42  ;;  %v6613_v54 = vpop.f32.mrb[27].mxu0  ;;  %v6619_v55 = vpop.f32.mrb[27].mxu1 }
 0x711   : > { %v2292_v48 = vpop.permute.xlu0 %2291 }
 0x712   : > { %v2294_v50 = vadd.f32 %v2292_v48, %v2287_v52 }
 0x714   : > { %v2438_v54 = vadd.f32 %v2294_v50, %v8110_v14 }
 0x715   : > { %v2337_v56 = vpop.f32.mrb[28].mxu0  ;;  %v2380_v57 = vpop.f32.mrb[28].mxu1 }
 0x716   : > { %v2381_v58 = vadd.f32 %v2380_v57, %v2337_v56  ;;  %v6624_v16 = vpop.f32.mrb[29].mxu0  ;;  %v6630_v4 = vpop.f32.mrb[29].mxu1  ;;  %v2446_v57 = vld [vmem:[%s8871_s18] sm:$0xff]  ;;  %s8878_s18 = sld [smem:[#allocation21_spill]] }
 0x717   : > { %v2340_v7 = vpop.f32.mrb[30].mxu0  ;;  %v2383_v10 = vpop.f32.mrb[30].mxu1  ;;  %v2447_v4 = vpack.c.bf16 %v2446_v57, %v2446_v57 }
 0x718   : > { %v6625_v18 = vpop.f32.mrb[31].mxu0  ;;  %v6631_v12 = vpop.f32.mrb[31].mxu1  ;;  %v2583_v10 = vld [vmem:[%s8872_s22 + $0x10] sm:$0xff] }
 0x71d   : > { %v2424_v59 = vpop.f32.mrb[32].mxu0 }
 0x71e   : > { %v2430_v60 = vadd.f32 %v2424_v59, %v2381_v58  ;;  %v6636_v5 = vpop.f32.mrb[33].mxu0 }
 0x71f   : > { %v2427_v62 = vpop.f32.mrb[34].mxu0 }
 0x720   : > { %v2437_v40 = vadd.f32 %v2435_v61, %v2430_v60  ;;  %v6637_v44 = vpop.f32.mrb[35].mxu0  ;;  %v2676_v61 = vpack.c.bf16 %v2583_v10, %v2583_v10 }
 0x722   : > { %v5835_v41 = vmul.f32 -1.442695, %v2437_v40 }
 0x724   : > { %7479 = vpow2.f32 %v5835_v41 }
 0x72e   : > { %v7480_v42 = vpop.eup %7479 }
 0x72f   : > { %v2442_v46 = vadd.f32 1.0, %v7480_v42  ;;  %v2735_v42 = vld [vmem:[%s8873_s23 + $0x8] sm:$0xff] }
 0x731   : > { %7481 = vrcp.f32 %v2442_v46 }
 0x73b   : > { %v7482_v55 = vpop.eup %7481 }
 0x73c   : > { %v2445_v56 = vmul.f32 %v7482_v55, %v2438_v54 }
 0x73e   : > { %v2448_v16 = vpack.c.bf16 %v2445_v56, %v2445_v56 }
 0x740   : > { %6661 = vmatmul.mubr.bf16.vlgmr.msra.gmra.mrb[36].mxu0 %v2448_v16  ;;  %v2459_v58 = vsel %vm1808_vm3, %v2448_v16, 0 }
 0x741   : > { %6639 = vmatpush3.bf16.msra.mxu1 %v2459_v58  ;;  %6703 = vmatpush3.bf16.msra.mxu0 %v7918_v43  ;;  %v2582_v43 = vld [vmem:[%s8872_s22 + $0x8] sm:$0xff] }
 0x742   : > { %6664 = vmatprep.subr.bf16.mxu1 %v7584_v2  ;;  %6704 = vmatprep.subr.bf16.mxu0 %v7584_v2 }
 0x743   : > { %6718 = vmatprep.mubr.msk.bf16.mxu0 %vm7585_vm0, %v7584_v2 }
 0x744   : > { %6641 = vmatmul.mubr.msk.bf16.vlgmr.msra.gmra.mrb[32].mxu1 %vm1804_vm4, %v2447_v4  ;;  %v2820_v4 = vpack.c.bf16 %v2735_v42, %v2735_v42 }
 0x745   : > { %6665 = vmatpush3.bf16.msra.mxu1 %v7861_v29  ;;  %6680 = vmatprep.mubr.msk.bf16.mxu1 %vm7585_vm0, %v7584_v2 }
 0x746   : > { %6666 = vmatprep.subr.bf16.mxu1 %v7584_v2  ;;  %6705 = vmatpush3.bf16.msra.mxu0 %v7924_v45  ;;  %v2586_v45 = vpack.c.bf16 %v2582_v43, %v2582_v43 }
 0x747   : > { %6706 = vmatprep.subr.bf16.mxu0 %v7584_v2 }
 0x749   : > { %6667 = vmatpush3.bf16.msra.mxu1 %v7869_v30 }
 0x74a   : > { %6668 = vmatprep.subr.bf16.mxu1 %v7584_v2  ;;  %6707 = vmatpush3.bf16.msra.mxu0 %v7930_v47 }
 0x74b   : > { %6708 = vmatprep.subr.bf16.mxu0 %v7584_v2 }
 0x74d   : > { %6669 = vmatpush3.bf16.msra.mxu1 %v7876_v31 }
 0x74e   : > { %6670 = vmatprep.subr.bf16.mxu1 %v7584_v2  ;;  %6709 = vmatpush3.bf16.msra.mxu0 %v7936_v49  ;;  %v2581_v49 = vld [vmem:[%s8872_s22] sm:$0xff] }
 0x74f   : > { %6710 = vmatprep.subr.bf16.mxu0 %v7584_v2  ;;  %v2584_v52 = vpack.c.bf16 %v2581_v49, %v2581_v49 }
 0x751   : > { %6671 = vmatpush3.bf16.msra.mxu1 %v7881_v32 }
 0x752   : > { %6672 = vmatprep.subr.bf16.mxu1 %v7584_v2  ;;  %6711 = vmatpush3.bf16.msra.mxu0 %v7942_v51 }
 0x753   : > { %6712 = vmatprep.subr.bf16.mxu0 %v7584_v2 }
 0x755   : > { %6673 = vmatpush3.bf16.msra.mxu1 %v7886_v33 }
 0x756   : > { %6674 = vmatprep.subr.bf16.mxu1 %v7584_v2  ;;  %6713 = vmatpush3.bf16.msra.mxu0 %v7948_v53 }
 0x757   : > { %6714 = vmatprep.subr.bf16.mxu0 %v7584_v2 }
 0x759   : > { %6675 = vmatpush3.bf16.msra.mxu1 %v7891_v34 }
 0x75a   : > { %6676 = vmatprep.subr.bf16.mxu1 %v7584_v2  ;;  %6715 = vmatpush3.bf16.msra.mxu0 %v7995_v21 }
 0x75b   : > { %6716 = vmatprep.subr.bf16.mxu0 %v7584_v2 }
 0x75d   : > { %6677 = vmatpush3.bf16.msra.mxu1 %v7896_v35 }
 0x75e   : > { %6678 = vmatprep.subr.bf16.mxu1 %v7584_v2  ;;  %6717 = vmatpush3.bf16.msra.mxu0 %v8005_v23 }
 0x75f   : > { %6742 = vmatprep.subr.bf16.mxu0 %v7584_v2 }
 0x761   : > { %6679 = vmatpush3.bf16.msra.mxu1 %v7901_v36 }
 0x762   : > { %6684 = vmatprep.subr.bf16.mxu1 %v7584_v2 }
 0x764   : > { %6681 = vmatmul.mubr.bf16.vlgmr.msra.gmra.mrb[36].mxu1 %v2448_v16 }
 0x765   : > { %6685 = vmatpush3.bf16.msra.mxu1 %v2459_v58  ;;  %6686 = vmatprep.mubr.msk.bf16.mxu1 %vm7585_vm0, %v7584_v2 }
 0x766   : > { %6690 = vmatprep.subr.bf16.mxu1 %v7584_v2 }
 0x76c   : > { %6687 = vmatmul.mubr.msk.bf16.vlgmr.msra.gmra.mrb[32].mxu1 %vm1804_vm4, %v2586_v45  ;;  %v2734_v45 = vld [vmem:[%s8873_s23] sm:$0xff] }
 0x76d   : > { %6692 = vmatprep.mubr.msk.bf16.mxu1 %vm7585_vm0, %v7584_v2 }
 0x813   : > { %v2535_v47 = vpop.f32.mrb[36].mxu0 }
 0x814   : > { %v2585_v51 = vpack.c.bf16 %v2535_v47, %v2535_v47  ;;  %v6662_v53 = vpop.f32.mrb[37].mxu0  ;;  %v2778_v47 = vpack.c.bf16 %v2734_v45, %v2734_v45  ;;  %v3248_v45 = vld [vmem:[%s8875_s1 + $0x10] sm:$0xff] }
 0x815   : > { %v2538_v21 = vpop.f32.mrb[38].mxu0  ;;  %v8335_v53 = vld [vmem:[%s7614_s21 + $0x38] sm:$0xff]  }
 0x816   : > { %v2634_v23 = vsel %vm1808_vm3, %v2585_v51, 0  ;;  %v6663_v14 = vpop.f32.mrb[39].mxu0  ;;  %v8330_v51 = vld [vmem:[%s7614_s21 + $0x30] sm:$0xff]  }
 0x817   : > { %6691 = vmatpush3.bf16.msra.mxu1 %v2634_v23 }
 0x818   : > { %6696 = vmatprep.subr.bf16.mxu1 %v7584_v2 }
 0x81a   : > { %6693 = vmatmul.mubr.msk.bf16.vlgmr.msra.gmra.mrb[32].mxu1 %vm1804_vm4, %v2584_v52 }
 0x81b   : > { %6698 = vmatprep.mubr.msk.bf16.mxu1 %vm7585_vm0, %v7584_v2 }
 0x837   : > { %v2575_v7 = vpop.f32.mrb[36].mxu1 }
 0x838   : > { %v2677_v18 = vpack.c.bf16 %v2575_v7, %v2575_v7  ;;  %v6682_v12 = vpop.f32.mrb[37].mxu1 }
 0x839   : > { %v2578_v59 = vpop.f32.mrb[38].mxu1 }
 0x83a   : > { %v2682_v60 = vsel %vm1808_vm3, %v2677_v18, 0  ;;  %v6683_v5 = vpop.f32.mrb[39].mxu1 }
 0x83b   : > { %6697 = vmatpush3.bf16.msra.mxu1 %v2682_v60  ;;  %v3093_v5 = vld [vmem:[%s8874_s26 + $0x8] sm:$0xff] }
 0x83c   : > { %6722 = vmatprep.subr.bf16.mxu1 %v7584_v2 }
 0x83e   : > { %6699 = vmatmul.mubr.msk.bf16.vlgmr.msra.gmra.mrb[32].mxu1 %vm1804_vm4, %v2676_v61  ;;  %v3097_v61 = vpack.c.bf16 %v3093_v5, %v3093_v5 }
 0x83f   : > { %6723 = vmatpush3.bf16.msra.mxu1 %v7961_v11  ;;  %6738 = vmatprep.mubr.msk.bf16.mxu1 %vm7585_vm0, %v7584_v2  ;;  %v2453_v11 = vpop.permute.xlu1 %2452 }
 0x840   : > { %6724 = vmatprep.subr.bf16.mxu1 %v7584_v2 }
 0x843   : > { %6725 = vmatpush3.bf16.msra.mxu1 %v7967_v13  ;;  %v3007_v52 = vpop.permute.xlu1 %3006 }
 0x844   : > { %6726 = vmatprep.subr.bf16.mxu1 %v7584_v2 }
 0x847   : > { %6727 = vmatpush3.bf16.msra.mxu1 %v7974_v15 }
 0x848   : > { %6728 = vmatprep.subr.bf16.mxu1 %v7584_v2 }
 0x84b   : > { %6729 = vmatpush3.bf16.msra.mxu1 %v7979_v17 }
 0x84c   : > { %6730 = vmatprep.subr.bf16.mxu1 %v7584_v2 }
 0x84f   : > { %6731 = vmatpush3.bf16.msra.mxu1 %v7984_v19  ;;  %v2729_v19 = vpop.permute.xlu0 %2728 }
 0x850   : > { %6732 = vmatprep.subr.bf16.mxu1 %v7584_v2 }
 0x853   : > { %6733 = vmatpush3.bf16.msra.mxu1 %v7989_v20 }
 0x854   : > { %6734 = vmatprep.subr.bf16.mxu1 %v7584_v2 }
 0x857   : > { %6735 = vmatpush3.bf16.msra.mxu1 %v7998_v22 }
 0x858   : > { %6736 = vmatprep.subr.bf16.mxu1 %v7584_v2 }
 0x85b   : > { %6737 = vmatpush3.bf16.msra.mxu1 %v8008_v24 }
 0x85c   : > { %6774 = vmatprep.subr.bf16.mxu1 %v7584_v2 }
 0x911   : > { %v2718_v13 = vpop.f32.mrb[32].mxu1 }
 0x912   : > { %v7284_v15 = vadd.f32 %v2718_v13, %v2453_v11  ;;  %v6700_v17 = vpop.f32.mrb[33].mxu1 }
 0x913   : > { %v2721_v62 = vpop.f32.mrb[34].mxu1  ;;  %v3094_v17 = vld [vmem:[%s8874_s26 + $0x10] sm:$0xff] }
 0x914   : > { %v7285_v40 = vadd.f32 %v7284_v15, %v2729_v19  ;;  %v6701_v44 = vpop.f32.mrb[35].mxu1  ;;  %v3092_v15 = vld [vmem:[%s8874_s26] sm:$0xff] }
 0x916   : > { %v2733_v20 = vmax.f32 %v7285_v40, 0.0 }
 0x918   : > { %v2737_v41 = vpack.c.bf16 %v2733_v20, %v2733_v20 }
 0x91a   : > { %6719 = vmatmul.mubr.bf16.vlgmr.msra.gmra.mrb[40].mxu0 %v2737_v41  ;;  %6739 = vmatmul.mubr.bf16.vlgmr.msra.gmra.mrb[40].mxu1 %v2737_v41 }
 0x91b   : > { %6744 = vmatprep.mubr.msk.bf16.mxu0 %vm7585_vm0, %v7584_v2  ;;  %6776 = vmatprep.mubr.msk.bf16.mxu1 %vm7585_vm0, %v7584_v2 }
 0x9ed   : > { %v2772_v22 = vpop.f32.mrb[40].mxu0  ;;  %v2814_v24 = vpop.f32.mrb[40].mxu1 }
 0x9ee   : > { %v2821_v46 = vpack.c.bf16 %v2814_v24, %v2814_v24  ;;  %v6720_v48 = vpop.f32.mrb[41].mxu0  ;;  %v6740_v50 = vpop.f32.mrb[41].mxu1  ;;  %v2779_v56 = vpack.c.bf16 %v2772_v22, %v2772_v22 }
 0x9ef   : > { %v2775_v54 = vpop.f32.mrb[42].mxu0  ;;  %v2817_v55 = vpop.f32.mrb[42].mxu1  ;;  %v3095_v48 = vpack.c.bf16 %v3092_v15, %v3092_v15  ;;  %v3190_v50 = vpack.c.bf16 %v3094_v17, %v3094_v17 }
 0x9f0   : > { %v2826_v57 = vsel %vm1808_vm3, %v2821_v46, 0  ;;  %v6721_v16 = vpop.f32.mrb[43].mxu0  ;;  %v6741_v58 = vpop.f32.mrb[43].mxu1  ;;  %v2872_v43 = vsel %vm1808_vm3, %v2779_v56, 0  ;;  %v3247_v54 = vld [vmem:[%s8875_s1 + $0x8] sm:$0xff]  ;;  %v3246_v55 = vld [vmem:[%s8875_s1] sm:$0xff] }
 0x9f1   : > { %6743 = vmatpush3.bf16.msra.mxu0 %v2826_v57  ;;  %v3250_v58 = vpack.c.bf16 %v3247_v54, %v3247_v54  ;;  %v8450_v54 = vld [vmem:[%s7614_s21 + $0xb0] sm:$0xff]   ;;  %s8881_s1 = sld [smem:[#allocation4_spill]] }
 0x9f2   : > { %6748 = vmatprep.subr.bf16.mxu0 %v7584_v2 }
 0x9f4   : > { %6745 = vmatmul.mubr.msk.bf16.vlgmr.msra.gmra.mrb[44].mxu0 %vm1804_vm4, %v2820_v4  ;;  %v3249_v4 = vpack.c.bf16 %v3246_v55, %v3246_v55  ;;  %v7513_v55 = vld [vmem:[%s8864_s28 + $0x38] sm:$0xff]  }
 0x9f5   : > { %6749 = vmatpush3.bf16.msra.mxu0 %v2872_v43  ;;  %6750 = vmatprep.mubr.msk.bf16.mxu0 %vm7585_vm0, %v7584_v2 }
 0x9f6   : > { %6754 = vmatprep.subr.bf16.mxu0 %v7584_v2 }
 0x9fc   : > { %6751 = vmatmul.mubr.msk.bf16.vlgmr.msra.gmra.mrb[48].mxu0 %vm1804_vm4, %v2778_v47  ;;  %v3337_v47 = vpack.c.bf16 %v3248_v45, %v3248_v45 }
 0x9fd   : > { %6755 = vmatpush3.bf16.msra.mxu0 %v8028_v1  ;;  %6770 = vmatprep.mubr.msk.bf16.mxu0 %vm7585_vm0, %v7584_v2 }
 0x9fe   : > { %6756 = vmatprep.subr.bf16.mxu0 %v7584_v2 }
 0xa01   : > { %6757 = vmatpush3.bf16.msra.mxu0 %v8033_v3 }
 0xa02   : > { %6758 = vmatprep.subr.bf16.mxu0 %v7584_v2 }
 0xa05   : > { %6759 = vmatpush3.bf16.msra.mxu0 %v8040_v6 }
 0xa06   : > { %6760 = vmatprep.subr.bf16.mxu0 %v7584_v2 }
 0xa09   : > { %6761 = vmatpush3.bf16.msra.mxu0 %v8045_v8 }
 0xa0a   : > { %6762 = vmatprep.subr.bf16.mxu0 %v7584_v2 }
 0xa0d   : > { %6763 = vmatpush3.bf16.msra.mxu0 %v8050_v9  ;;  %v2736_v9 = vld [vmem:[%s8873_s23 + $0x10] sm:$0xff] }
 0xa0e   : > { %6764 = vmatprep.subr.bf16.mxu0 %v7584_v2 }
 0xa11   : > { %6765 = vmatpush3.bf16.msra.mxu0 %v8055_v25 }
 0xa12   : > { %6766 = vmatprep.subr.bf16.mxu0 %v7584_v2 }
 0xa15   : > { %6767 = vmatpush3.bf16.msra.mxu0 %v8060_v26 }
 0xa16   : > { %6768 = vmatprep.subr.bf16.mxu0 %v7584_v2 }
 0xa19   : > { %6769 = vmatpush3.bf16.msra.mxu0 %v8065_v27 }
 0xa1a   : > { %6800 = vmatprep.subr.bf16.mxu0 %v7584_v2 }
 0xa1c   : > { %6771 = vmatmul.mubr.bf16.vlgmr.msra.gmra.mrb[52].mxu0 %v2737_v41 }
 0xa1d   : > { %6801 = vmatpush3.bf16.msra.mxu0 %v7861_v29  ;;  %6816 = vmatprep.mubr.msk.bf16.mxu0 %vm7585_vm0, %v7584_v2 }
 0xa1e   : > { %6802 = vmatprep.subr.bf16.mxu0 %v7584_v2 }
 0xa21   : > { %6803 = vmatpush3.bf16.msra.mxu0 %v7869_v30 }
 0xa22   : > { %6804 = vmatprep.subr.bf16.mxu0 %v7584_v2 }
 0xa25   : > { %6805 = vmatpush3.bf16.msra.mxu0 %v7876_v31 }
 0xa26   : > { %6806 = vmatprep.subr.bf16.mxu0 %v7584_v2 }
 0xa29   : > { %6807 = vmatpush3.bf16.msra.mxu0 %v7881_v32 }
 0xa2a   : > { %6808 = vmatprep.subr.bf16.mxu0 %v7584_v2 }
 0xa2d   : > { %6809 = vmatpush3.bf16.msra.mxu0 %v7886_v33 }
 0xa2e   : > { %6810 = vmatprep.subr.bf16.mxu0 %v7584_v2 }
 0xa31   : > { %6811 = vmatpush3.bf16.msra.mxu0 %v7891_v34 }
 0xa32   : > { %6812 = vmatprep.subr.bf16.mxu0 %v7584_v2 }
 0xa35   : > { %6813 = vmatpush3.bf16.msra.mxu0 %v7896_v35 }
 0xa36   : > { %6814 = vmatprep.subr.bf16.mxu0 %v7584_v2 }
 0xa39   : > { %6815 = vmatpush3.bf16.msra.mxu0 %v7901_v36  ;;  %v2954_v36 = vpack.c.bf16 %v2736_v9, %v2736_v9 }
 0xa3a   : > { %6832 = vmatprep.subr.bf16.mxu0 %v7584_v2 }
 0xac7   : > { %v2862_v29 = vpop.f32.mrb[44].mxu0 }
 0xac8   : > { %v6746_v30 = vpop.f32.mrb[45].mxu0 }
 0xac9   : > { %v2865_v31 = vpop.f32.mrb[46].mxu0 }
 0xaca   : > { %v6747_v32 = vpop.f32.mrb[47].mxu0 }
 0xacf   : > { %v2908_v33 = vpop.f32.mrb[48].mxu0 }
 0xad0   : > { %v2909_v1 = vadd.f32 %v2908_v33, %v2862_v29  ;;  %v6752_v3 = vpop.f32.mrb[49].mxu0 }
 0xad1   : > { %v2911_v6 = vpop.f32.mrb[50].mxu0 }
 0xad2   : > { %v6753_v34 = vpop.f32.mrb[51].mxu0 }
 0xaef   : > { %v2948_v8 = vpop.f32.mrb[52].mxu0 }
 0xaf0   : > { %v2955_v25 = vpack.c.bf16 %v2948_v8, %v2948_v8  ;;  %v6772_v26 = vpop.f32.mrb[53].mxu0 }
 0xaf1   : > { %v2951_v35 = vpop.f32.mrb[54].mxu0 }
 0xaf2   : > { %v2960_v27 = vsel %vm1808_vm3, %v2955_v25, 0  ;;  %v6773_v49 = vpop.f32.mrb[55].mxu0 }
 0xaf3   : > { %6775 = vmatpush3.bf16.msra.mxu1 %v2960_v27 }
 0xaf4   : > { %6780 = vmatprep.subr.bf16.mxu1 %v7584_v2 }
 0xaf6   : > { %6777 = vmatmul.mubr.msk.bf16.vlgmr.msra.gmra.mrb[44].mxu1 %vm1804_vm4, %v2954_v36  ;;  %v3386_v36 = vpop.permute.xlu0 %3385 }
 0xaf7   : > { %6781 = vmatpush3.bf16.msra.mxu1 %v8150_v63  ;;  %6796 = vmatprep.mubr.msk.bf16.mxu1 %vm7585_vm0, %v7584_v2 }
 0xaf8   : > { %6782 = vmatprep.subr.bf16.mxu1 %v7584_v2 }
 0xafb   : > { %6783 = vmatpush3.bf16.msra.mxu1 %v8157_v0 }
 0xafc   : > { %6784 = vmatprep.subr.bf16.mxu1 %v7584_v2 }
 0xaff   : > { %6785 = vmatpush3.bf16.msra.mxu1 %v8162_v28 }
 0xb00   : > { %6786 = vmatprep.subr.bf16.mxu1 %v7584_v2 }
 0xb03   : > { %6787 = vmatpush3.bf16.msra.mxu1 %v8167_v37 }
 0xb04   : > { %6788 = vmatprep.subr.bf16.mxu1 %v7584_v2 }
 0xb07   : > { %6789 = vmatpush3.bf16.msra.mxu1 %v8172_v38 }
 0xb08   : > { %6790 = vmatprep.subr.bf16.mxu1 %v7584_v2 }
 0xb0b   : > { %6791 = vmatpush3.bf16.msra.mxu1 %v8177_v39 }
 0xb0c   : > { %6792 = vmatprep.subr.bf16.mxu1 %v7584_v2 }
 0xb0f   : > { %6793 = vmatpush3.bf16.msra.mxu1 %v8330_v51 }
 0xb10   : > { %6794 = vmatprep.subr.bf16.mxu1 %v7584_v2 }
 0xb13   : > { %6795 = vmatpush3.bf16.msra.mxu1 %v8335_v53 }
 0xb14   : > { %6820 = vmatprep.subr.bf16.mxu1 %v7584_v2 }
 0xbc9   : > { %v2996_v21 = vpop.f32.mrb[44].mxu1 }
 0xbca   : > { %v3002_v23 = vadd.f32 %v2996_v21, %v2909_v1  ;;  %v6778_v14 = vpop.f32.mrb[45].mxu1 }
 0xbcb   : > { %v2999_v7 = vpop.f32.mrb[46].mxu1 }
 0xbcc   : > { %v3009_v10 = vadd.f32 %v3007_v52, %v3002_v23  ;;  %v6779_v18 = vpop.f32.mrb[47].mxu1 }
 0xbcd   : > { %v3243_v18 = vpop.permute.xlu1 %3242 }
 0xbce   : > { %v8339_v12 = vmax.f32 %v3009_v10, 0.0 }
 0xbd0   : > { %v3011_v59 = vpack.c.bf16 %v8339_v12, %v8339_v12 }
 0xbd2   : > { %6797 = vmatmul.mubr.bf16.vlgmr.msra.gmra.mrb[48].mxu1 %v3011_v59  ;;  %6817 = vmatmul.mubr.bf16.vlgmr.msra.gmra.mrb[56].mxu0 %v3011_v59  ;;  %v3102_v60 = vsel %vm1808_vm3, %v3011_v59, 0 }
 0xbd3   : > { %6821 = vmatpush3.bf16.msra.mxu1 %v3102_v60  ;;  %6822 = vmatprep.mubr.msk.bf16.mxu1 %vm7585_vm0, %v7584_v2 }
 0xbd4   : > { %6826 = vmatprep.subr.bf16.mxu1 %v7584_v2  ;;  %6834 = vmatprep.mubr.msk.bf16.mxu0 %vm7585_vm0, %v7584_v2 }
 0xbda   : > { %6823 = vmatmul.mubr.msk.bf16.vlgmr.msra.gmra.mrb[52].mxu1 %vm1804_vm4, %v3097_v61 }
 0xbdb   : > { %6828 = vmatprep.mubr.msk.bf16.mxu1 %vm7585_vm0, %v7584_v2 }
 0xca5   : > { %v3046_v11 = vpop.f32.mrb[48].mxu1  ;;  %v3086_v13 = vpop.f32.mrb[56].mxu0 }
 0xca6   : > { %v3096_v19 = vpack.c.bf16 %v3046_v11, %v3046_v11  ;;  %v3191_v62 = vpack.c.bf16 %v3086_v13, %v3086_v13  ;;  %v6798_v40 = vpop.f32.mrb[49].mxu1  ;;  %v6818_v44 = vpop.f32.mrb[57].mxu0  ;;  %v3397_v11 = vld [vmem:[%s8876_s2] sm:$0xff]  ;;  %s8879_s2 = sld [smem:[#allocation22_spill]] }
 0xca7   : > { %v3049_v20 = vpop.f32.mrb[50].mxu1  ;;  %v3089_v41 = vpop.f32.mrb[58].mxu0  ;;  %v3398_v17 = vpack.c.bf16 %v3397_v11, %v3397_v11  ;;  %v8415_v40 = vld [vmem:[%s7614_s21 + $0x88] sm:$0xff]   ;;  %v7503_v44 = vld [vmem:[%s8864_s28 + $0x10] sm:$0xff]  }
 0xca8   : > { %v3148_v22 = vsel %vm1808_vm3, %v3096_v19, 0  ;;  %v3196_v24 = vsel %vm1808_vm3, %v3191_v62, 0  ;;  %v6799_v42 = vpop.f32.mrb[51].mxu1  ;;  %v6819_v46 = vpop.f32.mrb[59].mxu0  ;;  %v7499_v19 = vld [vmem:[%s8864_s28] sm:$0xff]   ;;  %v7501_v62 = vld [vmem:[%s8864_s28 + $0x8] sm:$0xff]  }
 0xca9   : > { %6827 = vmatpush3.bf16.msra.mxu1 %v3148_v22  ;;  %6833 = vmatpush3.bf16.msra.mxu0 %v3196_v24  ;;  %v8422_v20 = vld [vmem:[%s7614_s21 + $0x90] sm:$0xff]   ;;  %v7505_v41 = vld [vmem:[%s8864_s28 + $0x18] sm:$0xff]   ;;  %v8436_v42 = vld [vmem:[%s7614_s21 + $0xa0] sm:$0xff]  }
 0xcaa   : > { %6838 = vmatprep.subr.bf16.mxu1 %v7584_v2  ;;  %6844 = vmatprep.subr.bf16.mxu0 %v7584_v2  ;;  %v7509_v46 = vld [vmem:[%s8864_s28 + $0x28] sm:$0xff]  }
 0xcac   : > { %6829 = vmatmul.mubr.msk.bf16.vlgmr.msra.gmra.mrb[56].mxu1 %vm1804_vm4, %v3095_v48  ;;  %6835 = vmatmul.mubr.msk.bf16.vlgmr.msra.gmra.mrb[60].mxu0 %vm1804_vm4, %v3190_v50  ;;  %v8443_v48 = vld [vmem:[%s7614_s21 + $0xa8] sm:$0xff]   ;;  %v7511_v50 = vld [vmem:[%s8864_s28 + $0x30] sm:$0xff]  }
 0xcad   : > { %6839 = vmatpush3.bf16.msra.mxu1 %v3102_v60  ;;  %6845 = vmatpush3.bf16.msra.mxu0 %v3148_v22  ;;  %v3138_v56 = vpop.f32.mrb[52].mxu1  ;;  %v8429_v22 = vld [vmem:[%s7614_s21 + $0x98] sm:$0xff]  }
 0xcae   : > { %6840 = vmatprep.mubr.msk.bf16.mxu1 %vm7585_vm0, %v7584_v2  ;;  %6846 = vmatprep.mubr.msk.bf16.mxu0 %vm7585_vm0, %v7584_v2  ;;  %v6824_v57 = vpop.f32.mrb[53].mxu1 }
 0xcaf   : > { %6850 = vmatprep.subr.bf16.mxu1 %v7584_v2  ;;  %v3141_v16 = vpop.f32.mrb[54].mxu1  ;;  %6856 = vmatprep.subr.bf16.mxu0 %v7584_v2  ;;  %v3533_v57 = vld [vmem:[%s8877_s7 + $0x8] sm:$0xff] }
 0xcb0   : > { %v6825_v43 = vpop.f32.mrb[55].mxu1  ;;  %v3537_v16 = vpack.c.bf16 %v3533_v57, %v3533_v57  ;;  %v7524_v57 = vld [vmem:[%s8864_s28 + $0x88] sm:$0xff]  }
 0xcb4   : > { %6841 = vmatmul.mubr.msk.bf16.vlgmr.msra.gmra.mrb[60].mxu1 %vm1804_vm4, %v3250_v58  ;;  %6847 = vmatmul.mubr.msk.bf16.vlgmr.msra.gmra.mrb[64].mxu0 %vm1804_vm4, %v3249_v4  ;;  %v3532_v4 = vld [vmem:[%s8877_s7] sm:$0xff] }
 0xcb5   : > { %6851 = vmatpush3.bf16.msra.mxu1 %v3196_v24  ;;  %6852 = vmatprep.mubr.msk.bf16.mxu1 %vm7585_vm0, %v7584_v2  ;;  %v7507_v24 = vld [vmem:[%s8864_s28 + $0x20] sm:$0xff]  }
 0xcb6   : > { %6862 = vmatprep.subr.bf16.mxu1 %v7584_v2  ;;  %6858 = vmatprep.mubr.msk.bf16.mxu0 %vm7585_vm0, %v7584_v2 }
 0xcbc   : > { %6853 = vmatmul.mubr.msk.bf16.vlgmr.msra.gmra.mrb[64].mxu1 %vm1804_vm4, %v3337_v47 }
 0xcbd   : > { %6863 = vmatpush3.bf16.msra.mxu1 %v8150_v63  ;;  %6878 = vmatprep.mubr.msk.bf16.mxu1 %vm7585_vm0, %v7584_v2 }
 0xcbe   : > { %6864 = vmatprep.subr.bf16.mxu1 %v7584_v2 }
 0xcc1   : > { %6865 = vmatpush3.bf16.msra.mxu1 %v8157_v0 }
 0xcc2   : > { %6866 = vmatprep.subr.bf16.mxu1 %v7584_v2 }
 0xcc5   : > { %6867 = vmatpush3.bf16.msra.mxu1 %v8162_v28 }
 0xcc6   : > { %6868 = vmatprep.subr.bf16.mxu1 %v7584_v2 }
 0xcc9   : > { %6869 = vmatpush3.bf16.msra.mxu1 %v8167_v37 }
 0xcca   : > { %6870 = vmatprep.subr.bf16.mxu1 %v7584_v2 }
 0xccd   : > { %6871 = vmatpush3.bf16.msra.mxu1 %v8172_v38 }
 0xcce   : > { %6872 = vmatprep.subr.bf16.mxu1 %v7584_v2 }
 0xcd1   : > { %6873 = vmatpush3.bf16.msra.mxu1 %v8177_v39 }
 0xcd2   : > { %6874 = vmatprep.subr.bf16.mxu1 %v7584_v2 }
 0xcd5   : > { %6875 = vmatpush3.bf16.msra.mxu1 %v8330_v51 }
 0xcd6   : > { %6876 = vmatprep.subr.bf16.mxu1 %v7584_v2 }
 0xcd9   : > { %6877 = vmatpush3.bf16.msra.mxu1 %v8335_v53 }
 0xcda   : > { %6920 = vmatprep.subr.bf16.mxu1 %v7584_v2 }
 0xd7f   : > { %v3184_v63 = vpop.f32.mrb[56].mxu1  ;;  %v3232_v0 = vpop.f32.mrb[60].mxu0 }
 0xd80   : > { %v3185_v28 = vadd.f32 %v3184_v63, %v3138_v56  ;;  %v6830_v37 = vpop.f32.mrb[57].mxu1  ;;  %v6836_v29 = vpop.f32.mrb[61].mxu0  ;;  %v8457_v56 = vld [vmem:[%s7614_s21 + $0xb8] sm:$0xff]  }
 0xd81   : > { %v3187_v38 = vpop.f32.mrb[58].mxu1  ;;  %v3235_v30 = vpop.f32.mrb[62].mxu0  ;;  %v3534_v29 = vld [vmem:[%s8877_s7 + $0x10] sm:$0xff] }
 0xd82   : > { %v3238_v31 = vadd.f32 %v3232_v0, %v3185_v28  ;;  %v6831_v32 = vpop.f32.mrb[59].mxu1  ;;  %v6837_v39 = vpop.f32.mrb[63].mxu0  ;;  %v3535_v28 = vpack.c.bf16 %v3532_v4, %v3532_v4  ;;  %v7527_v4 = vld [vmem:[%s8864_s28 + $0xa0] sm:$0xff]  }
 0xd84   : > { %v3245_v59 = vadd.f32 %v3243_v18, %v3238_v31 }
 0xd86   : > { %v3389_v60 = vadd.f32 %v3245_v59, %v8339_v12  ;;  %v8406_v12 = vld [vmem:[%s7614_s21 + $0x80] sm:$0xff]  }
 0xd87   : > { %v3288_v33 = vpop.f32.mrb[60].mxu1  ;;  %v3331_v1 = vpop.f32.mrb[64].mxu0 }
 0xd88   : > { %v3332_v3 = vadd.f32 %v3331_v1, %v3288_v33  ;;  %v6842_v6 = vpop.f32.mrb[61].mxu1  ;;  %v6848_v34 = vpop.f32.mrb[65].mxu0  ;;  %v3627_v33 = vpack.c.bf16 %v3534_v29, %v3534_v29  ;;  %v7515_v1 = vld [vmem:[%s8864_s28 + $0x40] sm:$0xff]   ;;  %v3687_v29 = vld [vmem:[%s8878_s18 + $0x10] sm:$0xff] }
 0xd89   : > { %v3291_v8 = vpop.f32.mrb[62].mxu1  ;;  %v3334_v9 = vpop.f32.mrb[66].mxu0  ;;  %v7517_v6 = vld [vmem:[%s8864_s28 + $0x50] sm:$0xff]   ;;  %v7518_v34 = vld [vmem:[%s8864_s28 + $0x58] sm:$0xff]  }
 0xd8a   : > { %v6843_v25 = vpop.f32.mrb[63].mxu1  ;;  %v6849_v26 = vpop.f32.mrb[67].mxu0  ;;  %v7519_v8 = vld [vmem:[%s8864_s28 + $0x60] sm:$0xff]   ;;  %v7520_v9 = vld [vmem:[%s8864_s28 + $0x68] sm:$0xff]  }
 0xd8b   : > { %v7521_v25 = vld [vmem:[%s8864_s28 + $0x70] sm:$0xff]   ;;  %v7522_v26 = vld [vmem:[%s8864_s28 + $0x78] sm:$0xff]  }
 0xd8f   : > { %v3375_v35 = vpop.f32.mrb[64].mxu1 }
 0xd90   : > { %v3381_v27 = vadd.f32 %v3375_v35, %v3332_v3  ;;  %v6854_v49 = vpop.f32.mrb[65].mxu1  ;;  %v7516_v3 = vld [vmem:[%s8864_s28 + $0x48] sm:$0xff]   ;;  %v3404_v35 = vpop.permute.xlu0 %3403 }
 0xd91   : > { %v3378_v21 = vpop.f32.mrb[66].mxu1 }
 0xd92   : > { %v3388_v23 = vadd.f32 %v3386_v36, %v3381_v27  ;;  %v6855_v14 = vpop.f32.mrb[67].mxu1  ;;  %v3680_v21 = vpop.permute.xlu1 %3679 }
 0xd94   : > { %v5849_v52 = vmul.f32 -1.442695, %v3388_v23 }
 0xd96   : > { %7483 = vpow2.f32 %v5849_v52 }
 0xda0   : > { %v7484_v7 = vpop.eup %7483 }
 0xda1   : > { %v3393_v10 = vadd.f32 1.0, %v7484_v7 }
 0xda3   : > { %7485 = vrcp.f32 %v3393_v10 }
 0xdad   : > { %v7486_v5 = vpop.eup %7485 }
 0xdae   : > { %v3396_v61 = vmul.f32 %v7486_v5, %v3389_v60  ;;  %v3686_v60 = vld [vmem:[%s8878_s18 + $0x8] sm:$0xff] }
 0xdb0   : > { %v3399_v13 = vpack.c.bf16 %v3396_v61, %v3396_v61 }
 0xdb2   : > { %6879 = vmatmul.mubr.bf16.vlgmr.msra.gmra.mrb[68].mxu1 %v3399_v13  ;;  %v3410_v15 = vsel %vm1808_vm3, %v3399_v13, 0 }
 0xdb3   : > { %6857 = vmatpush3.bf16.msra.mxu0 %v3410_v15  ;;  %6921 = vmatpush3.bf16.msra.mxu1 %v7499_v19 }
 0xdb4   : > { %6882 = vmatprep.subr.bf16.mxu0 %v7584_v2  ;;  %6922 = vmatprep.subr.bf16.mxu1 %v7584_v2 }
 0xdb5   : > { %6936 = vmatprep.mubr.msk.bf16.mxu1 %vm7585_vm0, %v7584_v2 }
 0xdb6   : > { %6859 = vmatmul.mubr.msk.bf16.vlgmr.msra.gmra.mrb[68].mxu0 %vm1804_vm4, %v3398_v17 }
 0xdb7   : > { %6883 = vmatpush3.bf16.msra.mxu0 %v8406_v12  ;;  %6898 = vmatprep.mubr.msk.bf16.mxu0 %vm7585_vm0, %v7584_v2 }
 0xdb8   : > { %6884 = vmatprep.subr.bf16.mxu0 %v7584_v2  ;;  %6923 = vmatpush3.bf16.msra.mxu1 %v7501_v62 }
 0xdb9   : > { %6924 = vmatprep.subr.bf16.mxu1 %v7584_v2 }
 0xdbb   : > { %6885 = vmatpush3.bf16.msra.mxu0 %v8415_v40 }
 0xdbc   : > { %6886 = vmatprep.subr.bf16.mxu0 %v7584_v2  ;;  %6925 = vmatpush3.bf16.msra.mxu1 %v7503_v44 }
 0xdbd   : > { %6926 = vmatprep.subr.bf16.mxu1 %v7584_v2 }
 0xdbf   : > { %6887 = vmatpush3.bf16.msra.mxu0 %v8422_v20 }
 0xdc0   : > { %6888 = vmatprep.subr.bf16.mxu0 %v7584_v2  ;;  %6927 = vmatpush3.bf16.msra.mxu1 %v7505_v41  ;;  %v3771_v41 = vpack.c.bf16 %v3686_v60, %v3686_v60 }
 0xdc1   : > { %6928 = vmatprep.subr.bf16.mxu1 %v7584_v2 }
 0xdc3   : > { %6889 = vmatpush3.bf16.msra.mxu0 %v8429_v22 }
 0xdc4   : > { %6890 = vmatprep.subr.bf16.mxu0 %v7584_v2  ;;  %6929 = vmatpush3.bf16.msra.mxu1 %v7507_v24 }
 0xdc5   : > { %6930 = vmatprep.subr.bf16.mxu1 %v7584_v2 }
 0xdc7   : > { %6891 = vmatpush3.bf16.msra.mxu0 %v8436_v42 }
 0xdc8   : > { %6892 = vmatprep.subr.bf16.mxu0 %v7584_v2  ;;  %6931 = vmatpush3.bf16.msra.mxu1 %v7509_v46  ;;  %v3685_v46 = vld [vmem:[%s8878_s18] sm:$0xff] }
 0xdc9   : > { %6932 = vmatprep.subr.bf16.mxu1 %v7584_v2 }
 0xdcb   : > { %6893 = vmatpush3.bf16.msra.mxu0 %v8443_v48 }
 0xdcc   : > { %6894 = vmatprep.subr.bf16.mxu0 %v7584_v2  ;;  %6933 = vmatpush3.bf16.msra.mxu1 %v7511_v50  ;;  %v3729_v50 = vpack.c.bf16 %v3685_v46, %v3685_v46 }
 0xdcd   : > { %6934 = vmatprep.subr.bf16.mxu1 %v7584_v2 }
 0xdcf   : > { %6895 = vmatpush3.bf16.msra.mxu0 %v8450_v54 }
 0xdd0   : > { %6896 = vmatprep.subr.bf16.mxu0 %v7584_v2  ;;  %6935 = vmatpush3.bf16.msra.mxu1 %v7513_v55  ;;  %v7523_v55 = vld [vmem:[%s8864_s28 + $0x80] sm:$0xff]  }
 0xdd1   : > { %6960 = vmatprep.subr.bf16.mxu1 %v7584_v2 }
 0xdd3   : > { %6897 = vmatpush3.bf16.msra.mxu0 %v8457_v56 }
 0xdd4   : > { %6902 = vmatprep.subr.bf16.mxu0 %v7584_v2 }
 0xdd6   : > { %6899 = vmatmul.mubr.bf16.vlgmr.msra.gmra.mrb[72].mxu0 %v3399_v13 }
 0xdd7   : > { %6903 = vmatpush3.bf16.msra.mxu0 %v3410_v15  ;;  %6904 = vmatprep.mubr.msk.bf16.mxu0 %vm7585_vm0, %v7584_v2 }
 0xdd8   : > { %6908 = vmatprep.subr.bf16.mxu0 %v7584_v2 }
 0xdde   : > { %6905 = vmatmul.mubr.msk.bf16.vlgmr.msra.gmra.mrb[68].mxu0 %vm1804_vm4, %v3537_v16  ;;  %v7525_v16 = vld [vmem:[%s8864_s28 + $0x90] sm:$0xff]  }
 0xddf   : > { %6910 = vmatprep.mubr.msk.bf16.mxu0 %vm7585_vm0, %v7584_v2 }
 0xe85   : > { %v3486_v58 = vpop.f32.mrb[68].mxu1 }
 0xe86   : > { %v3536_v43 = vpack.c.bf16 %v3486_v58, %v3486_v58  ;;  %v6880_v45 = vpop.f32.mrb[69].mxu1  ;;  %v7526_v58 = vld [vmem:[%s8864_s28 + $0x98] sm:$0xff]  }
 0xe87   : > { %v3489_v47 = vpop.f32.mrb[70].mxu1  ;;  %v7529_v45 = vld [vmem:[%s8864_s28 + $0xb0] sm:$0xff]  }
 0xe88   : > { %v3585_v63 = vsel %vm1808_vm3, %v3536_v43, 0  ;;  %v6881_v0 = vpop.f32.mrb[71].mxu1  ;;  %v7528_v43 = vld [vmem:[%s8864_s28 + $0xa8] sm:$0xff]   ;;  %v7530_v47 = vld [vmem:[%s8864_s28 + $0xb8] sm:$0xff]  }
 0xe89   : > { %6909 = vmatpush3.bf16.msra.mxu0 %v3585_v63 }
 0xe8a   : > { %6914 = vmatprep.subr.bf16.mxu0 %v7584_v2 }
 0xe8c   : > { %6911 = vmatmul.mubr.msk.bf16.vlgmr.msra.gmra.mrb[68].mxu0 %vm1804_vm4, %v3535_v28 }
 0xe8d   : > { %6916 = vmatprep.mubr.msk.bf16.mxu0 %vm7585_vm0, %v7584_v2 }
 0xea9   : > { %v3526_v37 = vpop.f32.mrb[72].mxu0 }
 0xeaa   : > { %v3628_v38 = vpack.c.bf16 %v3526_v37, %v3526_v37  ;;  %v6900_v30 = vpop.f32.mrb[73].mxu0 }
 0xeab   : > { %v3529_v31 = vpop.f32.mrb[74].mxu0 }
 0xeac   : > { %v3633_v32 = vsel %vm1808_vm3, %v3628_v38, 0  ;;  %v6901_v39 = vpop.f32.mrb[75].mxu0 }
 0xead   : > { %6915 = vmatpush3.bf16.msra.mxu0 %v3633_v32  ;;  %v3905_v32 = vpack.c.bf16 %v3687_v29, %v3687_v29  ;;  %v7531_v39 = vld [vmem:[%s7614_s21] sm:$0xff]   ;;  %v7427_v29 = vld [vmem:[%s8880_s0 + $0x30] sm:$0xff]  }
 0xeae   : > { %6940 = vmatprep.subr.bf16.mxu0 %v7584_v2 }
 0xeb0   : > { %6917 = vmatmul.mubr.msk.bf16.vlgmr.msra.gmra.mrb[68].mxu0 %vm1804_vm4, %v3627_v33  ;;  %v7532_v33 = vld [vmem:[%s7614_s21 + $0x8] sm:$0xff]  }
 0xeb1   : > { %6941 = vmatpush3.bf16.msra.mxu0 %v7515_v1  ;;  %6956 = vmatprep.mubr.msk.bf16.mxu0 %vm7585_vm0, %v7584_v2  ;;  %v7533_v1 = vld [vmem:[%s7614_s21 + $0x10] sm:$0xff]  }
 0xeb2   : > { %6942 = vmatprep.subr.bf16.mxu0 %v7584_v2 }
 0xeb5   : > { %6943 = vmatpush3.bf16.msra.mxu0 %v7516_v3  ;;  %v7534_v3 = vld [vmem:[%s7614_s21 + $0x18] sm:$0xff]  }
 0xeb6   : > { %6944 = vmatprep.subr.bf16.mxu0 %v7584_v2 }
 0xeb9   : > { %6945 = vmatpush3.bf16.msra.mxu0 %v7517_v6  ;;  %v7535_v6 = vld [vmem:[%s7614_s21 + $0x20] sm:$0xff]  }
 0xeba   : > { %6946 = vmatprep.subr.bf16.mxu0 %v7584_v2 }
 0xebd   : > { %6947 = vmatpush3.bf16.msra.mxu0 %v7518_v34  ;;  %v7536_v34 = vld [vmem:[%s7614_s21 + $0x28] sm:$0xff]  }
 0xebe   : > { %6948 = vmatprep.subr.bf16.mxu0 %v7584_v2 }
 0xec1   : > { %6949 = vmatpush3.bf16.msra.mxu0 %v7519_v8 }
 0xec2   : > { %6950 = vmatprep.subr.bf16.mxu0 %v7584_v2 }
 0xec5   : > { %6951 = vmatpush3.bf16.msra.mxu0 %v7520_v9 }
 0xec6   : > { %6952 = vmatprep.subr.bf16.mxu0 %v7584_v2 }
 0xec9   : > { %6953 = vmatpush3.bf16.msra.mxu0 %v7521_v25 }
 0xeca   : > { %6954 = vmatprep.subr.bf16.mxu0 %v7584_v2 }
 0xecd   : > { %6955 = vmatpush3.bf16.msra.mxu0 %v7522_v26  ;;  %v3958_v26 = vpop.permute.xlu0 %3957 }
 0xece   : > { %6992 = vmatprep.subr.bf16.mxu0 %v7584_v2 }
 0xf83   : > { %v3669_v27 = vpop.f32.mrb[68].mxu0 }
 0xf84   : > { %v7286_v49 = vadd.f32 %v3669_v27, %v3404_v35  ;;  %v6918_v36 = vpop.f32.mrb[69].mxu0 }
 0xf85   : > { %v3672_v23 = vpop.f32.mrb[70].mxu0 }
 0xf86   : > { %v7287_v14 = vadd.f32 %v7286_v49, %v3680_v21  ;;  %v6919_v52 = vpop.f32.mrb[71].mxu0  ;;  %v4044_v21 = vld [vmem:[%s8879_s2 + $0x8] sm:$0xff] }
 0xf87   : > { %v4048_v23 = vpack.c.bf16 %v4044_v21, %v4044_v21 }
 0xf88   : > { %v3684_v7 = vmax.f32 %v7287_v14, 0.0 }
 0xf8a   : > { %v3688_v10 = vpack.c.bf16 %v3684_v7, %v3684_v7  ;;  %v4043_v7 = vld [vmem:[%s8879_s2] sm:$0xff] }
 0xf8c   : > { %6937 = vmatmul.mubr.bf16.vlgmr.msra.gmra.mrb[72].mxu1 %v3688_v10  ;;  %6957 = vmatmul.mubr.bf16.vlgmr.msra.gmra.mrb[76].mxu0 %v3688_v10 }
 0xf8d   : > { %6962 = vmatprep.mubr.msk.bf16.mxu1 %vm7585_vm0, %v7584_v2  ;;  %6994 = vmatprep.mubr.msk.bf16.mxu0 %vm7585_vm0, %v7584_v2 }
0x105f   : > { %v3723_v18 = vpop.f32.mrb[72].mxu1  ;;  %v3765_v59 = vpop.f32.mrb[76].mxu0 }
0x1060   : > { %v3772_v5 = vpack.c.bf16 %v3765_v59, %v3765_v59  ;;  %v6938_v61 = vpop.f32.mrb[73].mxu1  ;;  %v6958_v11 = vpop.f32.mrb[77].mxu0  ;;  %v3730_v17 = vpack.c.bf16 %v3723_v18, %v3723_v18 }
0x1061   : > { %v3726_v13 = vpop.f32.mrb[74].mxu1  ;;  %v3768_v15 = vpop.f32.mrb[78].mxu0 }
0x1062   : > { %v3777_v19 = vsel %vm1808_vm3, %v3772_v5, 0  ;;  %v6939_v62 = vpop.f32.mrb[75].mxu1  ;;  %v6959_v44 = vpop.f32.mrb[79].mxu0  ;;  %v3823_v24 = vsel %vm1808_vm3, %v3730_v17, 0 }
0x1063   : > { %6961 = vmatpush3.bf16.msra.mxu1 %v3777_v19  ;;  %v4046_v62 = vpack.c.bf16 %v4043_v7, %v4043_v7  ;;  %v4337_v7 = vpop.permute.xlu1 %4336 }
0x1064   : > { %6966 = vmatprep.subr.bf16.mxu1 %v7584_v2 }
0x1066   : > { %6963 = vmatmul.mubr.msk.bf16.vlgmr.msra.gmra.mrb[76].mxu1 %vm1804_vm4, %v3771_v41  ;;  %v4198_v41 = vld [vmem:[%s7774_s27 + $0x8] sm:$0xff] }
0x1067   : > { %6967 = vmatpush3.bf16.msra.mxu1 %v3823_v24  ;;  %6968 = vmatprep.mubr.msk.bf16.mxu1 %vm7585_vm0, %v7584_v2  ;;  %v4197_v24 = vld [vmem:[%s7774_s27] sm:$0xff] }
0x1068   : > { %6972 = vmatprep.subr.bf16.mxu1 %v7584_v2 }
0x106e   : > { %6969 = vmatmul.mubr.msk.bf16.vlgmr.msra.gmra.mrb[80].mxu1 %vm1804_vm4, %v3729_v50 }
0x106f   : > { %6973 = vmatpush3.bf16.msra.mxu1 %v7523_v55  ;;  %6988 = vmatprep.mubr.msk.bf16.mxu1 %vm7585_vm0, %v7584_v2 }
0x1070   : > { %6974 = vmatprep.subr.bf16.mxu1 %v7584_v2 }
0x1073   : > { %6975 = vmatpush3.bf16.msra.mxu1 %v7524_v57  ;;  %v4201_v57 = vpack.c.bf16 %v4198_v41, %v4198_v41 }
0x1074   : > { %6976 = vmatprep.subr.bf16.mxu1 %v7584_v2 }
0x1077   : > { %6977 = vmatpush3.bf16.msra.mxu1 %v7525_v16  ;;  %v4200_v16 = vpack.c.bf16 %v4197_v24, %v4197_v24 }
0x1078   : > { %6978 = vmatprep.subr.bf16.mxu1 %v7584_v2 }
0x107b   : > { %6979 = vmatpush3.bf16.msra.mxu1 %v7526_v58 }
0x107c   : > { %6980 = vmatprep.subr.bf16.mxu1 %v7584_v2 }
0x107f   : > { %6981 = vmatpush3.bf16.msra.mxu1 %v7527_v4  ;;  %v4199_v4 = vld [vmem:[%s7774_s27 + $0x10] sm:$0xff] }
0x1080   : > { %6982 = vmatprep.subr.bf16.mxu1 %v7584_v2 }
0x1083   : > { %6983 = vmatpush3.bf16.msra.mxu1 %v7528_v43  ;;  %v4288_v43 = vpack.c.bf16 %v4199_v4, %v4199_v4 }
0x1084   : > { %6984 = vmatprep.subr.bf16.mxu1 %v7584_v2 }
0x1087   : > { %6985 = vmatpush3.bf16.msra.mxu1 %v7529_v45  ;;  %v7415_v45 = vld [vmem:[%s8880_s0] sm:$0xff]  }
0x1088   : > { %6986 = vmatprep.subr.bf16.mxu1 %v7584_v2 }
0x108b   : > { %6987 = vmatpush3.bf16.msra.mxu1 %v7530_v47  ;;  %v7416_v47 = vld [vmem:[%s8880_s0 + $0x40] sm:$0xff]  }
0x108c   : > { %7018 = vmatprep.subr.bf16.mxu1 %v7584_v2 }
0x108e   : > { %6989 = vmatmul.mubr.bf16.vlgmr.msra.gmra.mrb[84].mxu1 %v3688_v10  ;;  %v4045_v10 = vld [vmem:[%s8879_s2 + $0x10] sm:$0xff] }
0x108f   : > { %7019 = vmatpush3.bf16.msra.mxu1 %v8406_v12  ;;  %7034 = vmatprep.mubr.msk.bf16.mxu1 %vm7585_vm0, %v7584_v2  ;;  %v4141_v44 = vpack.c.bf16 %v4045_v10, %v4045_v10 }
0x1090   : > { %7020 = vmatprep.subr.bf16.mxu1 %v7584_v2 }
0x1093   : > { %7021 = vmatpush3.bf16.msra.mxu1 %v8415_v40 }
0x1094   : > { %7022 = vmatprep.subr.bf16.mxu1 %v7584_v2 }
0x1097   : > { %7023 = vmatpush3.bf16.msra.mxu1 %v8422_v20 }
0x1098   : > { %7024 = vmatprep.subr.bf16.mxu1 %v7584_v2 }
0x109b   : > { %7025 = vmatpush3.bf16.msra.mxu1 %v8429_v22 }
0x109c   : > { %7026 = vmatprep.subr.bf16.mxu1 %v7584_v2 }
0x109f   : > { %7027 = vmatpush3.bf16.msra.mxu1 %v8436_v42 }
0x10a0   : > { %7028 = vmatprep.subr.bf16.mxu1 %v7584_v2 }
0x10a3   : > { %7029 = vmatpush3.bf16.msra.mxu1 %v8443_v48 }
0x10a4   : > { %7030 = vmatprep.subr.bf16.mxu1 %v7584_v2 }
0x10a7   : > { %7031 = vmatpush3.bf16.msra.mxu1 %v8450_v54 }
0x10a8   : > { %7032 = vmatprep.subr.bf16.mxu1 %v7584_v2 }
0x10ab   : > { %7033 = vmatpush3.bf16.msra.mxu1 %v8457_v56 }
0x10ac   : > { %7050 = vmatprep.subr.bf16.mxu1 %v7584_v2 }
0x1139   : > { %v3813_v12 = vpop.f32.mrb[76].mxu1 }
0x113a   : > { %v6964_v40 = vpop.f32.mrb[77].mxu1 }
0x113b   : > { %v3816_v20 = vpop.f32.mrb[78].mxu1  ;;  %v7418_v40 = vld [vmem:[%s8880_s0 + $0x48] sm:$0xff]  }
0x113c   : > { %v6965_v22 = vpop.f32.mrb[79].mxu1  ;;  %v7419_v20 = vld [vmem:[%s8880_s0 + $0x10] sm:$0xff]  }
0x113d   : > { %v7420_v22 = vld [vmem:[%s8880_s0 + $0x50] sm:$0xff]  }
0x1141   : > { %v3859_v42 = vpop.f32.mrb[80].mxu1 }
0x1142   : > { %v3860_v63 = vadd.f32 %v3859_v42, %v3813_v12  ;;  %v6970_v0 = vpop.f32.mrb[81].mxu1  ;;  %v7417_v12 = vld [vmem:[%s8880_s0 + $0x8] sm:$0xff]   ;;  %v7421_v42 = vld [vmem:[%s8880_s0 + $0x18] sm:$0xff]  }
0x1143   : > { %v3862_v48 = vpop.f32.mrb[82].mxu1  ;;  %v7423_v0 = vld [vmem:[%s8880_s0 + $0x20] sm:$0xff]  }
0x1144   : > { %v6971_v28 = vpop.f32.mrb[83].mxu1  ;;  %v7424_v48 = vld [vmem:[%s8880_s0 + $0x60] sm:$0xff]  }
0x1145   : > { %v7425_v28 = vld [vmem:[%s8880_s0 + $0x28] sm:$0xff]  }
0x1161   : > { %v3899_v37 = vpop.f32.mrb[84].mxu1 }
0x1162   : > { %v3906_v54 = vpack.c.bf16 %v3899_v37, %v3899_v37  ;;  %v6990_v38 = vpop.f32.mrb[85].mxu1  ;;  %v7426_v37 = vld [vmem:[%s8880_s0 + $0x68] sm:$0xff]  }
0x1163   : > { %v3902_v30 = vpop.f32.mrb[86].mxu1  ;;  %v7429_v38 = vld [vmem:[%s8880_s0 + $0x38] sm:$0xff]  }
0x1164   : > { %v3911_v56 = vsel %vm1808_vm3, %v3906_v54, 0  ;;  %v6991_v31 = vpop.f32.mrb[87].mxu1  ;;  %v7428_v54 = vld [vmem:[%s8880_s0 + $0x70] sm:$0xff]   ;;  %v7430_v30 = vld [vmem:[%s8880_s0 + $0x78] sm:$0xff]  }
0x1165   : > { %6993 = vmatpush3.bf16.msra.mxu0 %v3911_v56 }
0x1166   : > { %6998 = vmatprep.subr.bf16.mxu0 %v7584_v2 }
0x1168   : > { %6995 = vmatmul.mubr.msk.bf16.vlgmr.msra.gmra.mrb[80].mxu0 %vm1804_vm4, %v3905_v32 }
0x1169   : > { %6999 = vmatpush3.bf16.msra.mxu0 %v7531_v39  ;;  %7014 = vmatprep.mubr.msk.bf16.mxu0 %vm7585_vm0, %v7584_v2 }
0x116a   : > { %7000 = vmatprep.subr.bf16.mxu0 %v7584_v2 }
0x116d   : > { %7001 = vmatpush3.bf16.msra.mxu0 %v7532_v33 }
0x116e   : > { %7002 = vmatprep.subr.bf16.mxu0 %v7584_v2 }
0x1171   : > { %7003 = vmatpush3.bf16.msra.mxu0 %v7533_v1 }
0x1172   : > { %7004 = vmatprep.subr.bf16.mxu0 %v7584_v2 }
0x1175   : > { %7005 = vmatpush3.bf16.msra.mxu0 %v7534_v3 }
0x1176   : > { %7006 = vmatprep.subr.bf16.mxu0 %v7584_v2 }
0x1179   : > { %7007 = vmatpush3.bf16.msra.mxu0 %v7535_v6 }
0x117a   : > { %7008 = vmatprep.subr.bf16.mxu0 %v7584_v2 }
0x117d   : > { %7009 = vmatpush3.bf16.msra.mxu0 %v7536_v34 }
0x117e   : > { %7010 = vmatprep.subr.bf16.mxu0 %v7584_v2 }
0x1181   : > { %7011 = vmatpush3.bf16.msra.mxu0 %v8330_v51 }
0x1182   : > { %7012 = vmatprep.subr.bf16.mxu0 %v7584_v2 }
0x1185   : > { %7013 = vmatpush3.bf16.msra.mxu0 %v8335_v53 }
0x1186   : > { %7038 = vmatprep.subr.bf16.mxu0 %v7584_v2 }
0x123b   : > { %v3947_v8 = vpop.f32.mrb[80].mxu0 }
0x123c   : > { %v3953_v9 = vadd.f32 %v3947_v8, %v3860_v63  ;;  %v6996_v25 = vpop.f32.mrb[81].mxu0  ;;  %v7422_v63 = vld [vmem:[%s8880_s0 + $0x58] sm:$0xff]  }
0x123d   : > { %v3950_v35 = vpop.f32.mrb[82].mxu0 }
0x123e   : > { %v3960_v27 = vadd.f32 %v3958_v26, %v3953_v9  ;;  %v6997_v49 = vpop.f32.mrb[83].mxu0 }
0x1240   : > { %v8568_v36 = vmax.f32 %v3960_v27, 0.0 }
0x1242   : > { %v3962_v51 = vpack.c.bf16 %v8568_v36, %v8568_v36 }
0x1244   : > { %7015 = vmatmul.mubr.bf16.vlgmr.msra.gmra.mrb[84].mxu0 %v3962_v51  ;;  %7035 = vmatmul.mubr.bf16.vlgmr.msra.gmra.mrb[88].mxu1 %v3962_v51  ;;  %v4053_v53 = vsel %vm1808_vm3, %v3962_v51, 0 }
0x1245   : > { %7039 = vmatpush3.bf16.msra.mxu0 %v4053_v53  ;;  %7040 = vmatprep.mubr.msk.bf16.mxu0 %vm7585_vm0, %v7584_v2 }
0x1246   : > { %7044 = vmatprep.subr.bf16.mxu0 %v7584_v2  ;;  %7052 = vmatprep.mubr.msk.bf16.mxu1 %vm7585_vm0, %v7584_v2 }
0x124c   : > { %7041 = vmatmul.mubr.msk.bf16.vlgmr.msra.gmra.mrb[88].mxu0 %vm1804_vm4, %v4048_v23 }
0x124d   : > { %7046 = vmatprep.mubr.msk.bf16.mxu0 %vm7585_vm0, %v7584_v2 }
0x1317   : > { %v3997_v14 = vpop.f32.mrb[84].mxu0  ;;  %v4037_v52 = vpop.f32.mrb[88].mxu1 }
0x1318   : > { %v4047_v18 = vpack.c.bf16 %v3997_v14, %v3997_v14  ;;  %v4142_v59 = vpack.c.bf16 %v4037_v52, %v4037_v52  ;;  %v7016_v60 = vpop.f32.mrb[85].mxu0  ;;  %v7036_v5 = vpop.f32.mrb[89].mxu1 }
0x1319   : > { %v4000_v61 = vpop.f32.mrb[86].mxu0  ;;  %v4040_v11 = vpop.f32.mrb[90].mxu1 }
0x131a   : > { %v4099_v13 = vsel %vm1808_vm3, %v4047_v18, 0  ;;  %v4147_v15 = vsel %vm1808_vm3, %v4142_v59, 0  ;;  %v7017_v17 = vpop.f32.mrb[87].mxu0  ;;  %v7037_v19 = vpop.f32.mrb[91].mxu1 }
0x131b   : > { %7045 = vmatpush3.bf16.msra.mxu0 %v4099_v13  ;;  %7051 = vmatpush3.bf16.msra.mxu1 %v4147_v15  ;;  %v4194_v11 = vpop.permute.xlu0 %4193 }
0x131c   : > { %7056 = vmatprep.subr.bf16.mxu0 %v7584_v2  ;;  %7062 = vmatprep.subr.bf16.mxu1 %v7584_v2 }
0x131e   : > { %7047 = vmatmul.mubr.msk.bf16.vlgmr.msra.gmra.mrb[92].mxu0 %vm1804_vm4, %v4046_v62  ;;  %7053 = vmatmul.mubr.msk.bf16.vlgmr.msra.gmra.mrb[92].mxu1 %vm1804_vm4, %v4141_v44  ;;  %v5897_v44 = vld [vmem:[%s8881_s1 + $0x18] sm:$0xf] }
0x131f   : > { %7057 = vmatpush3.bf16.msra.mxu0 %v4053_v53  ;;  %7063 = vmatpush3.bf16.msra.mxu1 %v4099_v13  ;;  %v8592_v46 = vpop.f32.mrb[88].mxu0 }
0x1320   : > { %7058 = vmatprep.mubr.msk.bf16.mxu0 %vm7585_vm0, %v7584_v2  ;;  %7068 = vmatprep.subr.bf16.mxu0 %v7584_v2  ;;  %v7042_v50 = vpop.f32.mrb[89].mxu0 }
0x1321   : > { %7064 = vmatprep.mubr.msk.bf16.mxu1 %vm7585_vm0, %v7584_v2  ;;  %v4092_v55 = vpop.f32.mrb[90].mxu0  ;;  %7074 = vmatprep.subr.bf16.mxu1 %v7584_v2  ;;  %v4453_v50 = vld [vmem:[%s8881_s1] sm:$0xff] }
0x1322   : > { %v7043_v58 = vpop.f32.mrb[91].mxu0 }
0x1326   : > { %7059 = vmatmul.mubr.msk.bf16.vlgmr.msra.gmra.mrb[96].mxu0 %vm1804_vm4, %v4201_v57  ;;  %7065 = vmatmul.mubr.msk.bf16.vlgmr.msra.gmra.mrb[96].mxu1 %vm1804_vm4, %v4200_v16 }
0x1327   : > { %7069 = vmatpush3.bf16.msra.mxu0 %v4147_v15  ;;  %7070 = vmatprep.mubr.msk.bf16.mxu0 %vm7585_vm0, %v7584_v2 }
0x1328   : > { %7094 = vmatprep.subr.bf16.mxu0 %v7584_v2  ;;  %7090 = vmatprep.mubr.msk.bf16.mxu1 %vm7585_vm0, %v7584_v2 }
0x1329   : > { %7075 = vmatpush3.bf16.msra.mxu1 %v7415_v45 }
0x132a   : > { %7076 = vmatprep.subr.bf16.mxu1 %v7584_v2 }
0x132d   : > { %7077 = vmatpush3.bf16.msra.mxu1 %v7417_v12 }
0x132e   : > { %7071 = vmatmul.mubr.msk.bf16.vlgmr.msra.gmra.mrb[100].mxu0 %vm1804_vm4, %v4288_v43  ;;  %7078 = vmatprep.subr.bf16.mxu1 %v7584_v2 }
0x132f   : > { %7110 = vmatprep.mubr.msk.bf16.mxu0 %vm7585_vm0, %v7584_v2  ;;  %7095 = vmatpush3.bf16.msra.mxu0 %v7416_v47 }
0x1330   : > { %7096 = vmatprep.subr.bf16.mxu0 %v7584_v2 }
0x1331   : > { %7079 = vmatpush3.bf16.msra.mxu1 %v7419_v20 }
0x1332   : > { %7080 = vmatprep.subr.bf16.mxu1 %v7584_v2 }
0x1333   : > { %7097 = vmatpush3.bf16.msra.mxu0 %v7418_v40 }
0x1334   : > { %7098 = vmatprep.subr.bf16.mxu0 %v7584_v2 }
0x1335   : > { %7081 = vmatpush3.bf16.msra.mxu1 %v7421_v42  ;;  %v7431_v42 = vld [vmem:[%s8880_s0 + $0x80] sm:$0xff]  }
0x1336   : > { %7082 = vmatprep.subr.bf16.mxu1 %v7584_v2 }
0x1337   : > { %7099 = vmatpush3.bf16.msra.mxu0 %v7420_v22 }
0x1338   : > { %7100 = vmatprep.subr.bf16.mxu0 %v7584_v2 }
0x1339   : > { %7083 = vmatpush3.bf16.msra.mxu1 %v7423_v0  ;;  %v7433_v0 = vld [vmem:[%s8880_s0 + $0x90] sm:$0xff]  }
0x133a   : > { %7084 = vmatprep.subr.bf16.mxu1 %v7584_v2 }
0x133b   : > { %7101 = vmatpush3.bf16.msra.mxu0 %v7422_v63  ;;  %v7432_v63 = vld [vmem:[%s8880_s0 + $0x88] sm:$0xff]  }
0x133c   : > { %7102 = vmatprep.subr.bf16.mxu0 %v7584_v2 }
0x133d   : > { %7085 = vmatpush3.bf16.msra.mxu1 %v7425_v28  ;;  %v7435_v28 = vld [vmem:[%s8880_s0 + $0xa0] sm:$0xff]  }
0x133e   : > { %7086 = vmatprep.subr.bf16.mxu1 %v7584_v2 }
0x133f   : > { %7103 = vmatpush3.bf16.msra.mxu0 %v7424_v48  ;;  %v7434_v48 = vld [vmem:[%s8880_s0 + $0x98] sm:$0xff]  }
0x1340   : > { %7104 = vmatprep.subr.bf16.mxu0 %v7584_v2 }
0x1341   : > { %7087 = vmatpush3.bf16.msra.mxu1 %v7427_v29  ;;  %v7437_v29 = vld [vmem:[%s8880_s0 + $0xb0] sm:$0xff]  }
0x1342   : > { %7088 = vmatprep.subr.bf16.mxu1 %v7584_v2 }
0x1343   : > { %7105 = vmatpush3.bf16.msra.mxu0 %v7426_v37  ;;  %v7436_v37 = vld [vmem:[%s8880_s0 + $0xa8] sm:$0xff]  }
0x1344   : > { %7106 = vmatprep.subr.bf16.mxu0 %v7584_v2 }
0x1345   : > { %7089 = vmatpush3.bf16.msra.mxu1 %v7429_v38 }
0x1346   : > { %7114 = vmatprep.subr.bf16.mxu1 %v7584_v2 }
0x1347   : > { %7107 = vmatpush3.bf16.msra.mxu0 %v7428_v54  ;;  %v7438_v54 = vld [vmem:[%s8880_s0 + $0xb8] sm:$0xff]  }
0x1348   : > { %7108 = vmatprep.subr.bf16.mxu0 %v7584_v2 }
0x134b   : > { %7109 = vmatpush3.bf16.msra.mxu0 %v7430_v30 }
0x134c   : > { %7120 = vmatprep.subr.bf16.mxu0 %v7584_v2 }
0x13f1   : > { %v4135_v56 = vpop.f32.mrb[92].mxu0  ;;  %v4183_v31 = vpop.f32.mrb[92].mxu1 }
0x13f2   : > { %v4136_v32 = vadd.f32 %v4135_v56, %v8592_v46  ;;  %v7048_v39 = vpop.f32.mrb[93].mxu0  ;;  %v7054_v33 = vpop.f32.mrb[93].mxu1  ;;  %v5896_v46 = vld [vmem:[%s8881_s1 + $0x10] sm:$0xff] }
0x13f3   : > { %v4138_v1 = vpop.f32.mrb[94].mxu0  ;;  %v4186_v3 = vpop.f32.mrb[94].mxu1  ;;  %v4565_v20 = vpack.c.bf16 %v5897_v44, %v5896_v46 }
0x13f4   : > { %v4189_v6 = vadd.f32 %v4183_v31, %v4136_v32  ;;  %v7049_v34 = vpop.f32.mrb[95].mxu0  ;;  %v7055_v8 = vpop.f32.mrb[95].mxu1 }
0x13f5   : > { %v5924_v8 = vld [vmem:[%s8881_s1 + $0x20] sm:$0xff] }
0x13f6   : > { %v4196_v13 = vadd.f32 %v4194_v11, %v4189_v6 }
0x13f8   : > { %v4340_v15 = vadd.f32 %v4196_v13, %v8568_v36  ;;  %v4454_v36 = vld [vmem:[%s8881_s1 + $0x8] sm:$0xf] }
0x13f9   : > { %v4239_v9 = vpop.f32.mrb[96].mxu0  ;;  %v4282_v25 = vpop.f32.mrb[96].mxu1  ;;  %v4455_v22 = vpack.c.bf16 %v4454_v36, %v4453_v50 }
0x13fa   : > { %v7060_v26 = vpop.f32.mrb[97].mxu0  ;;  %v4283_v35 = vadd.f32 %v4282_v25, %v4239_v9  ;;  %v7066_v27 = vpop.f32.mrb[97].mxu1  ;;  %v5925_v9 = vld [vmem:[%s8881_s1 + $0x28] sm:$0xf] }
0x13fb   : > { %v4242_v49 = vpop.f32.mrb[98].mxu0  ;;  %v4285_v51 = vpop.f32.mrb[98].mxu1 }
0x13fc   : > { %v7061_v53 = vpop.f32.mrb[99].mxu0  ;;  %v7067_v21 = vpop.f32.mrb[99].mxu1  ;;  %v4769_v51 = vpack.c.bf16 %v5925_v9, %v5924_v8 }
0x13fd   : > { %v7439_v53 = vld [vmem:[%s8880_s0 + $0xc0] sm:$0xff]   ;;  %v7440_v21 = vld [vmem:[%s8880_s0 + $0xc8] sm:$0xff]  }
0x1401   : > { %v4326_v23 = vpop.f32.mrb[100].mxu0 }
0x1402   : > { %v4332_v14 = vadd.f32 %v4326_v23, %v4283_v35  ;;  %v7072_v52 = vpop.f32.mrb[101].mxu0  ;;  %v7441_v23 = vld [vmem:[%s8880_s0 + $0xd0] sm:$0xff]  }
0x1403   : > { %v4329_v10 = vpop.f32.mrb[102].mxu0  ;;  %v7443_v52 = vld [vmem:[%s8880_s0 + $0xe0] sm:$0xff]  }
0x1404   : > { %v4339_v18 = vadd.f32 %v4337_v7, %v4332_v14  ;;  %v7073_v59 = vpop.f32.mrb[103].mxu0  ;;  %v7442_v14 = vld [vmem:[%s8880_s0 + $0xd8] sm:$0xff]   ;;  %v7444_v7 = vld [vmem:[%s8880_s0 + $0xe8] sm:$0xff]   ;;  %v7445_v10 = vld [vmem:[%s8880_s0 + $0xf0] sm:$0xff]  }
0x1406   : > { %v5863_v60 = vmul.f32 -1.442695, %v4339_v18  ;;  %v7446_v18 = vld [vmem:[%s8880_s0 + $0xf8] sm:$0xff]  }
0x1408   : > { %7487 = vpow2.f32 %v5863_v60 }
0x1412   : > { %v7488_v5 = vpop.eup %7487 }
0x1413   : > { %v4344_v61 = vadd.f32 1.0, %v7488_v5 }
0x1415   : > { %7489 = vrcp.f32 %v4344_v61 }
0x141f   : > { %v7490_v17 = vpop.eup %7489 }
0x1420   : > { %v4347_v19 = vmul.f32 %v7490_v17, %v4340_v15  ;;  %v5951_v17 = vld [vmem:[%s8881_s1 + $0x30] sm:$0xff] }
0x1422   : > { %v8645_v62 = vpack.c.bf16 %v4347_v19, %v4347_v19  ;;  %v5952_v19 = vld [vmem:[%s8881_s1 + $0x38] sm:$0xf] }
0x1423   : > { %v4928_v36 = vpack.c.bf16 %v5952_v19, %v5951_v17 }
0x1424   : > { %7091 = vmatmul.mubr.bf16.vlgmr.msra.gmra.mrb[100].mxu1 %v8645_v62  ;;  %7111 = vmatmul.mubr.bf16.vlgmr.msra.gmra.mrb[104].mxu0 %v8645_v62 }
0x1425   : > { %7116 = vmatprep.mubr.msk.bf16.mxu1 %vm7585_vm0, %v7584_v2  ;;  %7122 = vmatprep.mubr.msk.bf16.mxu0 %vm7585_vm0, %v7584_v2 }
0x14f7   : > { %v4447_v41 = vpop.f32.mrb[100].mxu1  ;;  %v4556_v24 = vpop.f32.mrb[104].mxu0 }
0x14f8   : > { %v4456_v55 = vpack.c.bf16 %v4447_v41, %v4447_v41  ;;  %v4566_v57 = vpack.c.bf16 %v4556_v24, %v4556_v24  ;;  %v7092_v16 = vpop.f32.mrb[101].mxu1  ;;  %v7112_v58 = vpop.f32.mrb[105].mxu0 }
0x14f9   : > { %v4450_v4 = vpop.f32.mrb[102].mxu1  ;;  %v4559_v43 = vpop.f32.mrb[106].mxu0  ;;  %v7449_v16 = vld [vmem:[%s8880_s0 + $0x110] sm:$0xff]   ;;  %v7450_v58 = vld [vmem:[%s8880_s0 + $0x118] sm:$0xff]  }
0x14fa   : > { %v4618_v45 = vsel %vm1808_vm3, %v4456_v55, 0  ;;  %v4571_v47 = vsel %vm1808_vm3, %v4566_v57, 0  ;;  %v7093_v12 = vpop.f32.mrb[103].mxu1  ;;  %v7113_v40 = vpop.f32.mrb[107].mxu0  ;;  %v7447_v55 = vld [vmem:[%s8880_s0 + $0x100] sm:$0xff]   ;;  %v7448_v57 = vld [vmem:[%s8880_s0 + $0x108] sm:$0xff]  }
0x14fb   : > { %7115 = vmatpush3.bf16.msra.mxu1 %v4571_v47  ;;  %7121 = vmatpush3.bf16.msra.mxu0 %v4618_v45  ;;  %v7451_v4 = vld [vmem:[%s8880_s0 + $0x120] sm:$0xff]   ;;  %v7452_v43 = vld [vmem:[%s8880_s0 + $0x128] sm:$0xff]   ;;  %v7453_v45 = vld [vmem:[%s8880_s0 + $0x130] sm:$0xff]  }
0x14fc   : > { %7126 = vmatprep.subr.bf16.mxu1 %v7584_v2  ;;  %7146 = vmatprep.subr.bf16.mxu0 %v7584_v2  ;;  %v7454_v47 = vld [vmem:[%s8880_s0 + $0x138] sm:$0xff]  }
0x14fe   : > { %7117 = vmatmul.mubr.msk.bf16.vlgmr.msra.gmra.mrb[104].mxu1 %vm1804_vm4, %v4565_v20  ;;  %7123 = vmatmul.mubr.msk.bf16.vlgmr.msra.gmra.mrb[108].mxu0 %vm1804_vm4, %v4455_v22 }
0x14ff   : > { %7127 = vmatpush3.bf16.msra.mxu1 %v7431_v42  ;;  %7142 = vmatprep.mubr.msk.bf16.mxu1 %vm7585_vm0, %v7584_v2 }
0x1500   : > { %7128 = vmatprep.subr.bf16.mxu1 %v7584_v2  ;;  %7148 = vmatprep.mubr.msk.bf16.mxu0 %vm7585_vm0, %v7584_v2 }
0x1503   : > { %7129 = vmatpush3.bf16.msra.mxu1 %v7432_v63 }
0x1504   : > { %7130 = vmatprep.subr.bf16.mxu1 %v7584_v2 }
0x1507   : > { %7131 = vmatpush3.bf16.msra.mxu1 %v7433_v0 }
0x1508   : > { %7132 = vmatprep.subr.bf16.mxu1 %v7584_v2 }
0x150b   : > { %7133 = vmatpush3.bf16.msra.mxu1 %v7434_v48  ;;  %v5978_v48 = vld [vmem:[%s8881_s1 + $0x40] sm:$0xff] }
0x150c   : > { %7134 = vmatprep.subr.bf16.mxu1 %v7584_v2 }
0x150f   : > { %7135 = vmatpush3.bf16.msra.mxu1 %v7435_v28  ;;  %v5979_v28 = vld [vmem:[%s8881_s1 + $0x48] sm:$0xf] }
0x1510   : > { %7136 = vmatprep.subr.bf16.mxu1 %v7584_v2 }
0x1513   : > { %7137 = vmatpush3.bf16.msra.mxu1 %v7436_v37 }
0x1514   : > { %7138 = vmatprep.subr.bf16.mxu1 %v7584_v2 }
0x1517   : > { %7139 = vmatpush3.bf16.msra.mxu1 %v7437_v29 }
0x1518   : > { %7140 = vmatprep.subr.bf16.mxu1 %v7584_v2 }
0x151b   : > { %7141 = vmatpush3.bf16.msra.mxu1 %v7438_v54 }
0x151c   : > { %7172 = vmatprep.subr.bf16.mxu1 %v7584_v2 }
0x151e   : > { %7143 = vmatmul.mubr.bf16.vlgmr.msra.gmra.mrb[108].mxu1 %v8645_v62 }
0x151f   : > { %7174 = vmatprep.mubr.msk.bf16.mxu1 %vm7585_vm0, %v7584_v2 }
0x15d1   : > { %v4607_v38 = vpop.f32.mrb[104].mxu1  ;;  %v4654_v30 = vpop.f32.mrb[108].mxu0 }
0x15d2   : > { %v7118_v56 = vpop.f32.mrb[105].mxu1  ;;  %v4655_v31 = vadd.f32 %v4654_v30, %v4607_v38  ;;  %v7124_v32 = vpop.f32.mrb[109].mxu0 }
0x15d3   : > { %v4610_v39 = vpop.f32.mrb[106].mxu1  ;;  %v4657_v33 = vpop.f32.mrb[110].mxu0  ;;  %v5087_v56 = vpack.c.bf16 %v5979_v28, %v5978_v48  ;;  %v7456_v32 = vld [vmem:[%s8880_s0 + $0x148] sm:$0xff]  }
0x15d4   : > { %v7119_v1 = vpop.f32.mrb[107].mxu1  ;;  %v4658_v3 = vadd.f32 %v4657_v33, %v4610_v39  ;;  %v7125_v6 = vpop.f32.mrb[111].mxu0  ;;  %v7457_v39 = vld [vmem:[%s8880_s0 + $0x150] sm:$0xff]   ;;  %v7458_v33 = vld [vmem:[%s8880_s0 + $0x158] sm:$0xff]  }
0x15d5   : > { %v7459_v1 = vld [vmem:[%s8880_s0 + $0x160] sm:$0xff]   ;;  %v7461_v6 = vld [vmem:[%s8880_s0 + $0x170] sm:$0xff]  }
0x15f1   : > { %v4760_v34 = vpop.f32.mrb[108].mxu1 }
0x15f2   : > { %v4770_v25 = vpack.c.bf16 %v4760_v34, %v4760_v34  ;;  %v7144_v26 = vpop.f32.mrb[109].mxu1  ;;  %v7462_v34 = vld [vmem:[%s8880_s0 + $0x178] sm:$0xff]  }
0x15f3   : > { %v4763_v35 = vpop.f32.mrb[110].mxu1 }
0x15f4   : > { %v4775_v27 = vsel %vm1808_vm3, %v4770_v25, 0  ;;  %v7145_v49 = vpop.f32.mrb[111].mxu1 }
0x15f5   : > { %7147 = vmatpush3.bf16.msra.mxu0 %v4775_v27 }
0x15f6   : > { %7152 = vmatprep.subr.bf16.mxu0 %v7584_v2 }
0x15f8   : > { %7149 = vmatmul.mubr.msk.bf16.vlgmr.msra.gmra.mrb[112].mxu0 %vm1804_vm4, %v4769_v51  ;;  %v6005_v51 = vld [vmem:[%s8881_s1 + $0x50] sm:$0xff] }
0x15f9   : > { %7153 = vmatpush3.bf16.msra.mxu0 %v7439_v53  ;;  %7168 = vmatprep.mubr.msk.bf16.mxu0 %vm7585_vm0, %v7584_v2  ;;  %v6006_v53 = vld [vmem:[%s8881_s1 + $0x58] sm:$0xf] }
0x15fa   : > { %7154 = vmatprep.subr.bf16.mxu0 %v7584_v2 }
0x15fd   : > { %7155 = vmatpush3.bf16.msra.mxu0 %v7440_v21 }
0x15fe   : > { %7156 = vmatprep.subr.bf16.mxu0 %v7584_v2 }
0x1601   : > { %7157 = vmatpush3.bf16.msra.mxu0 %v7441_v23 }
0x1602   : > { %7158 = vmatprep.subr.bf16.mxu0 %v7584_v2 }
0x1605   : > { %7159 = vmatpush3.bf16.msra.mxu0 %v7442_v14 }
0x1606   : > { %7160 = vmatprep.subr.bf16.mxu0 %v7584_v2 }
0x1609   : > { %7161 = vmatpush3.bf16.msra.mxu0 %v7443_v52 }
0x160a   : > { %7162 = vmatprep.subr.bf16.mxu0 %v7584_v2 }
0x160d   : > { %7163 = vmatpush3.bf16.msra.mxu0 %v7444_v7 }
0x160e   : > { %7164 = vmatprep.subr.bf16.mxu0 %v7584_v2 }
0x1611   : > { %7165 = vmatpush3.bf16.msra.mxu0 %v7445_v10  ;;  %v5246_v10 = vpack.c.bf16 %v6006_v53, %v6005_v51 }
0x1612   : > { %7166 = vmatprep.subr.bf16.mxu0 %v7584_v2 }
0x1615   : > { %7167 = vmatpush3.bf16.msra.mxu0 %v7446_v18  ;;  %v7463_v18 = vld [vmem:[%s8880_s0 + $0x180] sm:$0xff]  }
0x1616   : > { %7198 = vmatprep.subr.bf16.mxu0 %v7584_v2 }
0x1618   : > { %7169 = vmatmul.mubr.bf16.vlgmr.msra.gmra.mrb[116].mxu0 %v8645_v62 }
0x1619   : > { %7200 = vmatprep.mubr.msk.bf16.mxu0 %vm7585_vm0, %v7584_v2 }
0x16cb   : > { %v4811_v59 = vpop.f32.mrb[112].mxu0 }
0x16cc   : > { %v4818_v60 = vadd.f32 %v4811_v59, %v4655_v31  ;;  %v7150_v5 = vpop.f32.mrb[113].mxu0  ;;  %v7455_v31 = vld [vmem:[%s8880_s0 + $0x140] sm:$0xff]   ;;  %v7464_v59 = vld [vmem:[%s8880_s0 + $0x188] sm:$0xff]  }
0x16cd   : > { %v4814_v61 = vpop.f32.mrb[114].mxu0  ;;  %v7466_v5 = vld [vmem:[%s8880_s0 + $0x198] sm:$0xff]  }
0x16ce   : > { %v4819_v11 = vadd.f32 %v4814_v61, %v4658_v3  ;;  %v7151_v13 = vpop.f32.mrb[115].mxu0  ;;  %v7460_v3 = vld [vmem:[%s8880_s0 + $0x168] sm:$0xff]   ;;  %v7467_v61 = vld [vmem:[%s8880_s0 + $0x1a0] sm:$0xff]  }
0x16cf   : > { %v7469_v13 = vld [vmem:[%s8880_s0 + $0x1b0] sm:$0xff]  }
0x16eb   : > { %v4919_v15 = vpop.f32.mrb[116].mxu0 }
0x16ec   : > { %v4929_v44 = vpack.c.bf16 %v4919_v15, %v4919_v15  ;;  %v7170_v41 = vpop.f32.mrb[117].mxu0  ;;  %v7470_v15 = vld [vmem:[%s8880_s0 + $0x1b8] sm:$0xff]  }
0x16ed   : > { %v4922_v24 = vpop.f32.mrb[118].mxu0 }
0x16ee   : > { %v4934_v46 = vsel %vm1808_vm3, %v4929_v44, 0  ;;  %v7171_v50 = vpop.f32.mrb[119].mxu0 }
0x16ef   : > { %7173 = vmatpush3.bf16.msra.mxu1 %v4934_v46 }
0x16f0   : > { %7178 = vmatprep.subr.bf16.mxu1 %v7584_v2 }
0x16f2   : > { %7175 = vmatmul.mubr.msk.bf16.vlgmr.msra.gmra.mrb[112].mxu1 %vm1804_vm4, %v4928_v36  ;;  %v6032_v36 = vld [vmem:[%s8881_s1 + $0x60] sm:$0xff] }
0x16f3   : > { %7179 = vmatpush3.bf16.msra.mxu1 %v7447_v55  ;;  %7194 = vmatprep.mubr.msk.bf16.mxu1 %vm7585_vm0, %v7584_v2  ;;  %v6033_v55 = vld [vmem:[%s8881_s1 + $0x68] sm:$0xf] }
0x16f4   : > { %7180 = vmatprep.subr.bf16.mxu1 %v7584_v2 }
0x16f7   : > { %7181 = vmatpush3.bf16.msra.mxu1 %v7448_v57 }
0x16f8   : > { %7182 = vmatprep.subr.bf16.mxu1 %v7584_v2 }
0x16fb   : > { %7183 = vmatpush3.bf16.msra.mxu1 %v7449_v16 }
0x16fc   : > { %7184 = vmatprep.subr.bf16.mxu1 %v7584_v2 }
0x16ff   : > { %7185 = vmatpush3.bf16.msra.mxu1 %v7450_v58 }
0x1700   : > { %7186 = vmatprep.subr.bf16.mxu1 %v7584_v2 }
0x1703   : > { %7187 = vmatpush3.bf16.msra.mxu1 %v7451_v4 }
0x1704   : > { %7188 = vmatprep.subr.bf16.mxu1 %v7584_v2 }
0x1707   : > { %7189 = vmatpush3.bf16.msra.mxu1 %v7452_v43 }
0x1708   : > { %7190 = vmatprep.subr.bf16.mxu1 %v7584_v2 }
0x170b   : > { %7191 = vmatpush3.bf16.msra.mxu1 %v7453_v45  ;;  %v5405_v45 = vpack.c.bf16 %v6033_v55, %v6032_v36 }
0x170c   : > { %7192 = vmatprep.subr.bf16.mxu1 %v7584_v2 }
0x170f   : > { %7193 = vmatpush3.bf16.msra.mxu1 %v7454_v47  ;;  %v7471_v47 = vld [vmem:[%s8880_s0 + $0x1c0] sm:$0xff]  }
0x1710   : > { %7224 = vmatprep.subr.bf16.mxu1 %v7584_v2 }
0x1712   : > { %7195 = vmatmul.mubr.bf16.vlgmr.msra.gmra.mrb[116].mxu1 %v8645_v62 }
0x1713   : > { %7226 = vmatprep.mubr.msk.bf16.mxu1 %vm7585_vm0, %v7584_v2 }
0x17c5   : > { %v4970_v12 = vpop.f32.mrb[112].mxu1 }
0x17c6   : > { %v4977_v40 = vadd.f32 %v4970_v12, %v4818_v60  ;;  %v7176_v20 = vpop.f32.mrb[113].mxu1  ;;  %v7465_v60 = vld [vmem:[%s8880_s0 + $0x190] sm:$0xff]   ;;  %v7472_v12 = vld [vmem:[%s8880_s0 + $0x1c8] sm:$0xff]  }
0x17c7   : > { %v4973_v22 = vpop.f32.mrb[114].mxu1  ;;  %v7474_v20 = vld [vmem:[%s8880_s0 + $0x1d8] sm:$0xff]  }
0x17c8   : > { %v4978_v42 = vadd.f32 %v4973_v22, %v4819_v11  ;;  %v7177_v63 = vpop.f32.mrb[115].mxu1  ;;  %v7468_v11 = vld [vmem:[%s8880_s0 + $0x1a8] sm:$0xff]   ;;  %v7475_v22 = vld [vmem:[%s8880_s0 + $0x1e0] sm:$0xff]  }
0x17c9   : > { %v7477_v63 = vld [vmem:[%s8880_s0 + $0x1f0] sm:$0xff]  }
0x17e5   : > { %v5078_v0 = vpop.f32.mrb[116].mxu1 }
0x17e6   : > { %v5088_v37 = vpack.c.bf16 %v5078_v0, %v5078_v0  ;;  %v7196_v29 = vpop.f32.mrb[117].mxu1  ;;  %v7478_v0 = vld [vmem:[%s8880_s0 + $0x1f8] sm:$0xff]  }
0x17e7   : > { %v5081_v54 = vpop.f32.mrb[118].mxu1 }
0x17e8   : > { %v5093_v38 = vsel %vm1808_vm3, %v5088_v37, 0  ;;  %v7197_v30 = vpop.f32.mrb[119].mxu1 }
0x17e9   : > { %7199 = vmatpush3.bf16.msra.mxu0 %v5093_v38 }
0x17ea   : > { %7204 = vmatprep.subr.bf16.mxu0 %v7584_v2 }
0x17ec   : > { %7201 = vmatmul.mubr.msk.bf16.vlgmr.msra.gmra.mrb[120].mxu0 %vm1804_vm4, %v5087_v56  ;;  %v6059_v56 = vld [vmem:[%s8881_s1 + $0x70] sm:$0xff] }
0x17ed   : > { %7205 = vmatpush3.bf16.msra.mxu0 %v7455_v31  ;;  %7220 = vmatprep.mubr.msk.bf16.mxu0 %vm7585_vm0, %v7584_v2  ;;  %v6060_v31 = vld [vmem:[%s8881_s1 + $0x78] sm:$0xf] }
0x17ee   : > { %7206 = vmatprep.subr.bf16.mxu0 %v7584_v2 }
0x17f1   : > { %7207 = vmatpush3.bf16.msra.mxu0 %v7456_v32 }
0x17f2   : > { %7208 = vmatprep.subr.bf16.mxu0 %v7584_v2 }
0x17f5   : > { %7209 = vmatpush3.bf16.msra.mxu0 %v7457_v39 }
0x17f6   : > { %7210 = vmatprep.subr.bf16.mxu0 %v7584_v2 }
0x17f9   : > { %7211 = vmatpush3.bf16.msra.mxu0 %v7458_v33 }
0x17fa   : > { %7212 = vmatprep.subr.bf16.mxu0 %v7584_v2 }
0x17fd   : > { %7213 = vmatpush3.bf16.msra.mxu0 %v7459_v1 }
0x17fe   : > { %7214 = vmatprep.subr.bf16.mxu0 %v7584_v2 }
0x1801   : > { %7215 = vmatpush3.bf16.msra.mxu0 %v7460_v3  ;;  %v5564_v3 = vpack.c.bf16 %v6060_v31, %v6059_v56 }
0x1802   : > { %7216 = vmatprep.subr.bf16.mxu0 %v7584_v2 }
0x1805   : > { %7217 = vmatpush3.bf16.msra.mxu0 %v7461_v6 }
0x1806   : > { %7218 = vmatprep.subr.bf16.mxu0 %v7584_v2 }
0x1809   : > { %7219 = vmatpush3.bf16.msra.mxu0 %v7462_v34 }
0x180a   : > { %7250 = vmatprep.subr.bf16.mxu0 %v7584_v2 }
0x180c   : > { %7221 = vmatmul.mubr.bf16.vlgmr.msra.gmra.mrb[124].mxu0 %v8645_v62 }
0x180d   : > { %7252 = vmatprep.mubr.msk.bf16.mxu0 %vm7585_vm0, %v7584_v2 }
0x18bf   : > { %v5129_v8 = vpop.f32.mrb[120].mxu0 }
0x18c0   : > { %v5136_v9 = vadd.f32 %v5129_v8, %v4977_v40  ;;  %v7202_v25 = vpop.f32.mrb[121].mxu0  ;;  %v7473_v40 = vld [vmem:[%s8880_s0 + $0x1d0] sm:$0xff]   ;;  %v5620_v8 = vpop.permute.xlu1 %5619 }
0x18c1   : > { %v5132_v26 = vpop.f32.mrb[122].mxu0 }
0x18c2   : > { %v5137_v35 = vadd.f32 %v5132_v26, %v4978_v42  ;;  %v7203_v27 = vpop.f32.mrb[123].mxu0  ;;  %v7476_v42 = vld [vmem:[%s8880_s0 + $0x1e8] sm:$0xff]   ;;  %s6064_s0 = sshll.u32 %s8883_s16, 4 }
0x18c3   : > { %s1151_s2 = scalar_lea.vmem %s7784_s29, %s6064_s0  ;;  %v5625_v27 = vpop.permute.xlu0 %5624 }
0x18df   : > { %v5237_v49 = vpop.f32.mrb[124].mxu0 }
0x18e0   : > { %v5247_v21 = vpack.c.bf16 %v5237_v49, %v5237_v49  ;;  %v7222_v23 = vpop.f32.mrb[125].mxu0 }
0x18e1   : > { %v5240_v14 = vpop.f32.mrb[126].mxu0 }
0x18e2   : > { %v5252_v52 = vsel %vm1808_vm3, %v5247_v21, 0  ;;  %v7223_v7 = vpop.f32.mrb[127].mxu0 }
0x18e3   : > { %7225 = vmatpush3.bf16.msra.mxu1 %v5252_v52 }
0x18e4   : > { %7230 = vmatprep.subr.bf16.mxu1 %v7584_v2 }
0x18e6   : > { %7227 = vmatmul.mubr.msk.bf16.vlgmr.msra.gmra.mrb[120].mxu1 %vm1804_vm4, %v5246_v10 }
0x18e7   : > { %7231 = vmatpush3.bf16.msra.mxu1 %v7463_v18  ;;  %7246 = vmatprep.mubr.msk.bf16.mxu1 %vm7585_vm0, %v7584_v2 }
0x18e8   : > { %7232 = vmatprep.subr.bf16.mxu1 %v7584_v2 }
0x18eb   : > { %7233 = vmatpush3.bf16.msra.mxu1 %v7464_v59 }
0x18ec   : > { %7234 = vmatprep.subr.bf16.mxu1 %v7584_v2 }
0x18ef   : > { %7235 = vmatpush3.bf16.msra.mxu1 %v7465_v60 }
0x18f0   : > { %7236 = vmatprep.subr.bf16.mxu1 %v7584_v2 }
0x18f3   : > { %7237 = vmatpush3.bf16.msra.mxu1 %v7466_v5 }
0x18f4   : > { %7238 = vmatprep.subr.bf16.mxu1 %v7584_v2 }
0x18f7   : > { %7239 = vmatpush3.bf16.msra.mxu1 %v7467_v61 }
0x18f8   : > { %7240 = vmatprep.subr.bf16.mxu1 %v7584_v2 }
0x18fb   : > { %7241 = vmatpush3.bf16.msra.mxu1 %v7468_v11 }
0x18fc   : > { %7242 = vmatprep.subr.bf16.mxu1 %v7584_v2 }
0x18ff   : > { %7243 = vmatpush3.bf16.msra.mxu1 %v7469_v13 }
0x1900   : > { %7244 = vmatprep.subr.bf16.mxu1 %v7584_v2 }
0x1903   : > { %7245 = vmatpush3.bf16.msra.mxu1 %v7470_v15 }
0x1904   : > { %7276 = vmatprep.subr.bf16.mxu1 %v7584_v2 }
0x1906   : > { %7247 = vmatmul.mubr.bf16.vlgmr.msra.gmra.mrb[124].mxu1 %v8645_v62 }
0x1907   : > { %7278 = vmatprep.mubr.msk.bf16.mxu1 %vm7585_vm0, %v7584_v2 }
0x19b9   : > { %v5288_v17 = vpop.f32.mrb[120].mxu1 }
0x19ba   : > { %v5295_v19 = vadd.f32 %v5288_v17, %v5136_v9  ;;  %v7228_v44 = vpop.f32.mrb[121].mxu1 }
0x19bb   : > { %v5291_v41 = vpop.f32.mrb[122].mxu1 }
0x19bc   : > { %v5296_v24 = vadd.f32 %v5291_v41, %v5137_v35  ;;  %v7229_v46 = vpop.f32.mrb[123].mxu1 }
0x19d9   : > { %v5396_v50 = vpop.f32.mrb[124].mxu1 }
0x19da   : > { %v5406_v57 = vpack.c.bf16 %v5396_v50, %v5396_v50  ;;  %v7248_v16 = vpop.f32.mrb[125].mxu1 }
0x19db   : > { %v5399_v58 = vpop.f32.mrb[126].mxu1 }
0x19dc   : > { %v5411_v4 = vsel %vm1808_vm3, %v5406_v57, 0  ;;  %v7249_v43 = vpop.f32.mrb[127].mxu1 }
0x19dd   : > { %7251 = vmatpush3.bf16.msra.mxu0 %v5411_v4 }
0x19de   : > { %7256 = vmatprep.subr.bf16.mxu0 %v7584_v2 }
0x19e0   : > { %7253 = vmatmul.mubr.msk.bf16.vlgmr.msra.gmra.mrb[128].mxu0 %vm1804_vm4, %v5405_v45 }
0x19e1   : > { %7257 = vmatpush3.bf16.msra.mxu0 %v7471_v47  ;;  %7272 = vmatprep.mubr.msk.bf16.mxu0 %vm7585_vm0, %v7584_v2 }
0x19e2   : > { %7258 = vmatprep.subr.bf16.mxu0 %v7584_v2 }
0x19e5   : > { %7259 = vmatpush3.bf16.msra.mxu0 %v7472_v12 }
0x19e6   : > { %7260 = vmatprep.subr.bf16.mxu0 %v7584_v2 }
0x19e9   : > { %7261 = vmatpush3.bf16.msra.mxu0 %v7473_v40 }
0x19ea   : > { %7262 = vmatprep.subr.bf16.mxu0 %v7584_v2 }
0x19ed   : > { %7263 = vmatpush3.bf16.msra.mxu0 %v7474_v20 }
0x19ee   : > { %7264 = vmatprep.subr.bf16.mxu0 %v7584_v2 }
0x19f1   : > { %7265 = vmatpush3.bf16.msra.mxu0 %v7475_v22 }
0x19f2   : > { %7266 = vmatprep.subr.bf16.mxu0 %v7584_v2 }
0x19f5   : > { %7267 = vmatpush3.bf16.msra.mxu0 %v7476_v42 }
0x19f6   : > { %7268 = vmatprep.subr.bf16.mxu0 %v7584_v2 }
0x19f9   : > { %7269 = vmatpush3.bf16.msra.mxu0 %v7477_v63 }
0x19fa   : > { %7270 = vmatprep.subr.bf16.mxu0 %v7584_v2 }
0x19fd   : > { %7271 = vmatpush3.bf16.msra.mxu0 %v7478_v0 }
0x1a00   : > { %7273 = vmatmul.mubr.bf16.vlgmr.msra.gmra.mrb[132].mxu0 %v8645_v62 }
0x1ab3   : > { %v5447_v48 = vpop.f32.mrb[128].mxu0 }
0x1ab4   : > { %v5454_v28 = vadd.f32 %v5447_v48, %v5295_v19  ;;  %v7254_v37 = vpop.f32.mrb[129].mxu0 }
0x1ab5   : > { %v5450_v29 = vpop.f32.mrb[130].mxu0 }
0x1ab6   : > { %v5455_v54 = vadd.f32 %v5450_v29, %v5296_v24  ;;  %v7255_v38 = vpop.f32.mrb[131].mxu0 }
0x1ad3   : > { %v5555_v30 = vpop.f32.mrb[132].mxu0 }
0x1ad4   : > { %v5565_v32 = vpack.c.bf16 %v5555_v30, %v5555_v30  ;;  %v7274_v39 = vpop.f32.mrb[133].mxu0 }
0x1ad5   : > { %v5558_v33 = vpop.f32.mrb[134].mxu0 }
0x1ad6   : > { %v5570_v1 = vsel %vm1808_vm3, %v5565_v32, 0  ;;  %v7275_v2 = vpop.f32.mrb[135].mxu0 }
0x1ad7   : > { %7277 = vmatpush3.bf16.msra.mxu1 %v5570_v1 }
0x1ada   : > { %7279 = vmatmul.mubr.msk.bf16.vlgmr.msra.gmra.mrb[128].mxu1 %vm1804_vm4, %v5564_v3 }
0x1bad   : > { %v5606_v62 = vpop.f32.mrb[128].mxu1 }
0x1bae   : > { %v5613_v6 = vadd.f32 %v5606_v62, %v5454_v28  ;;  %v7280_v34 = vpop.f32.mrb[129].mxu1 }
0x1baf   : > { %v5609_v9 = vpop.f32.mrb[130].mxu1 }
0x1bb0   : > { %v5627_v25 = vadd.f32 %v5620_v8, %v5613_v6  ;;  %v5614_v26 = vadd.f32 %v5609_v9, %v5455_v54  ;;  %v7281_v35 = vpop.f32.mrb[131].mxu1 }
0x1bb2   : > { %5630 = vst.msk [vmem:[%s1151_s2] sm:$0xff] %vm5629_vm5, %v5627_v25  ;;  %v5628_v49 = vadd.f32 %v5625_v27, %v5614_v26 }
0x1bb4   : > { %5632 = vst.msk [vmem:[%s1151_s2 + $0x8] sm:$0xf] %vm5631_vm6, %v5628_v49 }
0x1bb5 PF: > { %s87_s15 = sadd.s32 1, %s7543_s15  }
0x1bb6   : > { %p84_p4 = scmp.ge.s32.totalorder %s87_s15, 4  }
0x1bb8   :  { %86 = sbr.rel (!%p84_p4) target bundleno = 64 (0x40), region = 257 }

</bundles_post_ra>
